<compile_context>
chip_gen: v7x
topology: tpu7x:2x2x1
jax: 0.10.0
libtpu: 0.0.40
codegen_flags: <defaults>
</compile_context>

<pallas_src>
import functools

import jax
import jax.numpy as jnp
import numpy as np
from jax.experimental import pallas as pl
from jax.experimental.pallas import tpu as pltpu


def _conv_bn_kernel(x_ref, w_ref, bias_ref, o_ref, xpad_ref, pmat_ref, *,
                    H, W, H_out, W_out, KH, KW, Cin, Cin_pad, Cout,
                    padding, dilation):
    """One batch element per grid step, channel-major layout.

    x_ref:    (1, Cin, H, W)             unpadded input image (VMEM)
    w_ref:    (Cout, KH*KW*Cin_pad)      conv weights, BN scale folded, Cin-padded
    bias_ref: (Cout, 1)                  folded BN bias (f32)
    o_ref:    (1, Cout, H_out*W_out)     lane-dense output (spatial on lanes)
    xpad_ref: (Cin_pad, Hp, Wp)          VMEM scratch: zero-padded image
    pmat_ref: (KH*KW*Cin_pad, H_out*W_out) VMEM scratch: im2col patch matrix
    """
    dt = xpad_ref.dtype
    Hp = H + 2 * padding
    Wp = W + 2 * padding

    if padding == 0 and Cin_pad == Cin:
        # No spatial or channel padding needed: read the input directly.
        xp = x_ref[0]
    else:
        # Zero only the border strips (top/bottom rows, left/right columns);
        # the interior is written exactly once below.
        if padding > 0:
            xpad_ref[:, 0:padding, :] = jnp.zeros((Cin_pad, padding, Wp), dt)
            xpad_ref[:, padding + H:, :] = jnp.zeros((Cin_pad, padding, Wp), dt)
            xpad_ref[:, :, 0:padding] = jnp.zeros((Cin_pad, Hp, padding), dt)
            xpad_ref[:, :, padding + W:] = jnp.zeros((Cin_pad, Hp, padding), dt)
        # Interior of the zero channel-pad block (channels Cin..Cin_pad).
        if Cin_pad > Cin:
            xpad_ref[Cin:, padding:padding + H, padding:padding + W] = (
                jnp.zeros((Cin_pad - Cin, H, W), dt))
        # Real image data.
        xpad_ref[0:Cin, padding:padding + H, padding:padding + W] = x_ref[0]
        xp = xpad_ref[...]                                    # (Cin_pad, Hp, Wp)

    # im2col: write each (Cin_pad, H_out*W_out) tap block straight into the
    # patch-matrix scratch.  Cin_pad == 8 keeps every block one full f32
    # sublane tile, so the stores are tile-aligned (no half-tile relayouts).
    for dy in range(KH):
        for dx in range(KW):
            tap = dy * KW + dx
            oy = dy * dilation
            ox = dx * dilation
            patch = xp[:, oy:oy + H_out, ox:ox + W_out]        # (Cin_pad, H_out, W_out)
            pmat_ref[tap * Cin_pad:(tap + 1) * Cin_pad, :] = (
                patch.reshape(Cin_pad, H_out * W_out))

    # (Cout, K) @ (K, HW) -> (Cout, HW); f32 accumulation on the MXU.  Output
    # is already channel-major and lane-dense (256 lanes).
    acc = jnp.dot(w_ref[...], pmat_ref[...], preferred_element_type=jnp.float32)
    o_ref[0] = (acc + bias_ref[...]).astype(o_ref.dtype)


def basic_conv2d(x_nchw, weight_oihw, gamma, beta, running_mean, running_var,
                 *, stride=1, padding=0, dilation=1, eps=1e-5):
    """Conv2d(bias=False, stride=1) + BatchNorm2d (eval), matching BasicConv2d.forward."""
    assert stride == 1, "this kernel implements stride=1 (module default)"
    # TODO(synk): general stride support would need strided patch slicing.
    N, Cin, H, W = x_nchw.shape
    Cout, Cin_w, KH, KW = weight_oihw.shape
    assert Cin_w == Cin

    H_out = H + 2 * padding - dilation * (KH - 1)
    W_out = W + 2 * padding - dilation * (KW - 1)
    Hp = H + 2 * padding
    Wp = W + 2 * padding
    # Pad Cin up to the f32 sublane tile (8) so every im2col tap block is
    # sublane-aligned; extra K rows multiply zero weight columns (free on an
    # MXU that is far from full at K=72).
    Cin_pad = -(-Cin // 8) * 8
    K = KH * KW * Cin_pad

    # Fold BN (inference, running stats) into the conv: scale into the weights,
    # bias stays as a per-output-channel add inside the kernel.
    scale = gamma / jnp.sqrt(running_var + eps)                       # (Cout,)
    bias = beta - running_mean * scale                                # (Cout,)
    # OIHW -> (Cout, KH, KW, Cin) -> pad Cin -> (Cout, KH*KW*Cin_pad); row
    # order matches the in-kernel tap order (dy, dx, c).
    w_t = jnp.transpose(weight_oihw, (0, 2, 3, 1))
    w_t = jnp.pad(w_t, ((0, 0), (0, 0), (0, 0), (0, Cin_pad - Cin)))
    w_mat = (w_t * scale[:, None, None, None]).reshape(Cout, K)
    w_mat = w_mat.astype(x_nchw.dtype)                                # MXU-native operand dtype
    bias2d = bias.reshape(Cout, 1).astype(jnp.float32)

    kernel = functools.partial(
        _conv_bn_kernel,
        H=H, W=W, H_out=H_out, W_out=W_out, KH=KH, KW=KW,
        Cin=Cin, Cin_pad=Cin_pad, Cout=Cout,
        padding=padding, dilation=dilation)

    out_flat = pl.pallas_call(
        kernel,
        out_shape=jax.ShapeDtypeStruct((N, Cout, H_out * W_out), x_nchw.dtype),
        grid=(N,),
        in_specs=[
            pl.BlockSpec((1, Cin, H, W), lambda n: (n, 0, 0, 0)),
            pl.BlockSpec((Cout, K), lambda n: (0, 0)),
            pl.BlockSpec((Cout, 1), lambda n: (0, 0)),
        ],
        out_specs=pl.BlockSpec((1, Cout, H_out * W_out), lambda n: (n, 0, 0)),
        scratch_shapes=[
            pltpu.VMEM((Cin_pad, Hp, Wp), x_nchw.dtype),       # padded image
            pltpu.VMEM((K, H_out * W_out), x_nchw.dtype),      # im2col patch matrix
        ],
        compiler_params=pltpu.CompilerParams(dimension_semantics=("parallel",)),
    )(x_nchw, w_mat, bias2d)

    # (N, Cout, H_out*W_out) -> NCHW is a free reshape (no transpose pass).
    return out_flat.reshape(N, Cout, H_out, W_out)


def _reference(x_nchw, weight_oihw, gamma, beta, running_mean, running_var,
               *, stride=1, padding=0, dilation=1, eps=1e-5):
    conv = jax.lax.conv_general_dilated(
        x_nchw.astype(jnp.float32), weight_oihw.astype(jnp.float32),
        window_strides=(stride, stride),
        padding=((padding, padding), (padding, padding)),
        rhs_dilation=(dilation, dilation),
        dimension_numbers=("NCHW", "OIHW", "NCHW"))
    inv = gamma / jnp.sqrt(running_var + eps)
    return (conv - running_mean[None, :, None, None]) * inv[None, :, None, None] \
        + beta[None, :, None, None]


if __name__ == "__main__":
    # Small shapes consistent with the module: BasicConv2d(4, 8, kernel_size=3, padding=1)
    N, Cin, H, W = 2, 4, 16, 16
    Cout, KH, KW = 8, 3, 3
    stride, padding, dilation = 1, 1, 1

    key = jax.random.PRNGKey(0)
    k_x, k_w, k_g, k_b, k_m, k_v = jax.random.split(key, 6)

    x = jax.random.normal(k_x, (N, Cin, H, W), dtype=jnp.float32)
    weight = 0.1 * jax.random.normal(k_w, (Cout, Cin, KH, KW), dtype=jnp.float32)
    gamma = 1.0 + 0.1 * jax.random.normal(k_g, (Cout,), dtype=jnp.float32)
    beta = 0.1 * jax.random.normal(k_b, (Cout,), dtype=jnp.float32)
    running_mean = 0.05 * jax.random.normal(k_m, (Cout,), dtype=jnp.float32)
    running_var = jnp.abs(jax.random.normal(k_v, (Cout,), dtype=jnp.float32)) + 0.5

    out = basic_conv2d(x, weight, gamma, beta, running_mean, running_var,
                       stride=stride, padding=padding, dilation=dilation)
    out = jax.block_until_ready(out)

    ref = _reference(x, weight, gamma, beta, running_mean, running_var,
                     stride=stride, padding=padding, dilation=dilation)
    np.testing.assert_allclose(np.asarray(out), np.asarray(ref), atol=2e-4, rtol=2e-4)

    print("KERNEL_OK")
</pallas_src>

<mosaic_0001>
module attributes {stable_mosaic.version = 11 : i64} {
  func.func @_conv_bn_kernel(%arg0: i32, %arg1: memref<1x4x16x16xf32, #tpu.memory_space<vmem>>, %arg2: memref<8x72xf32, #tpu.memory_space<vmem>>, %arg3: memref<8x1xf32, #tpu.memory_space<vmem>>, %arg4: memref<1x8x256xf32, #tpu.memory_space<vmem>>, %arg5: memref<8x18x18xf32, #tpu.memory_space<vmem>>, %arg6: memref<72x256xf32, #tpu.memory_space<vmem>>) attributes {dimension_semantics = [#tpu.dimension_semantics<parallel>], iteration_bounds = array<i64: 2>, scalar_prefetch = 0 : i64, scratch_operands = 2 : i64, tpu.core_type = #tpu.core_type<tc>, window_params = [{transform_indices = @transform_0, window_bounds = array<i64: 1, 4, 16, 16>}, {pipeline_mode = #tpu.pipeline_mode<synchronous>, transform_indices = @transform_1, window_bounds = array<i64: 8, 72>}, {pipeline_mode = #tpu.pipeline_mode<synchronous>, transform_indices = @transform_2, window_bounds = array<i64: 8, 1>}, {transform_indices = @transform_3, window_bounds = array<i64: 1, 8, 256>}]} {
    %cst = arith.constant 0.000000e+00 : f32
    %0 = vector.broadcast %cst : f32 to vector<8x1x18xf32>
    %c0 = arith.constant 0 : index
    %c0_0 = arith.constant 0 : index
    %c0_1 = arith.constant 0 : index
    %1 = vector.load %arg5[%c0, %c0_0, %c0_1] : memref<8x18x18xf32, #tpu.memory_space<vmem>>, vector<8x1x18xf32>
    tpu.vector_store %arg5[%c0, %c0_0, %c0_1], %0 {strides = array<i32>} : memref<8x18x18xf32, #tpu.memory_space<vmem>>, vector<8x1x18xf32>,
    %cst_2 = arith.constant 0.000000e+00 : f32
    %2 = vector.broadcast %cst_2 : f32 to vector<8x1x18xf32>
    %c0_3 = arith.constant 0 : index
    %c17 = arith.constant 17 : index
    %c0_4 = arith.constant 0 : index
    %3 = vector.load %arg5[%c0_3, %c17, %c0_4] : memref<8x18x18xf32, #tpu.memory_space<vmem>>, vector<8x1x18xf32>
    tpu.vector_store %arg5[%c0_3, %c17, %c0_4], %2 {strides = array<i32>} : memref<8x18x18xf32, #tpu.memory_space<vmem>>, vector<8x1x18xf32>,
    %cst_5 = arith.constant 0.000000e+00 : f32
    %4 = vector.broadcast %cst_5 : f32 to vector<8x18x1xf32>
    %c0_6 = arith.constant 0 : index
    %c0_7 = arith.constant 0 : index
    %c0_8 = arith.constant 0 : index
    %5 = vector.load %arg5[%c0_6, %c0_7, %c0_8] : memref<8x18x18xf32, #tpu.memory_space<vmem>>, vector<8x18x1xf32>
    tpu.vector_store %arg5[%c0_6, %c0_7, %c0_8], %4 {strides = array<i32>} : memref<8x18x18xf32, #tpu.memory_space<vmem>>, vector<8x18x1xf32>,
    %cst_9 = arith.constant 0.000000e+00 : f32
    %6 = vector.broadcast %cst_9 : f32 to vector<8x18x1xf32>
    %c0_10 = arith.constant 0 : index
    %c0_11 = arith.constant 0 : index
    %c17_12 = arith.constant 17 : index
    %7 = vector.load %arg5[%c0_10, %c0_11, %c17_12] : memref<8x18x18xf32, #tpu.memory_space<vmem>>, vector<8x18x1xf32>
    tpu.vector_store %arg5[%c0_10, %c0_11, %c17_12], %6 {strides = array<i32>} : memref<8x18x18xf32, #tpu.memory_space<vmem>>, vector<8x18x1xf32>,
    %cst_13 = arith.constant 0.000000e+00 : f32
    %8 = vector.broadcast %cst_13 : f32 to vector<4x16x16xf32>
    %c4 = arith.constant 4 : index
    %c1 = arith.constant 1 : index
    %c1_14 = arith.constant 1 : index
    %9 = vector.load %arg5[%c4, %c1, %c1_14] : memref<8x18x18xf32, #tpu.memory_space<vmem>>, vector<4x16x16xf32>
    tpu.vector_store %arg5[%c4, %c1, %c1_14], %8 {strides = array<i32>} : memref<8x18x18xf32, #tpu.memory_space<vmem>>, vector<4x16x16xf32>,
    %c0_15 = arith.constant 0 : index
    %c0_16 = arith.constant 0 : index
    %c0_17 = arith.constant 0 : index
    %c0_18 = arith.constant 0 : index
    %10 = vector.load %arg1[%c0_15, %c0_16, %c0_17, %c0_18] : memref<1x4x16x16xf32, #tpu.memory_space<vmem>>, vector<1x4x16x16xf32>
    %11 = vector.shape_cast %10 : vector<1x4x16x16xf32> to vector<4x16x16xf32>
    %c0_19 = arith.constant 0 : index
    %c1_20 = arith.constant 1 : index
    %c1_21 = arith.constant 1 : index
    %12 = vector.load %arg5[%c0_19, %c1_20, %c1_21] : memref<8x18x18xf32, #tpu.memory_space<vmem>>, vector<4x16x16xf32>
    tpu.vector_store %arg5[%c0_19, %c1_20, %c1_21], %11 {strides = array<i32>} : memref<8x18x18xf32, #tpu.memory_space<vmem>>, vector<4x16x16xf32>,
    %c0_22 = arith.constant 0 : index
    %c0_23 = arith.constant 0 : index
    %c0_24 = arith.constant 0 : index
    %13 = vector.load %arg5[%c0_22, %c0_23, %c0_24] : memref<8x18x18xf32, #tpu.memory_space<vmem>>, vector<8x18x18xf32>
    %14 = vector.extract_strided_slice %13 {offsets = [0, 0, 0], sizes = [8, 16, 16], strides = [1, 1, 1]} : vector<8x18x18xf32> to vector<8x16x16xf32>
    %15 = vector.shape_cast %14 : vector<8x16x16xf32> to vector<8x256xf32>
    %c0_25 = arith.constant 0 : index
    %c0_26 = arith.constant 0 : index
    %16 = vector.load %arg6[%c0_25, %c0_26] : memref<72x256xf32, #tpu.memory_space<vmem>>, vector<8x256xf32>
    tpu.vector_store %arg6[%c0_25, %c0_26], %15 {strides = array<i32>} : memref<72x256xf32, #tpu.memory_space<vmem>>, vector<8x256xf32>,
    %17 = vector.extract_strided_slice %13 {offsets = [0, 0, 1], sizes = [8, 16, 16], strides = [1, 1, 1]} : vector<8x18x18xf32> to vector<8x16x16xf32>
    %18 = vector.shape_cast %17 : vector<8x16x16xf32> to vector<8x256xf32>
    %c8 = arith.constant 8 : index
    %c0_27 = arith.constant 0 : index
    %19 = vector.load %arg6[%c8, %c0_27] : memref<72x256xf32, #tpu.memory_space<vmem>>, vector<8x256xf32>
    tpu.vector_store %arg6[%c8, %c0_27], %18 {strides = array<i32>} : memref<72x256xf32, #tpu.memory_space<vmem>>, vector<8x256xf32>,
    %20 = vector.extract_strided_slice %13 {offsets = [0, 0, 2], sizes = [8, 16, 16], strides = [1, 1, 1]} : vector<8x18x18xf32> to vector<8x16x16xf32>
    %21 = vector.shape_cast %20 : vector<8x16x16xf32> to vector<8x256xf32>
    %c16 = arith.constant 16 : index
    %c0_28 = arith.constant 0 : index
    %22 = vector.load %arg6[%c16, %c0_28] : memref<72x256xf32, #tpu.memory_space<vmem>>, vector<8x256xf32>
    tpu.vector_store %arg6[%c16, %c0_28], %21 {strides = array<i32>} : memref<72x256xf32, #tpu.memory_space<vmem>>, vector<8x256xf32>,
    %23 = vector.extract_strided_slice %13 {offsets = [0, 1, 0], sizes = [8, 16, 16], strides = [1, 1, 1]} : vector<8x18x18xf32> to vector<8x16x16xf32>
    %24 = vector.shape_cast %23 : vector<8x16x16xf32> to vector<8x256xf32>
    %c24 = arith.constant 24 : index
    %c0_29 = arith.constant 0 : index
    %25 = vector.load %arg6[%c24, %c0_29] : memref<72x256xf32, #tpu.memory_space<vmem>>, vector<8x256xf32>
    tpu.vector_store %arg6[%c24, %c0_29], %24 {strides = array<i32>} : memref<72x256xf32, #tpu.memory_space<vmem>>, vector<8x256xf32>,
    %26 = vector.extract_strided_slice %13 {offsets = [0, 1, 1], sizes = [8, 16, 16], strides = [1, 1, 1]} : vector<8x18x18xf32> to vector<8x16x16xf32>
    %27 = vector.shape_cast %26 : vector<8x16x16xf32> to vector<8x256xf32>
    %c32 = arith.constant 32 : index
    %c0_30 = arith.constant 0 : index
    %28 = vector.load %arg6[%c32, %c0_30] : memref<72x256xf32, #tpu.memory_space<vmem>>, vector<8x256xf32>
    tpu.vector_store %arg6[%c32, %c0_30], %27 {strides = array<i32>} : memref<72x256xf32, #tpu.memory_space<vmem>>, vector<8x256xf32>,
    %29 = vector.extract_strided_slice %13 {offsets = [0, 1, 2], sizes = [8, 16, 16], strides = [1, 1, 1]} : vector<8x18x18xf32> to vector<8x16x16xf32>
    %30 = vector.shape_cast %29 : vector<8x16x16xf32> to vector<8x256xf32>
    %c40 = arith.constant 40 : index
    %c0_31 = arith.constant 0 : index
    %31 = vector.load %arg6[%c40, %c0_31] : memref<72x256xf32, #tpu.memory_space<vmem>>, vector<8x256xf32>
    tpu.vector_store %arg6[%c40, %c0_31], %30 {strides = array<i32>} : memref<72x256xf32, #tpu.memory_space<vmem>>, vector<8x256xf32>,
    %32 = vector.extract_strided_slice %13 {offsets = [0, 2, 0], sizes = [8, 16, 16], strides = [1, 1, 1]} : vector<8x18x18xf32> to vector<8x16x16xf32>
    %33 = vector.shape_cast %32 : vector<8x16x16xf32> to vector<8x256xf32>
    %c48 = arith.constant 48 : index
    %c0_32 = arith.constant 0 : index
    %34 = vector.load %arg6[%c48, %c0_32] : memref<72x256xf32, #tpu.memory_space<vmem>>, vector<8x256xf32>
    tpu.vector_store %arg6[%c48, %c0_32], %33 {strides = array<i32>} : memref<72x256xf32, #tpu.memory_space<vmem>>, vector<8x256xf32>,
    %35 = vector.extract_strided_slice %13 {offsets = [0, 2, 1], sizes = [8, 16, 16], strides = [1, 1, 1]} : vector<8x18x18xf32> to vector<8x16x16xf32>
    %36 = vector.shape_cast %35 : vector<8x16x16xf32> to vector<8x256xf32>
    %c56 = arith.constant 56 : index
    %c0_33 = arith.constant 0 : index
    %37 = vector.load %arg6[%c56, %c0_33] : memref<72x256xf32, #tpu.memory_space<vmem>>, vector<8x256xf32>
    tpu.vector_store %arg6[%c56, %c0_33], %36 {strides = array<i32>} : memref<72x256xf32, #tpu.memory_space<vmem>>, vector<8x256xf32>,
    %38 = vector.extract_strided_slice %13 {offsets = [0, 2, 2], sizes = [8, 16, 16], strides = [1, 1, 1]} : vector<8x18x18xf32> to vector<8x16x16xf32>
    %39 = vector.shape_cast %38 : vector<8x16x16xf32> to vector<8x256xf32>
    %c64 = arith.constant 64 : index
    %c0_34 = arith.constant 0 : index
    %40 = vector.load %arg6[%c64, %c0_34] : memref<72x256xf32, #tpu.memory_space<vmem>>, vector<8x256xf32>
    tpu.vector_store %arg6[%c64, %c0_34], %39 {strides = array<i32>} : memref<72x256xf32, #tpu.memory_space<vmem>>, vector<8x256xf32>,
    %c0_35 = arith.constant 0 : index
    %c0_36 = arith.constant 0 : index
    %41 = vector.load %arg2[%c0_35, %c0_36] : memref<8x72xf32, #tpu.memory_space<vmem>>, vector<8x72xf32>
    %c0_37 = arith.constant 0 : index
    %c0_38 = arith.constant 0 : index
    %42 = vector.load %arg6[%c0_37, %c0_38] : memref<72x256xf32, #tpu.memory_space<vmem>>, vector<72x256xf32>
    %cst_39 = arith.constant dense<0.000000e+00> : vector<8x256xf32>
    %43 = tpu.matmul %41, %42, %cst_39 {dimension_numbers = #tpu.dot_dimension_numbers<[1], [0], [0], [1], [0, 0, 1, 1], [], []>} : vector<8x72xf32>, vector<72x256xf32>, vector<8x256xf32> -> vector<8x256xf32>
    %c0_40 = arith.constant 0 : index
    %c0_41 = arith.constant 0 : index
    %44 = vector.load %arg3[%c0_40, %c0_41] : memref<8x1xf32, #tpu.memory_space<vmem>>, vector<8x1xf32>
    %45 = vector.broadcast %44 : vector<8x1xf32> to vector<8x256xf32>
    %46 = arith.addf %43, %45 : vector<8x256xf32>
    %c0_42 = arith.constant 0 : index
    %c0_43 = arith.constant 0 : index
    %c0_44 = arith.constant 0 : index
    %47 = vector.load %arg4[%c0_42, %c0_43, %c0_44] : memref<1x8x256xf32, #tpu.memory_space<vmem>>, vector<1x8x256xf32>
    %48 = vector.shape_cast %47 : vector<1x8x256xf32> to vector<8x256xf32>
    %49 = vector.shape_cast %46 : vector<8x256xf32> to vector<1x8x256xf32>
    tpu.vector_store %arg4[%c0_42, %c0_43, %c0_44], %49 {strides = array<i32>} : memref<1x8x256xf32, #tpu.memory_space<vmem>>, vector<1x8x256xf32>,
    return
  }
  func.func @transform_0(%arg0: i32) -> (i32, i32, i32, i32) {
    %c0_i32 = arith.constant 0 : i32
    %c0_i32_0 = arith.constant 0 : i32
    %c0_i32_1 = arith.constant 0 : i32
    %c0_i32_2 = arith.constant 0 : i32
    return %arg0, %c0_i32, %c0_i32_0, %c0_i32_1 : i32, i32, i32, i32
  }
  func.func @transform_1(%arg0: i32) -> (i32, i32) {
    %c0_i32 = arith.constant 0 : i32
    %c0_i32_0 = arith.constant 0 : i32
    %c0_i32_1 = arith.constant 0 : i32
    return %c0_i32, %c0_i32_0 : i32, i32
  }
  func.func @transform_2(%arg0: i32) -> (i32, i32) {
    %c0_i32 = arith.constant 0 : i32
    %c0_i32_0 = arith.constant 0 : i32
    %c0_i32_1 = arith.constant 0 : i32
    return %c0_i32, %c0_i32_0 : i32, i32
  }
  func.func @transform_3(%arg0: i32) -> (i32, i32, i32) {
    %c0_i32 = arith.constant 0 : i32
    %c0_i32_0 = arith.constant 0 : i32
    %c0_i32_1 = arith.constant 0 : i32
    return %arg0, %c0_i32, %c0_i32_0 : i32, i32, i32
  }
}

</mosaic_0001>

<bundles_post_ra>
// kernel: tpu_custom_call.1
= control target key start
LH: loop header
LB: loop body
LE: loop exit
PB: predicated region body
PF: predicated region fallthrough
CT: control target
= control target key end

     0   :  { %8 = vsyncpa [#allocation5], 0  ;;  %s7297_s0 = inlined_call_operand.hbm [shape: f32[2,4,16,16], index: 0, kind: input, shape index: {}]   ;;  %s7298_s1 = inlined_call_operand.vmem [shape: f32[8,72], index: 1, kind: input, shape index: {}]   ;;  %s7299_s2 = inlined_call_operand.vmem [shape: f32[8,1], index: 2, kind: input, shape index: {}]   ;;  %s7300_s3 = inlined_call_operand.hbm [shape: f32[2,8,256], index: 3, kind: output, shape index: {}]  }
   0x1   :  { %10 = vsyncpa [#allocation5 + $0x1], 0 }
   0x2   :  { %11 = vsyncpa [#allocation6], 0 }
   0x3   :  { %13 = vsyncpa [#allocation6 + $0x1], 0  ;;  %s4574_s12 = smov 0   ;;  %s4576_s13 = smov 0  }
   0x4   :  { %s4578_s14 = smov 0   ;;  %s4580_s15 = smov 0  }
   0x5 LB: > { %s4595_s16 = sadd.s32 4294967295, %s4534_s15   ;;  %s4056_s17 = sadd.s32 4294967294, %s4534_s15   ;;  %s4534_s15 = sphi %s4580_s15, %s7732_s15   ;;  %s4530_s14 = sphi %s4578_s14, %s7731_s14   ;;  %s4526_s13 = sphi %s4576_s13, %s7730_s13   ;;  %s4522_s12 = sphi %s4574_s12, %s7729_s12  }
   0x6   : > { %s4599_s18 = sadd.s32 1, %s4534_s15   ;;  %s26_s19 = sadd.s32 1, %s4530_s14 }
   0x7   : > { %s23_s20 = ssub.s32 %s4534_s15, %s4599_s18  ;;  %p33_p0 = scmp.ne.s32.totalorder %s4530_s14, %s4526_s13 }
   0x8   : > { %p24_p1 = scmp.eq.s32.totalorder %s23_s20, 0  ;;  %p34_p2 = scmp.eq.s32.totalorder %s4534_s15, 0 }
   0x9   : > { %p39_p3 = scmp.ne.s32.totalorder %s4526_s13, %s4522_s12  ;;  %p40_p4 = scmp.eq.s32.totalorder %s4595_s16, 0 }
   0xa   : > { %s4611_s21 = scalar_select %p24_p1, %s4530_s14, %s26_s19  }
   0xb   : > { %p4613_p5 = por %p34_p2, %p33_p0  ;;  %p4617_p6 = por %p40_p4, %p39_p3 }
   0xc   : > { %p105_p7 = scmp.eq.s32.totalorder %s4595_s16, 1  ;;  %p111_p8 = scmp.eq.s32.totalorder %s4056_s17, 1 }
   0xd   : > { %p4101_p10 = scmp.lt.s32.totalorder %s4534_s15, 2  ;;  %s137_s26 = sand.u32 1, %s4530_s14  }
   0xe   : > { %p4624_p11 = por %p105_p7, %p33_p0  ;;  %p4628_p12 = por %p111_p8, %p39_p3 }
   0xf   : > { %s4071_s27 = sshll.u32 %s4534_s15, 10  ;;  %s4059_s28 = sshll.u32 %s137_s26, 6 }
  0x10   : > { %s7440_s24 = scalar_select %p4624_p11, 1, 0 }
  0x11   : > { %s7441_s25 = scalar_select %p4628_p12, 1, 0 }
  0x12   : > { %s4637_s4 = scalar_lea.hbm %s7297_s0, %s4071_s27  ;;  %s141_s5 = scalar_lea.vmem [#allocation4], %s4059_s28 }
  0x13   : > { %s148_s6 = sshll.u32 %s141_s5, 4  ;;  %p4641_p13 = pnand %p4101_p10, %p4613_p5  ;;  %s4645_s6 = int_to_ptr.vmem [resolvable:$true] %s148_s6 }
  0x14   : > { %s4647_s8 = scalar_lea.sflag [#allocation5], %s137_s26  ;;  %s4438_s9 = scalar_lea.hbm %s4637_s4, 1024 }
  0x15   : > { %p4439_p0 = scmp.ne.s32.totalorder %s4637_s4, %s4438_s9  ;;  %p4440_p1 = pneg %p4641_p13 }
  0x16   : > { %s4443_s17 = scalar_lea.hbm %s7297_s0, 2048  ;;  %p4444_p4 = scmp.lt.u32.totalorder %s4637_s4, %s7297_s0 }
  0x17   : > { %p4441_p2 = pnand %p4440_p1, %p4439_p0  ;;  %p4445_p5 = scmp.lt.u32.totalorder %s4443_s17, %s4438_s9 }
  0x18   : > { %p4447_p8 = scmp.lt.u32.totalorder %s4438_s9, %s4637_s4 }
  0x19   : > { %p4442_p3 = pneg %p4441_p2  ;;  %p4446_p7 = por %p4445_p5, %p4444_p4 }
  0x1b   : > { %p4448_p10 = por %p4447_p8, %p4446_p7 }
  0x1d   : > { %p4449_p9 = pnand %p4448_p10, %p4442_p3 }
  0x1f   : > { %4452 = shalt.err (!%p4449_p9)
}
  0x20   : > { %s4453_s22 = scalar_lea.vmem %s4645_s6, 1024  ;;  %s4536_s26 = smov [#allocation4]  }
  0x21   : > { %p4454_p0 = scmp.ne.s32.totalorder %s4645_s6, %s4453_s22  ;;  %s4458_s27 = sshll.u32 %s4536_s26, 4  ;;  %s4459_s27 = int_to_ptr.vmem [resolvable:$false] %s4458_s27 }
  0x22   : > { %s4460_s28 = scalar_lea.vmem %s4459_s27, 2048  ;;  %p4461_p11 = scmp.lt.s32.totalorder %s4645_s6, %s4459_s27 }
  0x23   : > { %p4456_p2 = pnand %p4454_p0, %p4440_p1  ;;  %p4462_p4 = scmp.lt.s32.totalorder %s4460_s28, %s4453_s22 }
  0x25   : > { %p4457_p12 = pneg %p4456_p2  ;;  %p4463_p5 = por %p4462_p4, %p4461_p11 }
  0x27   : > { %p4464_p7 = pnand %p4463_p5, %p4457_p12 }
  0x29   : > { %4467 = shalt.err (!%p4464_p7)
}
  0x2a   : > { %s4537_s29 = smov 128   ;;  %s4538_s30 = smov 8  }
  0x2b   : > { %4096 = dma.hbm_to_vmem [thread:$0]  (!%p4641_p13), %s4637_s4, 1024, %s4645_s6, %s4647_s8, %s4537_s29, %s4537_s29, %s4538_s30  }
  0x2c   : > { %p4062_p9 = scmp.ge.s32.totalorder %s4534_s15, 1  ;;  %p156_p1 = scmp.lt.s32.totalorder %s4534_s15, 3 }
  0x2e   : > { %p157_p3 = pnand %p4062_p9, %p156_p1 }
  0x30   : > { %160 = sbr.rel (%p157_p3) target bundleno = 838 (0x346), region = 32 }
  0x37   : > { %s4678_s5 = sand.u32 1, %s4526_s13  }
  0x38   : > { %s4063_s9 = sshll.u32 %s4678_s5, 6  ;;  %s163_s10 = scalar_lea.sflag [#allocation5], %s4678_s5 }
  0x39   : > { %s4682_s11 = scalar_lea.vmem [#allocation4], %s4063_s9 }
  0x3a   : > { %4513 = dma.done.wait (%p4617_p6), %s163_s10, 1024  }
  0x3b   : > { %4515 = vsyncadd (%p4617_p6), %s163_s10, 4294966272  ;;  %vm189_vm0 = vcmask 139264   ;;  %vm206_vm1 = vcmask 7168   ;;  %vm209_vm2 = vcmask 1024   ;;  %v4539_v0 = vmov 0.0   ;;  %v270_v1 = vld [vmem:[%s4682_s11 + $0x10] sm:$0xff] }
  0x3c   : > { %194 = vst.msk [vmem:[#allocation2 + $0x60] sm:$0x1] %vm189_vm0, %v4539_v0  ;;  %202 = vst.msk [vmem:[#allocation2 + $0x71] sm:$0x1] %vm189_vm0, %v4539_v0  ;;  %vm232_vm3 = vcmask 146568   ;;  %vm235_vm4 = vcmask 140424   ;;  %3962 = vmatprep.mubr.f32.mxu0 %v4539_v0  ;;  %v345_v3 = vlaneseq }
  0x3d   : > { %221 = vst.msk [vmem:[#allocation2 + $0x68] sm:$0xff] %vm206_vm1, %v4539_v0  ;;  %vm259_vm5 = vcmask 138248   ;;  %208 = vst.msk [vmem:[#allocation2 + $0x8] sm:$0xff] %vm206_vm1, %v4539_v0  ;;  %v268_v2 = vld [vmem:[%s4682_s11] sm:$0xff]  ;;  %s4540_s23 = smov 1   ;;  %v271_v4 = vld [vmem:[%s4682_s11 + $0x18] sm:$0xff] }
  0x3e   : > { %190 = vst.msk [vmem:[#allocation2] sm:$0x1] %vm189_vm0, %v4539_v0  ;;  %191 = vst.msk [vmem:[#allocation2 + $0x18] sm:$0x1] %vm189_vm0, %v4539_v0  ;;  %288 = vrot.lane.b32.xlu1 %v270_v1, %s4540_s23  ;;  %284 = vrot.lane.b32.xlu0 %v268_v2, %s4540_s23  ;;  %v269_v5 = vld [vmem:[%s4682_s11 + $0x8] sm:$0xff]  ;;  %v272_v9 = vld [vmem:[%s4682_s11 + $0x20] sm:$0xff] }
  0x3f   : > { %192 = vst.msk [vmem:[#allocation2 + $0x30] sm:$0x1] %vm189_vm0, %v4539_v0  ;;  %193 = vst.msk [vmem:[#allocation2 + $0x48] sm:$0x1] %vm189_vm0, %v4539_v0  ;;  %v4541_v6 = vmov 1983009808  }
  0x40   : > { %195 = vst.msk [vmem:[#allocation2 + $0x78] sm:$0x1] %vm189_vm0, %v4539_v0  ;;  %196 = vst.msk [vmem:[#allocation2 + $0x90] sm:$0x1] %vm189_vm0, %v4539_v0  ;;  %v343_v7 = vunpack.c.l.s4 %v4541_v6  ;;  %v273_v8 = vld [vmem:[%s4682_s11 + $0x28] sm:$0xff]  ;;  %vm1499_vm6 = vcmask 1046528  }
  0x41   : > { %197 = vst.msk [vmem:[#allocation2 + $0xa8] sm:$0x1] %vm189_vm0, %v4539_v0  ;;  %198 = vst.msk [vmem:[#allocation2 + $0x11] sm:$0x1] %vm189_vm0, %v4539_v0  ;;  %v4849_v13 = vshrl.u32 %v345_v3, 7  ;;  %v275_v28 = vld [vmem:[%s4682_s11 + $0x38] sm:$0xff] }
  0x42   : > { %199 = vst.msk [vmem:[#allocation2 + $0x29] sm:$0x1] %vm189_vm0, %v4539_v0  ;;  %200 = vst.msk [vmem:[#allocation2 + $0x41] sm:$0x1] %vm189_vm0, %v4539_v0  ;;  %290 = vrot.lane.b32.xlu1 %v271_v4, %s4540_s23  ;;  %286 = vrot.lane.b32.xlu0 %v269_v5, %s4540_s23  ;;  %v344_v18 = vunpack.c.0.s8 %v343_v7  ;;  %v274_v29 = vld [vmem:[%s4682_s11 + $0x30] sm:$0xff]  ;;  %s4542_s4 = smov 127  }
  0x43   : > { %201 = vst.msk [vmem:[#allocation2 + $0x59] sm:$0x1] %vm189_vm0, %v4539_v0  ;;  %203 = vst.msk [vmem:[#allocation2 + $0x89] sm:$0x1] %vm189_vm0, %v4539_v0  ;;  %s4543_s6 = smov 126   ;;  %vm2684_vm7 = vcmask 1045504  }
  0x44   : > { %204 = vst.msk [vmem:[#allocation2 + $0xa1] sm:$0x1] %vm189_vm0, %v4539_v0  ;;  %205 = vst.msk [vmem:[#allocation2 + $0xb9] sm:$0x1] %vm189_vm0, %v4539_v0  ;;  %v4879_v31 = vsub.s32 %v344_v18, %v4849_v13  ;;  %s4545_s7 = smov 32   ;;  %s4546_s8 = smov 64  }
  0x45   : > { %212 = vst.msk [vmem:[#allocation2 + $0x20] sm:$0xff] %vm206_vm1, %v4539_v0  ;;  %215 = vst.msk [vmem:[#allocation2 + $0x38] sm:$0xff] %vm206_vm1, %v4539_v0  ;;  %s4547_s17 = smov 16   ;;  %s4548_s19 = smov 96   ;;  %vm668_vm8 = vcmask 130048   ;;  %vm670_vm9 = vcmask 261120  }
  0x46   : > { %218 = vst.msk [vmem:[#allocation2 + $0x50] sm:$0xff] %vm206_vm1, %v4539_v0  ;;  %224 = vst.msk [vmem:[#allocation2 + $0x80] sm:$0xff] %vm206_vm1, %v4539_v0  ;;  %294 = vrot.lane.b32.xlu1 %v273_v8, %s4540_s23  ;;  %292 = vrot.lane.b32.xlu0 %v272_v9, %s4540_s23  ;;  %s4549_s20 = smov 48   ;;  %s4550_s22 = smov 80   ;;  %vm672_vm10 = vcmask 392192   ;;  %vm674_vm11 = vcmask 523264  }
  0x47   : > { %227 = vst.msk [vmem:[#allocation2 + $0x98] sm:$0xff] %vm206_vm1, %v4539_v0  ;;  %230 = vst.msk [vmem:[#allocation2 + $0xb0] sm:$0xff] %vm206_vm1, %v4539_v0  ;;  %s4551_s26 = smov 112   ;;  %vm676_vm12 = vcmask 654336   ;;  %vm678_vm13 = vcmask 785408   ;;  %vm680_vm14 = vcmask 916480  }
  0x48   : > { %220 = vst.msk [vmem:[#allocation2 + $0x60] sm:$0xff] %vm206_vm1, %v4539_v0  ;;  %223 = vst.msk [vmem:[#allocation2 + $0x78] sm:$0xff] %vm206_vm1, %v4539_v0  ;;  %vm3894_vm15 = vcmask 588800   ;;  %s4064_s9 = sshll.u32 %s4678_s5, 4  ;;  %s4072_s10 = sshll.u32 %s4595_s16, 8 }
  0x49   : > { %222 = vst.msk [vmem:[#allocation2 + $0x70] sm:$0x3] %vm209_vm2, %v4539_v0  ;;  %225 = vst.msk [vmem:[#allocation2 + $0x88] sm:$0x3] %vm209_vm2, %v4539_v0  ;;  %s188_s11 = scalar_lea.vmem [#allocation7], %s4064_s9  ;;  %p7726_p11 = scmp.ne.s32.totalorder %s7440_s24, 0 }
  0x4a   : > { %247 = vst.msk [vmem:[#allocation2 + $0x68] sm:$0xff] %vm232_vm3, %v4539_v0  ;;  %250 = vst.msk [vmem:[#allocation2 + $0x80] sm:$0xff] %vm232_vm3, %v4539_v0  ;;  %298 = vrot.lane.b32.xlu1 %v275_v28, %s4540_s23  ;;  %296 = vrot.lane.b32.xlu0 %v274_v29, %s4540_s23  ;;  %s3986_s23 = sshll.u32 %s188_s11, 4  ;;  %s7255_s23 = int_to_ptr.vmem [resolvable:$true] %s3986_s23 }
  0x4b   : > { %207 = vst.msk [vmem:[#allocation2] sm:$0xff] %vm206_vm1, %v4539_v0  ;;  %211 = vst.msk [vmem:[#allocation2 + $0x18] sm:$0xff] %vm206_vm1, %v4539_v0  ;;  %s4468_s16 = scalar_lea.vmem %s7255_s23, 256 }
  0x4c   : > { %210 = vst.msk [vmem:[#allocation2 + $0x10] sm:$0x3] %vm209_vm2, %v4539_v0  ;;  %213 = vst.msk [vmem:[#allocation2 + $0x28] sm:$0x3] %vm209_vm2, %v4539_v0  ;;  %p4469_p6 = scmp.ne.s32.totalorder %s7255_s23, %s4468_s16 }
  0x4d   : > { %214 = vst.msk [vmem:[#allocation2 + $0x30] sm:$0xff] %vm206_vm1, %v4539_v0  ;;  %217 = vst.msk [vmem:[#allocation2 + $0x48] sm:$0xff] %vm206_vm1, %v4539_v0 }
  0x4e   : > { %216 = vst.msk [vmem:[#allocation2 + $0x40] sm:$0x3] %vm209_vm2, %v4539_v0  ;;  %219 = vst.msk [vmem:[#allocation2 + $0x58] sm:$0x3] %vm209_vm2, %v4539_v0  ;;  %p4470_p12 = pnand %p4469_p6, %p7726_p11 }
  0x4f   : > { %226 = vst.msk [vmem:[#allocation2 + $0x90] sm:$0xff] %vm206_vm1, %v4539_v0  ;;  %229 = vst.msk [vmem:[#allocation2 + $0xa8] sm:$0xff] %vm206_vm1, %v4539_v0 }
  0x50   : > { %228 = vst.msk [vmem:[#allocation2 + $0xa0] sm:$0x3] %vm209_vm2, %v4539_v0  ;;  %231 = vst.msk [vmem:[#allocation2 + $0xb8] sm:$0x3] %vm209_vm2, %v4539_v0  ;;  %p4471_p13 = pneg %p4470_p12 }
  0x51   : > { %234 = vst.msk [vmem:[#allocation2 + $0x8] sm:$0xff] %vm232_vm3, %v4539_v0  ;;  %238 = vst.msk [vmem:[#allocation2 + $0x20] sm:$0xff] %vm232_vm3, %v4539_v0 }
  0x52   : > { %241 = vst.msk [vmem:[#allocation2 + $0x38] sm:$0xff] %vm232_vm3, %v4539_v0  ;;  %244 = vst.msk [vmem:[#allocation2 + $0x50] sm:$0xff] %vm232_vm3, %v4539_v0 }
  0x53   : > { %253 = vst.msk [vmem:[#allocation2 + $0x98] sm:$0xff] %vm232_vm3, %v4539_v0  ;;  %256 = vst.msk [vmem:[#allocation2 + $0xb0] sm:$0xff] %vm232_vm3, %v4539_v0 }
  0x54   : > { %246 = vst.msk [vmem:[#allocation2 + $0x60] sm:$0xff] %vm232_vm3, %v4539_v0  ;;  %249 = vst.msk [vmem:[#allocation2 + $0x78] sm:$0xff] %vm232_vm3, %v4539_v0 }
  0x55   : > { %248 = vst.msk [vmem:[#allocation2 + $0x70] sm:$0x3] %vm235_vm4, %v4539_v0  ;;  %251 = vst.msk [vmem:[#allocation2 + $0x88] sm:$0x3] %vm235_vm4, %v4539_v0 }
  0x56   : > { %233 = vst.msk [vmem:[#allocation2] sm:$0xff] %vm232_vm3, %v4539_v0  ;;  %237 = vst.msk [vmem:[#allocation2 + $0x18] sm:$0xff] %vm232_vm3, %v4539_v0 }
  0x57   : > { %236 = vst.msk [vmem:[#allocation2 + $0x10] sm:$0x3] %vm235_vm4, %v4539_v0  ;;  %239 = vst.msk [vmem:[#allocation2 + $0x28] sm:$0x3] %vm235_vm4, %v4539_v0 }
  0x58   : > { %240 = vst.msk [vmem:[#allocation2 + $0x30] sm:$0xff] %vm232_vm3, %v4539_v0  ;;  %243 = vst.msk [vmem:[#allocation2 + $0x48] sm:$0xff] %vm232_vm3, %v4539_v0 }
  0x59   : > { %242 = vst.msk [vmem:[#allocation2 + $0x40] sm:$0x3] %vm235_vm4, %v4539_v0  ;;  %245 = vst.msk [vmem:[#allocation2 + $0x58] sm:$0x3] %vm235_vm4, %v4539_v0 }
  0x5a   : > { %252 = vst.msk [vmem:[#allocation2 + $0x90] sm:$0xff] %vm232_vm3, %v4539_v0  ;;  %255 = vst.msk [vmem:[#allocation2 + $0xa8] sm:$0xff] %vm232_vm3, %v4539_v0 }
  0x5b   : > { %254 = vst.msk [vmem:[#allocation2 + $0xa0] sm:$0x3] %vm235_vm4, %v4539_v0  ;;  %257 = vst.msk [vmem:[#allocation2 + $0xb8] sm:$0x3] %vm235_vm4, %v4539_v0 }
  0x5c   : > { %260 = vst.msk [vmem:[#allocation2 + $0x61] sm:$0xff] %vm259_vm5, %v4539_v0  ;;  %261 = vst.msk [vmem:[#allocation2 + $0x69] sm:$0xff] %vm259_vm5, %v4539_v0 }
  0x5d   : > { %262 = vst.msk [vmem:[#allocation2 + $0x79] sm:$0xff] %vm259_vm5, %v4539_v0  ;;  %263 = vst.msk [vmem:[#allocation2 + $0x81] sm:$0xff] %vm259_vm5, %v4539_v0 }
  0x5e   : > { %264 = vst.msk [vmem:[#allocation2 + $0x91] sm:$0xff] %vm259_vm5, %v4539_v0  ;;  %265 = vst.msk [vmem:[#allocation2 + $0x99] sm:$0xff] %vm259_vm5, %v4539_v0 }
  0x5f   : > { %266 = vst.msk [vmem:[#allocation2 + $0xa9] sm:$0xff] %vm259_vm5, %v4539_v0  ;;  %267 = vst.msk [vmem:[#allocation2 + $0xb1] sm:$0xff] %vm259_vm5, %v4539_v0 }
  0x63   : > { %v4843_v10 = vld [vmem:[#allocation2 + $0x68] sm:$0xff]  ;;  %v4853_v15 = vld [vmem:[#allocation2 + $0x70] sm:$0x3]  ;;  %v4906_v39 = vld [vmem:[#allocation2 + $0x60] sm:$0xff] }
  0x64   : > { %v4845_v11 = vld [vmem:[#allocation2 + $0x80] sm:$0xff]  ;;  %v1521_v16 = vrot.slane %v4843_v10, 1  ;;  %v1523_v20 = vrot.slane %v4853_v15, 1  ;;  %v4859_v21 = vld [vmem:[#allocation2 + $0x88] sm:$0x3]  ;;  %v4914_v42 = vld [vmem:[#allocation2 + $0x78] sm:$0xff]  ;;  %725 = vrot.lane.b32.xlu0 %v4843_v10, %s4542_s4  ;;  %723 = vrot.lane.b32.xlu1 %v4906_v39, %s4542_s4 }
  0x65   : > { %v4847_v12 = vld [vmem:[#allocation2 + $0x98] sm:$0xff]  ;;  %v1526_v17 = vrot.slane %v4845_v11, 1  ;;  %v4861_v22 = vld [vmem:[#allocation2 + $0xa0] sm:$0x3]  ;;  %v1528_v24 = vrot.slane %v4859_v21, 1  ;;  %v4916_v43 = vld [vmem:[#allocation2 + $0x90] sm:$0xff] }
  0x66   : > { %v4851_v14 = vld [vmem:[#allocation2 + $0xb0] sm:$0xff]  ;;  %v1531_v19 = vrot.slane %v4847_v12, 1  ;;  %v1533_v25 = vrot.slane %v4861_v22, 1  ;;  %v4866_v26 = vld [vmem:[#allocation2 + $0xb8] sm:$0x3]  ;;  %v4876_v30 = vsel %vm1499_vm6, %v1521_v16, %v1523_v20  ;;  %v4918_v44 = vld [vmem:[#allocation2 + $0xa8] sm:$0xff]  ;;  %v372_v47 = vcombine.low %v4906_v39, %v4916_v43 }
  0x67   : > { %v1536_v23 = vrot.slane %v4851_v14, 1  ;;  %v1538_v27 = vrot.slane %v4866_v26, 1  ;;  %v4889_v33 = vsel %vm1499_vm6, %v1526_v17, %v1528_v24  ;;  %v388_v48 = vcombine.low %v4914_v42, %v4918_v44 }
  0x68   : > { %v4884_v32 = vsel %vm1499_vm6, %v1531_v19, %v1533_v25  ;;  %v4943_v53 = vrot.slane %v372_v47, %v4879_v31  ;;  %v508_v55 = vcombine.low %v4843_v10, %v4847_v12  ;;  %v524_v56 = vcombine.low %v4845_v11, %v4851_v14  ;;  %729 = vrot.lane.b32.xlu0 %v4845_v11, %s4542_s4 }
  0x69   : > { %v1724_v34 = vcombine.low %v4876_v30, %v4884_v32  ;;  %v1725_v35 = vcombine.high %v4876_v30, %v4884_v32  ;;  %v4898_v36 = vsel %vm1499_vm6, %v1536_v23, %v1538_v27  ;;  %v4946_v54 = vrot.slane %v388_v48, %v4879_v31  ;;  %727 = vrot.lane.b32.xlu1 %v4914_v42, %s4542_s4 }
  0x6a   : > { %v1740_v37 = vcombine.low %v4889_v33, %v4898_v36  ;;  %v1741_v38 = vcombine.high %v4889_v33, %v4898_v36  ;;  %v4955_v58 = vrot.slane %v508_v55, %v4879_v31  ;;  %v373_v59 = vcombine.high %v4906_v39, %v4916_v43 }
  0x6b   : > { %v4909_v40 = vrot.slane %v1724_v34, %v4879_v31  ;;  %v4912_v41 = vrot.slane %v1725_v35, %v4879_v31  ;;  %v437_v57 = vcombine.high %v4943_v53, %v4946_v54  ;;  %v389_v60 = vcombine.high %v4914_v42, %v4918_v44 }
  0x6c   : > { %v4921_v45 = vrot.slane %v1740_v37, %v4879_v31  ;;  %v4924_v46 = vrot.slane %v1741_v38, %v4879_v31  ;;  %v4966_v61 = vrot.slane %v524_v56, %v4879_v31  ;;  %v509_v62 = vcombine.high %v4843_v10, %v4847_v12  ;;  %733 = vrot.lane.b32.xlu0 %v4847_v12, %s4542_s4 }
  0x6d   : > { %7443 = vst [vmem:[#allocation10_spill] sm:$0xff] %v4909_v40  ;;  %7444 = vst [vmem:[#allocation11_spill] sm:$0xff] %v4912_v41  ;;  %v525_v63 = vcombine.high %v4845_v11, %v4851_v14  ;;  %v4973_v0 = vrot.slane %v373_v59, %v4879_v31  ;;  %v4976_v1 = vrot.slane %v389_v60, %v4879_v31  ;;  %731 = vrot.lane.b32.xlu1 %v4916_v43, %s4542_s4 }
  0x6e   : > { %7445 = vst [vmem:[#allocation12_spill] sm:$0xff] %v4921_v45  ;;  %7446 = vst [vmem:[#allocation13_spill] sm:$0xff] %v4924_v46  ;;  %v4981_v3 = vrot.slane %v509_v62, %v4879_v31  ;;  %v2711_v20 = vrot.slane %v4845_v11, 2  ;;  %v2713_v24 = vrot.slane %v4859_v21, 2  ;;  %v2721_v25 = vrot.slane %v4851_v14, 2 }
  0x6f   : > { %v4984_v4 = vrot.slane %v525_v63, %v4879_v31  ;;  %v2723_v27 = vrot.slane %v4866_v26, 2  ;;  %v2706_v21 = vrot.slane %v4843_v10, 2  ;;  %v2708_v26 = vrot.slane %v4853_v15, 2 }
  0x70   : > { %737 = vrot.lane.b32.xlu0 %v4851_v14, %s4542_s4  ;;  %v5023_v28 = vsel %vm2684_vm7, %v2711_v20, %v2713_v24  ;;  %v2716_v35 = vrot.slane %v4847_v12, 2  ;;  %v2718_v37 = vrot.slane %v4861_v22, 2  ;;  %v2710_v38 = vrot.slane %v4914_v42, 2 }
  0x71   : > { %735 = vrot.lane.b32.xlu1 %v4918_v44, %s4542_s4  ;;  %7447 = vst [vmem:[#allocation14_spill] sm:$0xff] %v5023_v28  ;;  %v5026_v29 = vsel %vm2684_vm7, %v2721_v25, %v2723_v27  ;;  %v5039_v34 = vsel %vm2684_vm7, %v2706_v21, %v2708_v26  ;;  %v2720_v47 = vrot.slane %v4918_v44, 2  ;;  %v1525_v22 = vrot.slane %v4914_v42, 1 }
  0x72   : > { %7448 = vst [vmem:[#allocation15_spill] sm:$0xff] %v5026_v29  ;;  %7449 = vst [vmem:[#allocation16_spill] sm:$0xff] %v5039_v34  ;;  %v5050_v48 = vsel %vm2684_vm7, %v2716_v35, %v2718_v37  ;;  %v5053_v15 = vsel %vm2684_vm7, %v2710_v38, %v2711_v20  ;;  %v1520_v56 = vrot.slane %v4906_v39, 1  ;;  %v2705_v59 = vrot.slane %v4906_v39, 2 }
  0x73   : > { %7450 = vst [vmem:[#allocation17_spill] sm:$0xff] %v5050_v48  ;;  %7451 = vst [vmem:[#allocation18_spill] sm:$0xff] %v5053_v15  ;;  %v5056_v55 = vsel %vm2684_vm7, %v2720_v47, %v2721_v25  ;;  %v2715_v60 = vrot.slane %v4916_v43, 2  ;;  %v4544_v27 = vmov 1934713408  }
  0x74   : > { %1117 = vrot.lane.b32.xlu0 %v4843_v10, %s4543_s6  ;;  %7452 = vst [vmem:[#allocation19_spill] sm:$0xff] %v5056_v55 }
  0x75   : > { %1121 = vrot.lane.b32.xlu1 %v4845_v11, %s4543_s6 }
  0x78   : > { %1125 = vrot.lane.b32.xlu0 %v4847_v12, %s4543_s6 }
  0x79   : > { %1129 = vrot.lane.b32.xlu1 %v4851_v14, %s4543_s6 }
  0x7c   : > { %1115 = vrot.lane.b32.xlu0 %v4906_v39, %s4543_s6  ;;  %v5086_v39 = vsel %vm2684_vm7, %v2715_v60, %v2716_v35 }
  0x7d   : > { %1119 = vrot.lane.b32.xlu1 %v4914_v42, %s4543_s6  ;;  %v1535_v42 = vrot.slane %v4918_v44, 1 }
  0x7f   : > { %v5095_v10 = vsel %vm1499_vm6, %v1535_v42, %v1536_v23 }
  0x80   : > { %1123 = vrot.lane.b32.xlu0 %v4916_v43, %s4543_s6 }
  0x81   : > { %1127 = vrot.lane.b32.xlu1 %v4918_v44, %s4543_s6 }
  0x84   : > { %1918 = vrot.lane.b32.xlu0 %v4876_v30, %s4542_s4 }
  0x85   : > { %1922 = vrot.lane.b32.xlu1 %v4889_v33, %s4542_s4 }
  0x88   : > { %1926 = vrot.lane.b32.xlu0 %v4884_v32, %s4542_s4 }
  0x89   : > { %1930 = vrot.lane.b32.xlu1 %v4898_v36, %s4542_s4 }
  0x8c   : > { %2310 = vrot.lane.b32.xlu0 %v4876_v30, %s4543_s6  ;;  %v5073_v30 = vsel %vm1499_vm6, %v1525_v22, %v1526_v17 }
  0x8d   : > { %2314 = vrot.lane.b32.xlu1 %v4889_v33, %s4543_s6  ;;  %v5078_v33 = vsel %vm1499_vm6, %v1520_v56, %v1521_v16 }
  0x90   : > { %2318 = vrot.lane.b32.xlu0 %v4884_v32, %s4543_s6  ;;  %v1530_v32 = vrot.slane %v4916_v43, 1 }
  0x91   : > { %2322 = vrot.lane.b32.xlu1 %v4898_v36, %s4543_s6  ;;  %v5083_v36 = vsel %vm2684_vm7, %v2705_v59, %v2706_v21  ;;  %v407_v21 = vunpack.c.l.s4 %v4544_v27 }
  0x92   : > { %7453 = vst [vmem:[#allocation20_spill] sm:$0xff] %v5083_v36  ;;  %v5100_v11 = vsel %vm1499_vm6, %v1530_v32, %v1531_v19 }
  0x94   : > { %1916 = vrot.lane.b32.xlu0 %v5078_v33, %s4542_s4 }
  0x95   : > { %1920 = vrot.lane.b32.xlu1 %v5073_v30, %s4542_s4 }
  0x98   : > { %1924 = vrot.lane.b32.xlu0 %v5100_v11, %s4542_s4 }
  0x99   : > { %1928 = vrot.lane.b32.xlu1 %v5095_v10, %s4542_s4 }
  0xb0   : > { %v289_v16 = vpop.permute.xlu1 %288  ;;  %v285_v17 = vpop.permute.xlu0 %284 }
  0xb1   : > { %310 = vst.msk [vmem:[#allocation2 + $0x19] sm:$0xff] %vm259_vm5, %v289_v16  ;;  %308 = vst.msk [vmem:[#allocation2 + $0x1] sm:$0xff] %vm259_vm5, %v285_v17  ;;  %v408_v16 = vunpack.c.0.s8 %v407_v21 }
  0xb3   : > { %v5186_v50 = vsub.s32 %v408_v16, %v4849_v13 }
  0xb4   : > { %v291_v14 = vpop.permute.xlu1 %290  ;;  %v287_v23 = vpop.permute.xlu0 %286 }
  0xb5   : > { %311 = vst.msk [vmem:[#allocation2 + $0x21] sm:$0xff] %vm259_vm5, %v291_v14  ;;  %309 = vst.msk [vmem:[#allocation2 + $0x9] sm:$0xff] %vm259_vm5, %v287_v23 }
  0xb8   : > { %v295_v12 = vpop.permute.xlu1 %294  ;;  %v293_v19 = vpop.permute.xlu0 %292  ;;  %v5110_v43 = vld [vmem:[#allocation2] sm:$0xff]  ;;  %v5112_v44 = vld [vmem:[#allocation2 + $0x18] sm:$0xff] }
  0xb9   : > { %313 = vst.msk [vmem:[#allocation2 + $0x39] sm:$0xff] %vm259_vm5, %v295_v12  ;;  %312 = vst.msk [vmem:[#allocation2 + $0x31] sm:$0xff] %vm259_vm5, %v293_v19  ;;  %707 = vrot.lane.b32.xlu1 %v5110_v43, %s4542_s4  ;;  %v2690_v62 = vrot.slane %v5112_v44, 2  ;;  %v2685_v38 = vrot.slane %v5110_v43, 2 }
  0xbc   : > { %v299_v63 = vpop.permute.xlu1 %298  ;;  %v297_v20 = vpop.permute.xlu0 %296  ;;  %v5119_v24 = vld [vmem:[#allocation2 + $0x8] sm:$0xff]  ;;  %v5121_v25 = vld [vmem:[#allocation2 + $0x20] sm:$0xff]  ;;  %v5129_v26 = vld [vmem:[#allocation2 + $0x10] sm:$0x3] }
  0xbd   : > { %315 = vst.msk [vmem:[#allocation2 + $0x51] sm:$0xff] %vm259_vm5, %v299_v63  ;;  %314 = vst.msk [vmem:[#allocation2 + $0x49] sm:$0xff] %vm259_vm5, %v297_v20  ;;  %709 = vrot.lane.b32.xlu0 %v5119_v24, %s4542_s4  ;;  %711 = vrot.lane.b32.xlu1 %v5112_v44, %s4542_s4  ;;  %v7303_v35 = vrot.slane %v5121_v25, 2  ;;  %v7302_v37 = vrot.slane %v5119_v24, 2  ;;  %v5134_v47 = vld [vmem:[#allocation2 + $0x28] sm:$0x3] }
  0xbe   : > { %v7305_v22 = vrot.slane %v5119_v24, 1  ;;  %v1503_v56 = vrot.slane %v5129_v26, 1  ;;  %v1506_v12 = vrot.slane %v5121_v25, 1  ;;  %v1508_v19 = vrot.slane %v5134_v47, 1 }
  0xbf   : > { %v5141_v59 = vsel %vm2684_vm7, %v2690_v62, %v7303_v35  ;;  %v5152_v17 = vsel %vm2684_vm7, %v2685_v38, %v7302_v37  ;;  %v1505_v62 = vrot.slane %v5112_v44, 1 }
  0xc0   : > { %7454 = vst [vmem:[#allocation21_spill] sm:$0xff] %v5141_v59  ;;  %v5143_v60 = vld [vmem:[#allocation2 + $0x30] sm:$0xff]  ;;  %v5145_v42 = vld [vmem:[#allocation2 + $0x38] sm:$0xff]  ;;  %v5147_v32 = vld [vmem:[#allocation2 + $0x40] sm:$0x3]  ;;  %v5166_v63 = vsel %vm1499_vm6, %v7305_v22, %v1503_v56 }
  0xc1   : > { %7455 = vst [vmem:[#allocation22_spill] sm:$0xff] %v5152_v17  ;;  %713 = vrot.lane.b32.xlu0 %v5121_v25, %s4542_s4  ;;  %715 = vrot.lane.b32.xlu1 %v5143_v60, %s4542_s4  ;;  %v7304_v14 = vrot.slane %v5145_v42, 1  ;;  %v1513_v23 = vrot.slane %v5147_v32, 1  ;;  %v340_v27 = vcombine.low %v5110_v43, %v5143_v60  ;;  %v5201_v13 = vsel %vm1499_vm6, %v1505_v62, %v1506_v12 }
  0xc2   : > { %v476_v16 = vcombine.low %v5119_v24, %v5145_v42  ;;  %v341_v2 = vcombine.high %v5110_v43, %v5143_v60 }
  0xc3   : > { %v5171_v20 = vsel %vm1499_vm6, %v7304_v14, %v1513_v23  ;;  %v5198_v14 = vsel %vm1499_vm6, %v1506_v12, %v1508_v19  ;;  %v348_v9 = vrot.slane %v340_v27, %v4879_v31 }
  0xc4   : > { %v5175_v21 = vld [vmem:[#allocation2 + $0x48] sm:$0xff]  ;;  %v5177_v38 = vld [vmem:[#allocation2 + $0x50] sm:$0xff]  ;;  %v5179_v51 = vld [vmem:[#allocation2 + $0x58] sm:$0x3]  ;;  %v1692_v52 = vcombine.low %v5166_v63, %v5171_v20  ;;  %v1693_v56 = vcombine.high %v5166_v63, %v5171_v20 }
  0xc5   : > { %717 = vrot.lane.b32.xlu0 %v5145_v42, %s4542_s4  ;;  %719 = vrot.lane.b32.xlu1 %v5175_v21, %s4542_s4  ;;  %v1516_v23 = vrot.slane %v5177_v38, 1  ;;  %v1518_v49 = vrot.slane %v5179_v51, 1  ;;  %v1515_v37 = vrot.slane %v5175_v21, 1  ;;  %v356_v35 = vcombine.low %v5112_v44, %v5175_v21 }
  0xc6   : > { %v492_v27 = vcombine.low %v5121_v25, %v5177_v38  ;;  %v5240_v62 = vrot.slane %v1692_v52, %v4879_v31  ;;  %v5243_v5 = vrot.slane %v1693_v56, %v4879_v31  ;;  %v7461_v52 = vcombine.low %v4943_v53, %v4946_v54 }
  0xc7   : > { %v5206_v22 = vsel %vm1499_vm6, %v1516_v23, %v1518_v49  ;;  %v5209_v18 = vsel %vm1499_vm6, %v1515_v37, %v1516_v23  ;;  %v364_v8 = vrot.slane %v356_v35, %v4879_v31  ;;  %v5229_v35 = vrot.slane %v437_v57, %v5186_v50 }
  0xc8   : > { %v1708_v19 = vcombine.low %v5198_v14, %v5206_v22  ;;  %v1709_v12 = vcombine.high %v5198_v14, %v5206_v22  ;;  %7458 = vst [vmem:[#allocation25_spill] sm:$0xff] %v5240_v62  ;;  %7459 = vst [vmem:[#allocation26_spill] sm:$0xff] %v5243_v5  ;;  %v484_v57 = vrot.slane %v476_v16, %v4879_v31 }
  0xc9   : > { %721 = vrot.lane.b32.xlu0 %v5177_v38, %s4542_s4  ;;  %1105 = vrot.lane.b32.xlu1 %v5121_v25, %s4543_s6  ;;  %v405_v37 = vcombine.high %v348_v9, %v364_v8  ;;  %v500_v6 = vrot.slane %v492_v27, %v4879_v31  ;;  %v477_v16 = vcombine.high %v5119_v24, %v5145_v42 }
  0xca   : > { %v5234_v23 = vrot.slane %v1708_v19, %v4879_v31  ;;  %v5237_v49 = vrot.slane %v1709_v12, %v4879_v31  ;;  %v7460_v27 = vcombine.high %v4955_v58, %v4966_v61  ;;  %v5272_v56 = vrot.slane %v7461_v52, %v5186_v50 }
  0xcb   : > { %v419_v7 = vrot.slane %v405_v37, %v5186_v50  ;;  %v541_v37 = vcombine.high %v484_v57, %v500_v6  ;;  %v493_v5 = vcombine.high %v5121_v25, %v5177_v38  ;;  %v355_v53 = vrot.slane %v341_v2, %v4879_v31 }
  0xcc   : > { %7456 = vst [vmem:[#allocation23_spill] sm:$0xff] %v5234_v23  ;;  %7457 = vst [vmem:[#allocation24_spill] sm:$0xff] %v5237_v49  ;;  %v587_v12 = vrot.slane %v7460_v27, %v5186_v50  ;;  %v357_v49 = vcombine.high %v5112_v44, %v5175_v21  ;;  %v7463_v23 = vcombine.low %v4955_v58, %v4966_v61 }
  0xcd   : > { %1101 = vrot.lane.b32.xlu0 %v5119_v24, %s4543_s6  ;;  %1113 = vrot.lane.b32.xlu1 %v5177_v38, %s4543_s6  ;;  %7462 = vst [vmem:[#allocation27_spill] sm:$0xff] %v5272_v56  ;;  %v470_v19 = vcombine.low %v419_v7, %v5229_v35  ;;  %v555_v27 = vrot.slane %v541_v37, %v5186_v50 }
  0xce   : > { %v5283_v62 = vrot.slane %v7463_v23, %v5186_v50  ;;  %v404_v54 = vcombine.low %v348_v9, %v364_v8  ;;  %v540_v52 = vcombine.low %v484_v57, %v500_v6  ;;  %v371_v46 = vrot.slane %v357_v49, %v4879_v31 }
  0xcf   : > { %v491_v41 = vrot.slane %v477_v16, %v4879_v31  ;;  %v507_v58 = vrot.slane %v493_v5, %v4879_v31  ;;  %v606_v61 = vcombine.low %v555_v27, %v587_v12  ;;  %v7467_v8 = vcombine.low %v4973_v0, %v4976_v1 }
  0xd0   : > { %7464 = vst [vmem:[#allocation28_spill] sm:$0xff] %v5283_v62  ;;  %v5295_v23 = vrot.slane %v404_v54, %v5186_v50  ;;  %v5298_v2 = vrot.slane %v540_v52, %v5186_v50  ;;  %v420_v6 = vcombine.low %v355_v53, %v371_v46  ;;  %v7468_v49 = vcombine.low %v4981_v3, %v4984_v4 }
  0xd1   : > { %1109 = vrot.lane.b32.xlu0 %v5145_v42, %s4543_s6  ;;  %1103 = vrot.lane.b32.xlu1 %v5112_v44, %s4543_s6  ;;  %v460_v9 = vrot.slane %v7467_v8, %v5186_v50  ;;  %v556_v44 = vcombine.low %v491_v41, %v507_v58  ;;  %v4156_v5 = vpack.i.bf16 %v606_v61, %v470_v19 }
  0xd2   : > { %7465 = vst [vmem:[#allocation29_spill] sm:$0xff] %v5295_v23  ;;  %7466 = vst [vmem:[#allocation30_spill] sm:$0xff] %v5298_v2  ;;  %v596_v57 = vrot.slane %v7468_v49, %v5186_v50  ;;  %v469_v16 = vcombine.high %v5295_v23, %v5272_v56  ;;  %v605_v54 = vcombine.high %v5298_v2, %v5283_v62 }
  0xd3   : > { %v428_v52 = vrot.slane %v420_v6, %v5186_v50  ;;  %v564_v8 = vrot.slane %v556_v44, %v5186_v50  ;;  %v7470_v6 = vcombine.high %v4973_v0, %v4976_v1  ;;  %v421_v19 = vcombine.high %v355_v53, %v371_v46 }
  0xd4   : > { %v5322_v61 = vpack.i.bf16 %v605_v54, %v469_v16  ;;  %v7471_v16 = vcombine.high %v4981_v3, %v4984_v4  ;;  %v557_v56 = vcombine.high %v491_v41, %v507_v58  ;;  %v471_v23 = vcombine.high %v419_v7, %v5229_v35 }
  0xd5   : > { %1099 = vrot.lane.b32.xlu0 %v5110_v43, %s4543_s6  ;;  %1111 = vrot.lane.b32.xlu1 %v5175_v21, %s4543_s6  ;;  %v472_v49 = vcombine.low %v428_v52, %v460_v9  ;;  %v608_v37 = vcombine.low %v564_v8, %v596_v57  ;;  %v467_v44 = vrot.slane %v7470_v6, %v5186_v50  ;;  %v2700_v53 = vrot.slane %v5175_v21, 2 }
  0xd6   : > { %v5328_v62 = vpop.permute.xlu1 %723  ;;  %v603_v54 = vrot.slane %v7471_v16, %v5186_v50  ;;  %v607_v45 = vcombine.high %v555_v27, %v587_v12  ;;  %v473_v40 = vcombine.high %v428_v52, %v460_v9  ;;  %v609_v17 = vcombine.high %v564_v8, %v596_v57  ;;  %v5349_v4 = vpop.permute.xlu0 %725 }
  0xd7   : > { %7469 = vst [vmem:[#allocation31_spill] sm:$0xff] %v5328_v62  ;;  %v4166_v2 = vpack.i.bf16 %v608_v37, %v472_v49  ;;  %v435_v62 = vrot.slane %v421_v19, %v5186_v50  ;;  %v571_v37 = vrot.slane %v557_v56, %v5186_v50  ;;  %v1510_v56 = vrot.slane %v5143_v60, 1 }
  0xd8   : > { %v5341_v49 = vpack.i.bf16 %v607_v45, %v471_v23  ;;  %v5347_v0 = vpack.i.bf16 %v609_v17, %v473_v40  ;;  %v1500_v17 = vrot.slane %v5110_v43, 1  ;;  %v2701_v43 = vrot.slane %v5177_v38, 2 }
  0xd9   : > { %1107 = vrot.lane.b32.xlu0 %v5143_v60, %s4543_s6  ;;  %1906 = vrot.lane.b32.xlu1 %v5198_v14, %s4542_s4  ;;  %v474_v41 = vcombine.low %v435_v62, %v467_v44  ;;  %v610_v46 = vcombine.low %v571_v37, %v603_v54  ;;  %v475_v1 = vcombine.high %v435_v62, %v467_v44  ;;  %v2696_v27 = vrot.slane %v5145_v42, 2 }
  0xda   : > { %v611_v3 = vcombine.high %v571_v37, %v603_v54  ;;  %v5363_v40 = vpop.permute.xlu0 %729  ;;  %v2695_v58 = vrot.slane %v5143_v60, 2  ;;  %v7474_v23 = vrot.slane %v5145_v42, 1  ;;  %v2703_v38 = vrot.slane %v5179_v51, 2 }
  0xdb   : > { %v5351_v7 = vpop.permute.xlu1 %727  ;;  %v4176_v35 = vpack.i.bf16 %v610_v46, %v474_v41  ;;  %v1604_v21 = vcombine.low %v5073_v30, %v5095_v10  ;;  %v2693_v60 = vrot.slane %v5134_v47, 2  ;;  %v2698_v42 = vrot.slane %v5147_v32, 2 }
  0xdc   : > { %v5353_v12 = vpack.i.bf16 %v611_v3, %v475_v1  ;;  %v5395_v9 = vsel %vm1499_vm6, %v1510_v56, %v7474_v23  ;;  %v5408_v52 = vsel %vm2684_vm7, %v2700_v53, %v2701_v43  ;;  %v5411_v8 = vsel %vm2684_vm7, %v2695_v58, %v2696_v27 }
  0xdd   : > { %1902 = vrot.lane.b32.xlu0 %v5166_v63, %s4542_s4  ;;  %1914 = vrot.lane.b32.xlu1 %v5206_v22, %s4542_s4  ;;  %7475 = vst [vmem:[#allocation33_spill] sm:$0xff] %v5408_v52  ;;  %7476 = vst [vmem:[#allocation34_spill] sm:$0xff] %v5411_v8  ;;  %v2925_v19 = vcombine.low %v5023_v28, %v5026_v29  ;;  %v2909_v51 = vcombine.low %v5039_v34, %v5050_v48  ;;  %v2688_v44 = vrot.slane %v5129_v26, 2 }
  0xde   : > { %v5372_v62 = vpop.permute.xlu0 %733  ;;  %v5427_v6 = vsel %vm2684_vm7, %v2701_v43, %v2703_v38  ;;  %v5431_v16 = vrot.slane %v1604_v21, %v4879_v31  ;;  %v7480_v54 = vrot.slane %v5121_v25, 2  ;;  %v5439_v37 = vsel %vm2684_vm7, %v2696_v27, %v2698_v42 }
  0xdf   : > { %v5365_v45 = vpop.permute.xlu1 %731  ;;  %7479 = vst [vmem:[#allocation37_spill] sm:$0xff] %v5427_v6  ;;  %7482 = vst [vmem:[#allocation39_spill] sm:$0xff] %v5439_v37  ;;  %v2773_v41 = vcombine.low %v5083_v36, %v5086_v39  ;;  %v5451_v25 = vrot.slane %v2925_v19, %v4879_v31  ;;  %v5454_v1 = vrot.slane %v2909_v51, %v4879_v31  ;;  %v7493_v19 = vld [vmem:[#allocation10_spill] sm:$0xff]  ;;  %v7494_v51 = vld [vmem:[#allocation12_spill] sm:$0xff] }
  0xe0   : > { %v2757_v43 = vcombine.low %v5141_v59, %v5408_v52  ;;  %v7487_v27 = vcombine.low %v5201_v13, %v5209_v18 }
  0xe1   : > { %1910 = vrot.lane.b32.xlu0 %v5171_v20, %s4542_s4  ;;  %2298 = vrot.lane.b32.xlu1 %v5198_v14, %s4543_s6  ;;  %7483 = vst [vmem:[#allocation40_spill] sm:$0xff] %v5451_v25  ;;  %7484 = vst [vmem:[#allocation41_spill] sm:$0xff] %v5454_v1  ;;  %v5484_v58 = vrot.slane %v2773_v41, %v4879_v31  ;;  %v2973_v21 = vcombine.low %v5454_v1, %v5451_v25 }
  0xe2   : > { %v5400_v57 = vpop.permute.xlu0 %737 }
  0xe3   : > { %v5374_v14 = vpop.permute.xlu1 %735  ;;  %7490 = vst [vmem:[#allocation45_spill] sm:$0xff] %v5484_v58 }
  0xe5   : > { %2294 = vrot.lane.b32.xlu0 %v5166_v63, %s4543_s6  ;;  %2306 = vrot.lane.b32.xlu1 %v5206_v22, %s4543_s6  ;;  %v7472_v63 = vrot.slane %v5119_v24, 1 }
  0xe6   : > { %v5422_v47 = vpop.permute.xlu0 %1117 }
  0xe7   : > { %v5379_v22 = vsel %vm1499_vm6, %v1500_v17, %v7472_v63  ;;  %7477 = vst [vmem:[#allocation35_spill] sm:$0xff] %v5422_v47  ;;  %v7485_v17 = vrot.slane %v5119_v24, 2 }
  0xe8   : > { %v1556_v3 = vcombine.low %v5379_v22, %v5395_v9 }
  0xe9   : > { %2302 = vrot.lane.b32.xlu0 %v5171_v20, %s4543_s6  ;;  %1904 = vrot.lane.b32.xlu1 %v5201_v13, %s4542_s4  ;;  %v5386_v20 = vpop.permute.xlu1 %1121  ;;  %v5464_v63 = vsel %vm2684_vm7, %v7485_v17, %v2688_v44  ;;  %v7495_v44 = vcombine.low %v7493_v19, %v7494_v51  ;;  %v7502_v17 = vld [vmem:[#allocation13_spill] sm:$0xff] }
  0xea   : > { %7473 = vst [vmem:[#allocation32_spill] sm:$0xff] %v5386_v20  ;;  %7486 = vst [vmem:[#allocation42_spill] sm:$0xff] %v5464_v63  ;;  %v2877_v56 = vcombine.low %v5464_v63, %v5439_v37  ;;  %v5476_v53 = vpop.permute.xlu0 %1125 }
  0xed   : > { %1912 = vrot.lane.b32.xlu1 %v5209_v18, %s4542_s4  ;;  %1900 = vrot.lane.b32.xlu0 %v5379_v22, %s4542_s4  ;;  %v5424_v32 = vpop.permute.xlu1 %1129 }
  0xee   : > { %7478 = vst [vmem:[#allocation36_spill] sm:$0xff] %v5424_v32 }
  0xf1   : > { %1908 = vrot.lane.b32.xlu0 %v5395_v9, %s4542_s4  ;;  %4157 = vrot.lane.b32.xlu1 %v4156_v5, %s4545_s7  ;;  %v1588_v5 = vcombine.low %v5078_v33, %v5100_v11 }
  0xf3   : > { %v5446_v46 = vrot.slane %v1588_v5, %v4879_v31  ;;  %v5496_v5 = vrot.slane %v1556_v3, %v4879_v31  ;;  %v5518_v3 = vrot.slane %v2757_v43, %v4879_v31  ;;  %v7507_v43 = vld [vmem:[#allocation25_spill] sm:$0xff] }
  0xf5   : > { %4167 = vrot.lane.b32.xlu1 %v4166_v2, %s4546_s8  ;;  %4152 = vrot.lane.b32.xlu0 %v5322_v61, %s4547_s17  ;;  %v5436_v2 = vsel %vm2684_vm7, %v7480_v54, %v2693_v60  ;;  %v2789_v61 = vcombine.low %v5053_v15, %v5056_v55  ;;  %v1652_v23 = vcombine.low %v5446_v46, %v5431_v16  ;;  %v7492_v60 = vld [vmem:[#allocation22_spill] sm:$0xff] }
  0xf6   : > { %7481 = vst [vmem:[#allocation38_spill] sm:$0xff] %v5436_v2  ;;  %v2893_v26 = vcombine.low %v5436_v2, %v5427_v6  ;;  %v2741_v42 = vcombine.low %v7492_v60, %v5411_v8  ;;  %v5506_v54 = vrot.slane %v7495_v44, %v5186_v50  ;;  %7500 = vst [vmem:[#allocation48_spill] sm:$0xff] %v5518_v3 }
  0xf7   : > { %v5481_v24 = vrot.slane %v2789_v61, %v4879_v31  ;;  %v7497_v61 = vcombine.high %v7493_v19, %v7494_v51  ;;  %v7508_v51 = vld [vmem:[#allocation23_spill] sm:$0xff] }
  0xf8   : > { %v5489_v38 = vrot.slane %v2893_v26, %v4879_v31  ;;  %7496 = vst [vmem:[#allocation10_spill] sm:$0xff] %v5506_v54  ;;  %v5515_v26 = vrot.slane %v2877_v56, %v4879_v31 }
  0xf9   : > { %4177 = vrot.lane.b32.xlu1 %v4176_v35, %s4548_s19  ;;  %4162 = vrot.lane.b32.xlu0 %v5341_v49, %s4549_s20  ;;  %v5474_v35 = vrot.slane %v7487_v27, %v4879_v31  ;;  %v5478_v49 = vpop.permute.xlu1 %1119  ;;  %7489 = vst [vmem:[#allocation44_spill] sm:$0xff] %v5481_v24  ;;  %v5512_v41 = vrot.slane %v7497_v61, %v5186_v50 }
  0xfa   : > { %7488 = vst [vmem:[#allocation43_spill] sm:$0xff] %v5478_v49  ;;  %7491 = vst [vmem:[#allocation46_spill] sm:$0xff] %v5489_v38  ;;  %v2837_v56 = vcombine.low %v5484_v58, %v5481_v24  ;;  %v7509_v61 = vcombine.low %v7507_v43, %v7508_v51  ;;  %v7515_v58 = vld [vmem:[#allocation24_spill] sm:$0xff] }
  0xfb   : > { %7498 = vst [vmem:[#allocation12_spill] sm:$0xff] %v5512_v41  ;;  %7499 = vst [vmem:[#allocation47_spill] sm:$0xff] %v5515_v26  ;;  %v1620_v19 = vcombine.low %v5496_v5, %v5474_v35  ;;  %v924_v41 = vcombine.high %v5349_v4, %v5372_v62 }
  0xfc   : > { %v5540_v49 = vrot.slane %v7509_v61, %v5186_v50 }
  0xfd   : > { %2296 = vrot.lane.b32.xlu1 %v5201_v13, %s4543_s6  ;;  %4172 = vrot.lane.b32.xlu0 %v5347_v0, %s4550_s22  ;;  %v7501_v0 = vld [vmem:[#allocation11_spill] sm:$0xff] }
  0xfe   : > { %v7503_v27 = vcombine.high %v7501_v0, %v7502_v17  ;;  %v7505_v44 = vcombine.low %v7501_v0, %v7502_v17  ;;  %7510 = vst [vmem:[#allocation25_spill] sm:$0xff] %v5540_v49  ;;  %v2941_v0 = vcombine.low %v5515_v26, %v5489_v38  ;;  %v5551_v17 = vrot.slane %v2741_v42, %v4879_v31  ;;  %v5569_v42 = vpop.permute.xlu0 %1115 }
 0x100   : > { %v5524_v1 = vrot.slane %v7503_v27, %v5186_v50  ;;  %v5530_v25 = vrot.slane %v7505_v44, %v5186_v50  ;;  %v7511_v27 = vcombine.high %v7507_v43, %v7508_v51  ;;  %7513 = vst [vmem:[#allocation49_spill] sm:$0xff] %v5551_v17  ;;  %v7514_v44 = vld [vmem:[#allocation26_spill] sm:$0xff]  ;;  %v5571_v43 = vpop.permute.xlu1 %1127  ;;  %v5609_v51 = vrot.slane %v2837_v56, %v5186_v50 }
 0x101   : > { %v7516_v24 = vcombine.high %v7514_v44, %v7515_v58  ;;  %v7518_v61 = vcombine.low %v7514_v44, %v7515_v58  ;;  %2304 = vrot.lane.b32.xlu1 %v5209_v18, %s4543_s6  ;;  %4182 = vrot.lane.b32.xlu0 %v5353_v12, %s4551_s26  ;;  %v5594_v58 = vrot.slane %v1620_v19, %v5186_v50 }
 0x102   : > { %7504 = vst [vmem:[#allocation11_spill] sm:$0xff] %v5524_v1  ;;  %7506 = vst [vmem:[#allocation13_spill] sm:$0xff] %v5530_v25  ;;  %v5546_v20 = vrot.slane %v7511_v27, %v5186_v50  ;;  %v2805_v27 = vcombine.low %v5551_v17, %v5518_v3  ;;  %v5597_v44 = vrot.slane %v1652_v23, %v5186_v50  ;;  %v5611_v17 = vpop.permute.xlu0 %1123 }
 0x103   : > { %v5557_v32 = vrot.slane %v7516_v24, %v5186_v50  ;;  %v5563_v47 = vrot.slane %v7518_v61, %v5186_v50  ;;  %7520 = vst [vmem:[#allocation50_spill] sm:$0xff] %v5594_v58  ;;  %v5600_v12 = vrot.slane %v2941_v0, %v5186_v50  ;;  %v5603_v61 = vrot.slane %v2973_v21, %v5186_v50 }
 0x104   : > { %7512 = vst [vmem:[#allocation23_spill] sm:$0xff] %v5546_v20  ;;  %7521 = vst [vmem:[#allocation51_spill] sm:$0xff] %v5597_v44  ;;  %v5606_v24 = vrot.slane %v2805_v27, %v5186_v50  ;;  %v5613_v3 = vpop.permute.xlu1 %1922  ;;  %v1605_v25 = vcombine.high %v5073_v30, %v5095_v10  ;;  %v923_v1 = vcombine.low %v5349_v4, %v5372_v62  ;;  %v7536_v62 = vld [vmem:[#allocation31_spill] sm:$0xff] }
 0x105   : > { %7517 = vst [vmem:[#allocation26_spill] sm:$0xff] %v5557_v32  ;;  %7519 = vst [vmem:[#allocation24_spill] sm:$0xff] %v5563_v47  ;;  %2312 = vrot.lane.b32.xlu1 %v5073_v30, %s4543_s6  ;;  %2292 = vrot.lane.b32.xlu0 %v5379_v22, %s4543_s6  ;;  %v1589_v47 = vcombine.high %v5078_v33, %v5100_v11  ;;  %v939_v32 = vcombine.low %v5363_v40, %v5400_v57 }
 0x106   : > { %7522 = vst [vmem:[#allocation52_spill] sm:$0xff] %v5600_v12  ;;  %7523 = vst [vmem:[#allocation53_spill] sm:$0xff] %v5603_v61  ;;  %v5631_v0 = vpop.permute.xlu0 %1918  ;;  %v940_v30 = vcombine.high %v5363_v40, %v5400_v57  ;;  %v931_v4 = vrot.slane %v923_v1, %v4879_v31  ;;  %v787_v57 = vcombine.low %v7536_v62, %v5365_v45 }
 0x107   : > { %7524 = vst [vmem:[#allocation54_spill] sm:$0xff] %v5606_v24  ;;  %7525 = vst [vmem:[#allocation55_spill] sm:$0xff] %v5609_v51  ;;  %v947_v40 = vrot.slane %v939_v32, %v4879_v31  ;;  %v938_v20 = vrot.slane %v924_v41, %v4879_v31  ;;  %v1557_v32 = vcombine.high %v5379_v22, %v5395_v9 }
 0x108   : > { %7526 = vst [vmem:[#allocation56_spill] sm:$0xff] %v5613_v3  ;;  %7527 = vst [vmem:[#allocation57_spill] sm:$0xff] %v5631_v0  ;;  %v5633_v27 = vpop.permute.xlu1 %1930  ;;  %v788_v1 = vcombine.high %v7536_v62, %v5365_v45  ;;  %v795_v45 = vrot.slane %v787_v57, %v4879_v31 }
 0x109   : > { %2320 = vrot.lane.b32.xlu1 %v5095_v10, %s4543_s6  ;;  %2300 = vrot.lane.b32.xlu0 %v5395_v9, %s4543_s6  ;;  %7528 = vst [vmem:[#allocation58_spill] sm:$0xff] %v5633_v27  ;;  %v987_v9 = vcombine.low %v931_v4, %v947_v40 }
 0x10a   : > { %v5639_v19 = vpop.permute.xlu0 %1926 }
 0x10b   : > { %7529 = vst [vmem:[#allocation59_spill] sm:$0xff] %v5639_v19 }
 0x10c   : > { %v5641_v23 = vpop.permute.xlu1 %2314 }
 0x10d   : > { %3091 = vrot.lane.b32.xlu1 %v5436_v2, %s4542_s4  ;;  %2308 = vrot.lane.b32.xlu0 %v5078_v33, %s4543_s6 }
 0x10e   : > { %v5651_v56 = vpop.permute.xlu0 %2310 }
 0x110   : > { %v5653_v21 = vpop.permute.xlu1 %2322 }
 0x111   : > { %3099 = vrot.lane.b32.xlu1 %v5427_v6, %s4542_s4  ;;  %2316 = vrot.lane.b32.xlu0 %v5100_v11, %s4543_s6  ;;  %v5704_v11 = vrot.slane %v1605_v25, %v4879_v31  ;;  %v803_v25 = vcombine.low %v5351_v7, %v5374_v14 }
 0x112   : > { %v5659_v24 = vpop.permute.xlu0 %2318 }
 0x113   : > { %7534 = vst [vmem:[#allocation64_spill] sm:$0xff] %v5704_v11 }
 0x114   : > { %v5661_v51 = vpop.permute.xlu1 %1920 }
 0x115   : > { %3107 = vrot.lane.b32.xlu1 %v5023_v28, %s4542_s4  ;;  %3087 = vrot.lane.b32.xlu0 %v5464_v63, %s4542_s4  ;;  %7530 = vst [vmem:[#allocation60_spill] sm:$0xff] %v5661_v51  ;;  %v804_v51 = vcombine.high %v5351_v7, %v5374_v14  ;;  %v811_v7 = vrot.slane %v803_v25, %v4879_v31 }
 0x116   : > { %v5667_v12 = vpop.permute.xlu0 %1916  ;;  %v988_v14 = vcombine.high %v931_v4, %v947_v40 }
 0x117   : > { %7531 = vst [vmem:[#allocation61_spill] sm:$0xff] %v5667_v12  ;;  %v5761_v57 = vrot.slane %v804_v51, %v4879_v31  ;;  %v5777_v51 = vrot.slane %v987_v9, %v5186_v50  ;;  %v851_v25 = vcombine.low %v795_v45, %v811_v7 }
 0x118   : > { %v5673_v61 = vpop.permute.xlu1 %1928 }
 0x119   : > { %3115 = vrot.lane.b32.xlu1 %v5026_v29, %s4542_s4  ;;  %3095 = vrot.lane.b32.xlu0 %v5439_v37, %s4542_s4  ;;  %7532 = vst [vmem:[#allocation62_spill] sm:$0xff] %v5673_v61  ;;  %7541 = vst [vmem:[#allocation68_spill] sm:$0xff] %v5777_v51 }
 0x11a   : > { %v5679_v26 = vpop.permute.xlu0 %1924 }
 0x11b   : > { %7533 = vst [vmem:[#allocation63_spill] sm:$0xff] %v5679_v26 }
 0x11d   : > { %3089 = vrot.lane.b32.xlu1 %v5141_v59, %s4542_s4  ;;  %3103 = vrot.lane.b32.xlu0 %v5039_v34, %s4542_s4 }
 0x121   : > { %3097 = vrot.lane.b32.xlu1 %v5408_v52, %s4542_s4  ;;  %3111 = vrot.lane.b32.xlu0 %v5050_v48, %s4542_s4 }
 0x125   : > { %3105 = vrot.lane.b32.xlu1 %v5053_v15, %s4542_s4  ;;  %3085 = vrot.lane.b32.xlu0 %v7492_v60, %s4542_s4 }
 0x129   : > { %3113 = vrot.lane.b32.xlu1 %v5056_v55, %s4542_s4  ;;  %3093 = vrot.lane.b32.xlu0 %v5411_v8, %s4542_s4 }
 0x12b   : > { %v5681_v38 = vpop.permute.xlu1 %707 }
 0x12d   : > { %3483 = vrot.lane.b32.xlu1 %v5436_v2, %s4543_s6  ;;  %3101 = vrot.lane.b32.xlu0 %v5083_v36, %s4542_s4  ;;  %v5707_v2 = vrot.slane %v1589_v47, %v4879_v31  ;;  %v1653_v47 = vcombine.high %v5446_v46, %v5431_v16  ;;  %v7537_v46 = vcombine.high %v5201_v13, %v5209_v18 }
 0x12e   : > { %v5758_v13 = vrot.slane %v788_v1, %v4879_v31  ;;  %v5782_v1 = vrot.slane %v988_v14, %v5186_v50 }
 0x12f   : > { %v5699_v10 = vpop.permute.xlu0 %709  ;;  %v5701_v33 = vpop.permute.xlu1 %711  ;;  %7535 = vst [vmem:[#allocation65_spill] sm:$0xff] %v5707_v2  ;;  %v1668_v16 = vcombine.low %v5707_v2, %v5704_v11  ;;  %v5743_v22 = vrot.slane %v7537_v46, %v4879_v31  ;;  %v7543_v2 = vld [vmem:[#allocation36_spill] sm:$0xff] }
 0x130   : > { %v867_v14 = vcombine.low %v5758_v13, %v5761_v57  ;;  %v7544_v11 = vld [vmem:[#allocation32_spill] sm:$0xff] }
 0x131   : > { %3491 = vrot.lane.b32.xlu1 %v5427_v6, %s4543_s6  ;;  %3109 = vrot.lane.b32.xlu0 %v5086_v39, %s4542_s4  ;;  %v954_v6 = vrot.slane %v940_v30, %v4879_v31  ;;  %7538 = vst [vmem:[#allocation31_spill] sm:$0xff] %v5743_v22 }
 0x133   : > { %v5723_v12 = vpop.permute.xlu0 %713  ;;  %v5725_v26 = vpop.permute.xlu1 %715  ;;  %v1003_v41 = vcombine.low %v938_v20, %v954_v6  ;;  %v1004_v18 = vcombine.high %v938_v20, %v954_v6  ;;  %v5772_v20 = vrot.slane %v1668_v16, %v5186_v50 }
 0x134   : > { %v755_v16 = vcombine.low %v5681_v38, %v5725_v26 }
 0x135   : > { %3499 = vrot.lane.b32.xlu1 %v5023_v28, %s4543_s6  ;;  %3479 = vrot.lane.b32.xlu0 %v5464_v63, %s4543_s6  ;;  %v5752_v28 = vrot.slane %v1653_v47, %v5186_v50  ;;  %v5755_v63 = vrot.slane %v1557_v32, %v4879_v31  ;;  %7540 = vst [vmem:[#allocation67_spill] sm:$0xff] %v5772_v20  ;;  %v7542_v47 = vld [vmem:[#allocation35_spill] sm:$0xff] }
 0x136   : > { %v1315_v32 = vcombine.low %v7542_v47, %v5476_v53  ;;  %v5785_v46 = vrot.slane %v1003_v41, %v5186_v50  ;;  %v5794_v9 = vrot.slane %v1004_v18, %v5186_v50  ;;  %v1331_v41 = vcombine.low %v7544_v11, %v7543_v2 }
 0x137   : > { %v5747_v30 = vpop.permute.xlu0 %717  ;;  %v5749_v62 = vpop.permute.xlu1 %719  ;;  %7539 = vst [vmem:[#allocation66_spill] sm:$0xff] %v5755_v63  ;;  %v868_v20 = vcombine.high %v5758_v13, %v5761_v57  ;;  %v1332_v13 = vcombine.high %v7544_v11, %v7543_v2  ;;  %v763_v57 = vrot.slane %v755_v16, %v4879_v31  ;;  %v1179_v2 = vcombine.low %v5569_v42, %v5611_v17  ;;  %v7546_v11 = vld [vmem:[#allocation43_spill] sm:$0xff] }
 0x138   : > { %v771_v40 = vcombine.low %v5701_v33, %v5749_v62  ;;  %v891_v4 = vcombine.low %v5699_v10, %v5747_v30  ;;  %v1323_v18 = vrot.slane %v1315_v32, %v4879_v31 }
 0x139   : > { %3507 = vrot.lane.b32.xlu1 %v5026_v29, %s4543_s6  ;;  %3487 = vrot.lane.b32.xlu0 %v5439_v37, %s4543_s6  ;;  %v852_v29 = vcombine.high %v795_v45, %v811_v7  ;;  %v5809_v45 = vrot.slane %v851_v25, %v5186_v50  ;;  %v1316_v7 = vcombine.high %v7542_v47, %v5476_v53 }
 0x13a   : > { %v779_v61 = vrot.slane %v771_v40, %v4879_v31  ;;  %v899_v40 = vrot.slane %v891_v4, %v4879_v31  ;;  %v1339_v53 = vrot.slane %v1331_v41, %v4879_v31  ;;  %v1195_v47 = vcombine.low %v7546_v11, %v5571_v43 }
 0x13b   : > { %v722_v6 = vpop.permute.xlu0 %721  ;;  %v5791_v37 = vpop.permute.xlu1 %1105  ;;  %7545 = vst [vmem:[#allocation35_spill] sm:$0xff] %v5809_v45  ;;  %v5825_v54 = vrot.slane %v852_v29, %v5186_v50  ;;  %v5839_v29 = vrot.slane %v867_v14, %v5186_v50  ;;  %v5842_v32 = vrot.slane %v1316_v7, %v4879_v31  ;;  %v5845_v16 = vrot.slane %v1332_v13, %v4879_v31 }
 0x13c   : > { %v907_v22 = vcombine.low %v5723_v12, %v722_v6  ;;  %v819_v4 = vcombine.low %v763_v57, %v779_v61  ;;  %v1379_v13 = vcombine.low %v1323_v18, %v1339_v53 }
 0x13d   : > { %3481 = vrot.lane.b32.xlu1 %v5141_v59, %s4543_s6  ;;  %3495 = vrot.lane.b32.xlu0 %v5039_v34, %s4543_s6  ;;  %v908_v59 = vcombine.high %v5723_v12, %v722_v6  ;;  %v892_v12 = vcombine.high %v5699_v10, %v5747_v30  ;;  %7547 = vst [vmem:[#allocation36_spill] sm:$0xff] %v5845_v16 }
 0x13e   : > { %v915_v63 = vrot.slane %v907_v22, %v4879_v31  ;;  %v772_v22 = vcombine.high %v5701_v33, %v5749_v62  ;;  %v1180_v10 = vcombine.high %v5569_v42, %v5611_v17  ;;  %v756_v33 = vcombine.high %v5681_v38, %v5725_v26 }
 0x13f   : > { %v5820_v34 = vpop.permute.xlu0 %1101  ;;  %v5822_v25 = vpop.permute.xlu1 %1113  ;;  %v922_v30 = vrot.slane %v908_v59, %v4879_v31  ;;  %v1196_v17 = vcombine.high %v7546_v11, %v5571_v43  ;;  %v1203_v42 = vrot.slane %v1195_v47, %v4879_v31  ;;  %v906_v38 = vrot.slane %v892_v12, %v4879_v31 }
 0x140   : > { %v955_v6 = vcombine.low %v899_v40, %v915_v63  ;;  %v956_v62 = vcombine.high %v899_v40, %v915_v63  ;;  %v786_v59 = vrot.slane %v772_v22, %v4879_v31  ;;  %v820_v63 = vcombine.high %v763_v57, %v779_v61 }
 0x141   : > { %3489 = vrot.lane.b32.xlu1 %v5408_v52, %s4543_s6  ;;  %3503 = vrot.lane.b32.xlu0 %v5050_v48, %s4543_s6  ;;  %v1187_v52 = vrot.slane %v1179_v2, %v4879_v31  ;;  %v5868_v26 = vrot.slane %v819_v4, %v5186_v50  ;;  %v5873_v40 = vrot.slane %v868_v20, %v5186_v50 }
 0x142   : > { %v5855_v14 = vrot.slane %v955_v6, %v5186_v50  ;;  %v1380_v2 = vcombine.high %v1323_v18, %v1339_v53  ;;  %v5878_v11 = vrot.slane %v1180_v10, %v4879_v31  ;;  %v770_v61 = vrot.slane %v756_v33, %v4879_v31 }
 0x143   : > { %v5857_v41 = vpop.permute.xlu0 %1109  ;;  %v5859_v7 = vpop.permute.xlu1 %1103  ;;  %7549 = vst [vmem:[#allocation43_spill] sm:$0xff] %v5868_v26  ;;  %v5884_v57 = vrot.slane %v956_v62, %v5186_v50  ;;  %v971_v47 = vcombine.low %v906_v38, %v922_v30  ;;  %v5895_v22 = vrot.slane %v1196_v17, %v4879_v31  ;;  %v1243_v4 = vcombine.low %v1187_v52, %v1203_v42 }
 0x144   : > { %7548 = vst [vmem:[#allocation32_spill] sm:$0xff] %v5855_v14  ;;  %v1020_v18 = vcombine.high %v5855_v14, %v5777_v51  ;;  %v1244_v6 = vcombine.high %v1187_v52, %v1203_v42  ;;  %v5898_v10 = vrot.slane %v1379_v13, %v5186_v50  ;;  %v834_v33 = vrot.slane %v820_v63, %v5186_v50  ;;  %v7580_v51 = vld [vmem:[#allocation12_spill] sm:$0xff] }
 0x145   : > { %3497 = vrot.lane.b32.xlu1 %v5053_v15, %s4543_s6  ;;  %3477 = vrot.lane.b32.xlu0 %v7492_v60, %s4543_s6  ;;  %v835_v62 = vcombine.low %v770_v61, %v786_v59  ;;  %v884_v43 = vcombine.high %v5868_v26, %v5809_v45  ;;  %v5906_v60 = vrot.slane %v1380_v2, %v5186_v50  ;;  %v7579_v26 = vld [vmem:[#allocation23_spill] sm:$0xff] }
 0x146   : > { %7550 = vst [vmem:[#allocation69_spill] sm:$0xff] %v5898_v10  ;;  %v2116_v17 = vcombine.low %v5631_v0, %v5639_v19  ;;  %v972_v53 = vcombine.high %v906_v38, %v922_v30  ;;  %v2132_v13 = vcombine.low %v5613_v3, %v5633_v27  ;;  %v5917_v42 = vrot.slane %v971_v47, %v5186_v50 }
 0x147   : > { %v5886_v12 = vpop.permute.xlu0 %1099  ;;  %v5888_v20 = vpop.permute.xlu1 %1111  ;;  %v4186_v2 = vpack.i.bf16 %v1020_v18, %v884_v43  ;;  %v1022_v0 = vcombine.high %v5884_v57, %v5782_v1  ;;  %v5924_v30 = vrot.slane %v1243_v4, %v5186_v50  ;;  %v5927_v38 = vrot.slane %v1244_v6, %v5186_v50 }
 0x148   : > { %v1163_v52 = vcombine.low %v5859_v7, %v5888_v20  ;;  %v836_v47 = vcombine.high %v770_v61, %v786_v59  ;;  %v843_v27 = vrot.slane %v835_v62, %v5186_v50  ;;  %v1299_v43 = vcombine.low %v5791_v37, %v5822_v25 }
 0x149   : > { %3505 = vrot.lane.b32.xlu1 %v5056_v55, %s4543_s6  ;;  %3485 = vrot.lane.b32.xlu0 %v5411_v8, %s4543_s6  ;;  %7552 = vst [vmem:[#allocation71_spill] sm:$0xff] %v5924_v30  ;;  %v1283_v8 = vcombine.low %v5820_v34, %v5857_v41  ;;  %v886_v18 = vcombine.high %v834_v33, %v5825_v54 }
 0x14a   : > { %v5940_v6 = vrot.slane %v972_v53, %v5186_v50  ;;  %v1171_v19 = vrot.slane %v1163_v52, %v4879_v31  ;;  %v5947_v59 = vrot.slane %v2116_v17, %v4879_v31  ;;  %v5950_v61 = vrot.slane %v2132_v13, %v4879_v31 }
 0x14b   : > { %v1108_v63 = vpop.permute.xlu0 %1107  ;;  %v5919_v48 = vpop.permute.xlu1 %1906  ;;  %v4196_v4 = vpack.i.bf16 %v1022_v0, %v886_v18  ;;  %v1024_v53 = vcombine.high %v5917_v42, %v5785_v46  ;;  %v1291_v52 = vrot.slane %v1283_v8, %v4879_v31  ;;  %v1021_v17 = vcombine.low %v5884_v57, %v5782_v1 }
 0x14c   : > { %7551 = vst [vmem:[#allocation70_spill] sm:$0xff] %v5919_v48  ;;  %v1147_v3 = vcombine.low %v5886_v12, %v1108_v63  ;;  %v850_v13 = vrot.slane %v836_v47, %v5186_v50  ;;  %v1307_v55 = vrot.slane %v1299_v43, %v4879_v31  ;;  %v888_v0 = vcombine.high %v843_v27, %v5839_v29 }
 0x14d   : > { %4187 = vrot.lane.b32.xlu1 %v4186_v2, %s4547_s17  ;;  %3493 = vrot.lane.b32.xlu0 %v5083_v36, %s4543_s6  ;;  %v885_v18 = vcombine.low %v834_v33, %v5825_v54  ;;  %v1148_v16 = vcombine.high %v5886_v12, %v1108_v63  ;;  %v1026_v8 = vcombine.high %v5940_v6, %v5794_v9  ;;  %v7570_v33 = vld [vmem:[#allocation31_spill] sm:$0xff] }
 0x14e   : > { %v1155_v15 = vrot.slane %v1147_v3, %v4879_v31  ;;  %v1023_v1 = vcombine.low %v5917_v42, %v5785_v46  ;;  %v4206_v12 = vpack.i.bf16 %v1024_v53, %v888_v0  ;;  %v1347_v63 = vcombine.low %v1291_v52, %v1307_v55 }
 0x14f   : > { %v5952_v62 = vpop.permute.xlu0 %1902  ;;  %v5954_v2 = vpop.permute.xlu1 %1914  ;;  %v4191_v46 = vpack.i.bf16 %v1021_v17, %v885_v18  ;;  %v887_v42 = vcombine.low %v843_v27, %v5839_v29  ;;  %v1348_v53 = vcombine.high %v1291_v52, %v1307_v55  ;;  %v5998_v0 = vrot.slane %v1148_v16, %v4879_v31 }
 0x150   : > { %7553 = vst [vmem:[#allocation72_spill] sm:$0xff] %v5952_v62  ;;  %7554 = vst [vmem:[#allocation73_spill] sm:$0xff] %v5954_v2  ;;  %v1211_v36 = vcombine.low %v1155_v15, %v1171_v19  ;;  %v2100_v3 = vcombine.low %v5919_v48, %v5954_v2  ;;  %v1212_v57 = vcombine.high %v1155_v15, %v1171_v19 }
 0x151   : > { %4197 = vrot.lane.b32.xlu1 %v4196_v4, %s4549_s20  ;;  %3501 = vrot.lane.b32.xlu0 %v5086_v39, %s4543_s6  ;;  %v1164_v4 = vcombine.high %v5859_v7, %v5888_v20  ;;  %v1300_v15 = vcombine.high %v5791_v37, %v5822_v25  ;;  %v890_v19 = vcombine.high %v850_v13, %v5873_v40 }
 0x152   : > { %v5978_v47 = vrot.slane %v1211_v36, %v5186_v50  ;;  %v1284_v36 = vcombine.high %v5820_v34, %v5857_v41  ;;  %v6001_v7 = vrot.slane %v2100_v3, %v4879_v31  ;;  %v6008_v34 = vrot.slane %v1212_v57, %v5186_v50 }
 0x153   : > { %v5980_v43 = vpop.permute.xlu0 %1910  ;;  %v5982_v54 = vpop.permute.xlu1 %2298  ;;  %v4216_v27 = vpack.i.bf16 %v1026_v8, %v890_v19  ;;  %v4201_v55 = vpack.i.bf16 %v1023_v1, %v887_v42  ;;  %v6017_v16 = vrot.slane %v1347_v63, %v5186_v50  ;;  %v1025_v3 = vcombine.low %v5940_v6, %v5794_v9 }
 0x154   : > { %7555 = vst [vmem:[#allocation74_spill] sm:$0xff] %v5978_v47  ;;  %7556 = vst [vmem:[#allocation75_spill] sm:$0xff] %v5980_v43  ;;  %v2084_v48 = vcombine.low %v5952_v62, %v5980_v43  ;;  %v1276_v29 = vcombine.high %v5978_v47, %v5924_v30  ;;  %v2180_v52 = vcombine.low %v5947_v59, %v5950_v61  ;;  %v7613_v62 = vld [vmem:[#allocation56_spill] sm:$0xff] }
 0x155   : > { %7557 = vst [vmem:[#allocation76_spill] sm:$0xff] %v5982_v54  ;;  %4207 = vrot.lane.b32.xlu1 %v4206_v12, %s4550_s22  ;;  %4192 = vrot.lane.b32.xlu0 %v4191_v46, %s4545_s7  ;;  %7560 = vst [vmem:[#allocation79_spill] sm:$0xff] %v6017_v16  ;;  %v1685_v17 = vcombine.high %v5594_v58, %v5597_v44  ;;  %v7561_v18 = vcombine.high %v5496_v5, %v5474_v35 }
 0x156   : > { %v6004_v20 = vrot.slane %v2084_v48, %v4879_v31  ;;  %v6020_v48 = vrot.slane %v1164_v4, %v4879_v31  ;;  %v1314_v57 = vrot.slane %v1300_v15, %v4879_v31  ;;  %v1298_v9 = vrot.slane %v1284_v36, %v4879_v31 }
 0x157   : > { %v6010_v37 = vpop.permute.xlu0 %2294  ;;  %v6012_v25 = vpop.permute.xlu1 %2306  ;;  %v1635_v8 = vrot.slane %v7561_v18, %v5186_v50  ;;  %v889_v12 = vcombine.low %v850_v13, %v5873_v40  ;;  %v4226_v5 = vpack.i.bf16 %v1685_v17, %v1276_v29  ;;  %v1277_v46 = vcombine.low %v6008_v34, %v5927_v38  ;;  %v7567_v17 = vld [vmem:[#allocation10_spill] sm:$0xff] }
 0x158   : > { %7558 = vst [vmem:[#allocation77_spill] sm:$0xff] %v6010_v37  ;;  %7559 = vst [vmem:[#allocation78_spill] sm:$0xff] %v6012_v25  ;;  %v2148_v41 = vcombine.low %v6004_v20, %v6001_v7  ;;  %v1227_v6 = vcombine.low %v5998_v0, %v6020_v48  ;;  %v1362_v36 = vrot.slane %v1348_v53, %v5186_v50 }
 0x159   : > { %4217 = vrot.lane.b32.xlu1 %v4216_v27, %s4551_s26  ;;  %4202 = vrot.lane.b32.xlu0 %v4201_v55, %s4546_s8  ;;  %v4211_v40 = vpack.i.bf16 %v1025_v3, %v889_v12  ;;  %v1412_v13 = vcombine.high %v6017_v16, %v5898_v10  ;;  %v6060_v42 = vrot.slane %v2180_v52, %v5186_v50  ;;  %v7577_v10 = vld [vmem:[#allocation61_spill] sm:$0xff] }
 0x15a   : > { %v6044_v63 = vrot.slane %v2148_v41, %v5186_v50  ;;  %v2524_v27 = vcombine.low %v5641_v23, %v5653_v21  ;;  %v2492_v55 = vcombine.low %v5982_v54, %v6012_v25  ;;  %v1686_v53 = vcombine.low %v1635_v8, %v5752_v28 }
 0x15b   : > { %v6046_v4 = vpop.permute.xlu0 %2302  ;;  %v6048_v35 = vpop.permute.xlu1 %1904  ;;  %7564 = vst [vmem:[#allocation82_spill] sm:$0xff] %v6060_v42  ;;  %v7565_v29 = vcombine.low %v5878_v11, %v5895_v22  ;;  %v1364_v3 = vcombine.high %v1298_v9, %v1314_v57  ;;  %v6075_v52 = vrot.slane %v1227_v6, %v5186_v50  ;;  %v7566_v6 = vcombine.low %v5651_v56, %v5659_v24 }
 0x15c   : > { %7562 = vst [vmem:[#allocation80_spill] sm:$0xff] %v6044_v63  ;;  %7563 = vst [vmem:[#allocation81_spill] sm:$0xff] %v6046_v4  ;;  %v2476_v19 = vcombine.low %v6010_v37, %v6046_v4  ;;  %v4236_v15 = vpack.i.bf16 %v1686_v53, %v1277_v46  ;;  %v1363_v1 = vcombine.low %v1298_v9, %v1314_v57  ;;  %v7572_v57 = vld [vmem:[#allocation36_spill] sm:$0xff] }
 0x15d   : > { %4227 = vrot.lane.b32.xlu1 %v4226_v5, %s4547_s17  ;;  %v6072_v41 = vrot.slane %v7565_v29, %v5186_v50  ;;  %4212 = vrot.lane.b32.xlu0 %v4211_v40, %s4548_s19  ;;  %v1278_v29 = vcombine.high %v6008_v34, %v5927_v38  ;;  %v2516_v40 = vrot.slane %v7566_v6, %v4879_v31  ;;  %v7569_v34 = vld [vmem:[#allocation66_spill] sm:$0xff] }
 0x15e   : > { %v2484_v18 = vrot.slane %v2476_v19, %v4879_v31  ;;  %v7568_v19 = vcombine.high %v5540_v49, %v7567_v17  ;;  %v1413_v47 = vcombine.low %v1362_v36, %v5906_v60  ;;  %v2532_v46 = vrot.slane %v2524_v27, %v4879_v31  ;;  %v7575_v27 = vld [vmem:[#allocation60_spill] sm:$0xff] }
 0x15f   : > { %v6081_v12 = vpop.permute.xlu1 %1912  ;;  %v6083_v5 = vpop.permute.xlu0 %1900  ;;  %v2500_v53 = vrot.slane %v2492_v55, %v4879_v31  ;;  %v1687_v38 = vcombine.high %v1635_v8, %v5752_v28  ;;  %v7571_v44 = vcombine.low %v7569_v34, %v7570_v33  ;;  %v7573_v9 = vcombine.high %v5842_v32, %v7572_v57  ;;  %v7576_v55 = vld [vmem:[#allocation63_spill] sm:$0xff] }
 0x160   : > { %v4221_v30 = vpack.i.bf16 %v7568_v19, %v1412_v13  ;;  %v7574_v19 = vld [vmem:[#allocation62_spill] sm:$0xff]  ;;  %v6118_v28 = vrot.slane %v1364_v3, %v5186_v50  ;;  %v1279_v49 = vcombine.low %v6075_v52, %v6072_v41  ;;  %v1371_v45 = vrot.slane %v1363_v1, %v5186_v50 }
 0x161   : > { %4237 = vrot.lane.b32.xlu1 %v4236_v15, %s4545_s7  ;;  %v6105_v6 = vrot.slane %v7571_v44, %v5186_v50  ;;  %v6111_v13 = vrot.slane %v7573_v9, %v5186_v50  ;;  %v1996_v58 = vcombine.low %v7575_v27, %v7574_v19  ;;  %v1980_v15 = vcombine.low %v7577_v10, %v7576_v55 }
 0x162   : > { %4222 = vrot.lane.b32.xlu0 %v4221_v30, %s4547_s17  ;;  %v2540_v8 = vcombine.low %v2484_v18, %v2500_v53  ;;  %v1964_v44 = vcombine.low %v6048_v35, %v6081_v12  ;;  %v4246_v9 = vpack.i.bf16 %v1687_v38, %v1278_v29  ;;  %v7581_v30 = vcombine.low %v7579_v26, %v7580_v51  ;;  %v7583_v38 = vld [vmem:[#allocation67_spill] sm:$0xff] }
 0x163   : > { %v6123_v16 = vpop.permute.xlu0 %1908  ;;  %v6125_v17 = vpop.permute.xlu1 %4157  ;;  %v1414_v2 = vcombine.high %v1362_v36, %v5906_v60  ;;  %v7582_v54 = vcombine.low %v5842_v32, %v7572_v57  ;;  %v2572_v29 = vcombine.low %v2516_v40, %v2532_v46  ;;  %v1688_v1 = vcombine.low %v6105_v6, %v7583_v38 }
 0x164   : > { %7578 = vst [vmem:[#allocation66_spill] sm:$0xff] %v6125_v17  ;;  %v1948_v3 = vcombine.low %v6083_v5, %v6123_v16  ;;  %v4231_v14 = vpack.i.bf16 %v7581_v30, %v1413_v47  ;;  %v6144_v25 = vrot.slane %v1996_v58, %v4879_v31  ;;  %v6147_v37 = vrot.slane %v1980_v15, %v4879_v31 }
 0x165   : > { %v1403_v17 = vrot.slane %v7582_v54, %v5186_v50  ;;  %4247 = vrot.lane.b32.xlu1 %v4246_v9, %s4549_s20  ;;  %v1417_v60 = vcombine.low %v6118_v28, %v6111_v13  ;;  %v2541_v32 = vcombine.high %v2484_v18, %v2500_v53  ;;  %v6156_v54 = vrot.slane %v2540_v8, %v5186_v50  ;;  %v7589_v8 = vld [vmem:[#allocation19_spill] sm:$0xff] }
 0x166   : > { %v6150_v47 = vrot.slane %v1948_v3, %v4879_v31  ;;  %4232 = vrot.lane.b32.xlu0 %v4231_v14, %s4545_s7  ;;  %v6159_v36 = vrot.slane %v1964_v44, %v4879_v31  ;;  %v4256_v15 = vpack.i.bf16 %v1688_v1, %v1279_v49  ;;  %v7587_v9 = vcombine.high %v7579_v26, %v7580_v51  ;;  %v7590_v44 = vld [vmem:[#allocation18_spill] sm:$0xff] }
 0x167   : > { %7584 = vst [vmem:[#allocation31_spill] sm:$0xff] %v6156_v54  ;;  %v6161_v58 = vpop.permute.xlu1 %4167  ;;  %v6163_v57 = vpop.permute.xlu0 %4152  ;;  %v1415_v14 = vcombine.low %v1371_v45, %v1403_v17  ;;  %v2573_v30 = vcombine.high %v2516_v40, %v2532_v46  ;;  %v6169_v4 = vrot.slane %v2572_v29, %v5186_v50  ;;  %v2149_v18 = vcombine.high %v6004_v20, %v6001_v7  ;;  %v7593_v40 = vld [vmem:[#allocation26_spill] sm:$0xff]  ;;  %v7594_v46 = vld [vmem:[#allocation11_spill] sm:$0xff] }
 0x168   : > { %7585 = vst [vmem:[#allocation36_spill] sm:$0xff] %v6161_v58  ;;  %7586 = vst [vmem:[#allocation62_spill] sm:$0xff] %v6163_v57  ;;  %v4241_v3 = vpack.i.bf16 %v7587_v9, %v1414_v2  ;;  %v2012_v53 = vcombine.low %v6150_v47, %v6159_v36  ;;  %v2181_v49 = vcombine.high %v5947_v59, %v5950_v61  ;;  %v7596_v61 = vld [vmem:[#allocation20_spill] sm:$0xff]  ;;  %v7603_v57 = vld [vmem:[#allocation15_spill] sm:$0xff] }
 0x169   : > { %7588 = vst [vmem:[#allocation60_spill] sm:$0xff] %v6169_v4  ;;  %4257 = vrot.lane.b32.xlu1 %v4256_v15, %s4546_s8  ;;  %v2790_v51 = vcombine.high %v7590_v44, %v7589_v8  ;;  %v2044_v26 = vcombine.low %v6147_v37, %v6144_v25  ;;  %v6184_v2 = vrot.slane %v2541_v32, %v5186_v50  ;;  %v7597_v9 = vld [vmem:[#allocation24_spill] sm:$0xff] }
 0x16a   : > { %4242 = vrot.lane.b32.xlu0 %v4241_v3, %s4549_s20  ;;  %v7595_v29 = vcombine.low %v7593_v40, %v7594_v46  ;;  %v2605_v59 = vcombine.high %v6156_v54, %v6169_v4  ;;  %v2774_v15 = vcombine.high %v7596_v61, %v5086_v39  ;;  %v7598_v3 = vld [vmem:[#allocation13_spill] sm:$0xff]  ;;  %v1416_v32 = vcombine.high %v1371_v45, %v1403_v17  ;;  %v7601_v39 = vld [vmem:[#allocation64_spill] sm:$0xff] }
 0x16b   : > { %v6186_v7 = vpop.permute.xlu1 %4177  ;;  %v6188_v20 = vpop.permute.xlu0 %4162  ;;  %v7599_v8 = vcombine.low %v7597_v9, %v7598_v3  ;;  %v6201_v58 = vrot.slane %v2573_v30, %v5186_v50  ;;  %v7605_v17 = vld [vmem:[#allocation17_spill] sm:$0xff]  ;;  %v7606_v30 = vld [vmem:[#allocation16_spill] sm:$0xff] }
 0x16c   : > { %7591 = vst [vmem:[#allocation63_spill] sm:$0xff] %v6186_v7  ;;  %7592 = vst [vmem:[#allocation61_spill] sm:$0xff] %v6188_v20  ;;  %v4271_v1 = vpack.i.bf16 %v7595_v29, %v1417_v60  ;;  %v6204_v7 = vrot.slane %v2149_v18, %v5186_v50  ;;  %v6207_v20 = vrot.slane %v2012_v53, %v5186_v50  ;;  %v7602_v29 = vld [vmem:[#allocation65_spill] sm:$0xff] }
 0x16d   : > { %v4251_v44 = vpack.i.bf16 %v7599_v8, %v1415_v14  ;;  %v2213_v60 = vcombine.high %v6044_v63, %v6060_v42  ;;  %v1669_v61 = vcombine.high %v7602_v29, %v7601_v39  ;;  %v7604_v14 = vld [vmem:[#allocation14_spill] sm:$0xff]  ;;  %v2910_v8 = vcombine.high %v7606_v30, %v7605_v17  ;;  %v7609_v29 = vld [vmem:[#allocation59_spill] sm:$0xff] }
 0x16e   : > { %7600 = vst [vmem:[#allocation23_spill] sm:$0xff] %v6207_v20  ;;  %4272 = vrot.lane.b32.xlu1 %v4271_v1, %s4548_s19  ;;  %v2926_v45 = vcombine.high %v7604_v14, %v7603_v57  ;;  %v2804_v18 = vrot.slane %v2790_v51, %v4879_v31  ;;  %v6221_v53 = vrot.slane %v2181_v49, %v5186_v50  ;;  %v7610_v14 = vld [vmem:[#allocation57_spill] sm:$0xff]  ;;  %v7612_v30 = vld [vmem:[#allocation58_spill] sm:$0xff] }
 0x16f   : > { %4252 = vrot.lane.b32.xlu0 %v4251_v44, %s4546_s8  ;;  %v6224_v1 = vrot.slane %v2044_v26, %v5186_v50  ;;  %v6226_v42 = vpop.permute.xlu1 %2296  ;;  %v6228_v63 = vpop.permute.xlu0 %4172  ;;  %v4276_v39 = vpack.i.bf16 %v2605_v59, %v2213_v60  ;;  %v2606_v57 = vcombine.low %v6184_v2, %v6201_v58  ;;  %v2117_v17 = vcombine.high %v7610_v14, %v7609_v29  ;;  %v7617_v29 = vld [vmem:[#allocation45_spill] sm:$0xff] }
 0x170   : > { %7608 = vst [vmem:[#allocation67_spill] sm:$0xff] %v6228_v63  ;;  %v2788_v51 = vrot.slane %v2774_v15, %v4879_v31  ;;  %v7611_v49 = vcombine.high %v7597_v9, %v7598_v3  ;;  %v1280_v26 = vcombine.high %v6075_v52, %v6072_v41  ;;  %v2133_v43 = vcombine.high %v7613_v62, %v7612_v30  ;;  %v7615_v41 = vld [vmem:[#allocation41_spill] sm:$0xff] }
 0x171   : > { %7607 = vst [vmem:[#allocation12_spill] sm:$0xff] %v6224_v1  ;;  %v2214_v59 = vcombine.low %v6204_v7, %v6221_v53  ;;  %v2940_v9 = vrot.slane %v2926_v45, %v4879_v31  ;;  %v2924_v3 = vrot.slane %v2910_v8, %v4879_v31  ;;  %v1689_v62 = vcombine.high %v6105_v6, %v7583_v38 }
 0x172   : > { %v4261_v44 = vpack.i.bf16 %v7611_v49, %v1416_v32  ;;  %4277 = vrot.lane.b32.xlu1 %v4276_v39, %s4547_s17  ;;  %v7614_v32 = vld [vmem:[#allocation40_spill] sm:$0xff]  ;;  %v1418_v45 = vcombine.high %v6118_v28, %v6111_v13  ;;  %v2509_v8 = vcombine.high %v5651_v56, %v5659_v24  ;;  %v2131_v6 = vrot.slane %v2117_v17, %v4879_v31 }
 0x173   : > { %v2974_v52 = vcombine.high %v7615_v41, %v7614_v32  ;;  %v7616_v39 = vld [vmem:[#allocation44_spill] sm:$0xff]  ;;  %v6258_v49 = vpop.permute.xlu1 %2304  ;;  %v6260_v30 = vpop.permute.xlu0 %4182  ;;  %v4286_v15 = vpack.i.bf16 %v2606_v57, %v2214_v59  ;;  %v2853_v32 = vcombine.low %v2788_v51, %v2804_v18  ;;  %v4266_v41 = vpack.i.bf16 %v1689_v62, %v1280_v26 }
 0x174   : > { %4262 = vrot.lane.b32.xlu0 %v4261_v44, %s4550_s22  ;;  %v2838_v14 = vcombine.high %v7617_v29, %v7616_v39  ;;  %7618 = vst [vmem:[#allocation19_spill] sm:$0xff] %v6260_v30  ;;  %v2525_v44 = vcombine.high %v5641_v23, %v5653_v21  ;;  %v2147_v38 = vrot.slane %v2133_v43, %v4879_v31  ;;  %v7619_v23 = vld [vmem:[#allocation37_spill] sm:$0xff]  ;;  %v7620_v21 = vld [vmem:[#allocation38_spill] sm:$0xff] }
 0x175   : > { %v2854_v39 = vcombine.high %v2788_v51, %v2804_v18  ;;  %v2989_v29 = vcombine.low %v2924_v3, %v2940_v9  ;;  %v2990_v57 = vcombine.high %v2924_v3, %v2940_v9  ;;  %v6273_v13 = vrot.slane %v1669_v61, %v5186_v50 }
 0x176   : > { %4287 = vrot.lane.b32.xlu1 %v4286_v15, %s4545_s7  ;;  %v6276_v24 = vrot.slane %v2974_v52, %v5186_v50  ;;  %v2894_v56 = vcombine.high %v7620_v21, %v7619_v23  ;;  %v7621_v43 = vcombine.high %v7593_v40, %v7594_v46  ;;  %v2607_v51 = vcombine.high %v6184_v2, %v6201_v58  ;;  %v7622_v52 = vld [vmem:[#allocation39_spill] sm:$0xff]  ;;  %v7623_v40 = vld [vmem:[#allocation42_spill] sm:$0xff] }
 0x177   : > { %v6280_v28 = vpop.permute.xlu1 %2312  ;;  %v6282_v17 = vpop.permute.xlu0 %2292  ;;  %v6290_v61 = vrot.slane %v2838_v14, %v5186_v50  ;;  %v1260_v26 = vcombine.high %v5878_v11, %v5895_v22  ;;  %v2523_v59 = vrot.slane %v2509_v8, %v4879_v31  ;;  %v2539_v15 = vrot.slane %v2525_v44, %v4879_v31  ;;  %v7626_v23 = vld [vmem:[#allocation46_spill] sm:$0xff]  ;;  %v7627_v21 = vld [vmem:[#allocation47_spill] sm:$0xff] }
 0x178   : > { %4267 = vrot.lane.b32.xlu0 %v4266_v41, %s4550_s22  ;;  %v4296_v18 = vpack.i.bf16 %v7621_v43, %v1418_v45  ;;  %v6297_v9 = vrot.slane %v2853_v32, %v5186_v50  ;;  %v2196_v3 = vcombine.low %v2131_v6, %v2147_v38  ;;  %v2878_v46 = vcombine.high %v7623_v40, %v7622_v52  ;;  %v7625_v41 = vld [vmem:[#allocation21_spill] sm:$0xff] }
 0x179   : > { %v2215_v58 = vcombine.high %v6204_v7, %v6221_v53  ;;  %v6305_v2 = vrot.slane %v2854_v39, %v5186_v50  ;;  %v1997_v11 = vcombine.high %v7575_v27, %v7574_v19  ;;  %v1981_v22 = vcombine.high %v7577_v10, %v7576_v55  ;;  %v7624_v55 = vld [vmem:[#allocation33_spill] sm:$0xff] }
 0x17a   : > { %4297 = vrot.lane.b32.xlu1 %v4296_v18, %s4551_s26  ;;  %v6312_v62 = vrot.slane %v2989_v29, %v5186_v50  ;;  %v6315_v14 = vrot.slane %v2990_v57, %v5186_v50  ;;  %v1637_v45 = vcombine.high %v7569_v34, %v7570_v33  ;;  %v6320_v7 = vrot.slane %v2894_v56, %v4879_v31  ;;  %v7629_v56 = vld [vmem:[#allocation22_spill] sm:$0xff] }
 0x17b   : > { %v2197_v53 = vcombine.high %v2131_v6, %v2147_v38  ;;  %v2321_v8 = vpop.permute.xlu1 %2320  ;;  %v2301_v44 = vpop.permute.xlu0 %2300  ;;  %v4306_v32 = vpack.i.bf16 %v2607_v51, %v2215_v58  ;;  %v6323_v19 = vrot.slane %v1260_v26, %v5186_v50  ;;  %v2588_v10 = vcombine.low %v2523_v59, %v2539_v15  ;;  %v7628_v38 = vld [vmem:[#allocation34_spill] sm:$0xff] }
 0x17c   : > { %v2589_v27 = vcombine.high %v2523_v59, %v2539_v15  ;;  %v2758_v39 = vcombine.high %v7625_v41, %v7624_v55  ;;  %v6328_v29 = vrot.slane %v2196_v3, %v5186_v50  ;;  %v6331_v57 = vrot.slane %v2878_v46, %v4879_v31 }
 0x17d   : > { %v2742_v43 = vcombine.high %v7629_v56, %v7628_v38  ;;  %v2011_v18 = vrot.slane %v1997_v11, %v4879_v31  ;;  %v1995_v51 = vrot.slane %v1981_v22, %v4879_v31  ;;  %v2045_v26 = vcombine.high %v6147_v37, %v6144_v25  ;;  %v7631_v38 = vld [vmem:[#allocation48_spill] sm:$0xff]  ;;  %v7632_v56 = vld [vmem:[#allocation49_spill] sm:$0xff] }
 0x17e   : > { %4307 = vrot.lane.b32.xlu1 %v4306_v32, %s4549_s20  ;;  %v2340_v59 = vcombine.low %v6282_v17, %v2301_v44  ;;  %v6344_v15 = vrot.slane %v2197_v53, %v5186_v50  ;;  %v1949_v40 = vcombine.high %v6083_v5, %v6123_v16  ;;  %v6355_v11 = vrot.slane %v2588_v10, %v5186_v50 }
 0x17f   : > { %v6352_v46 = vpop.permute.xlu1 %3091  ;;  %v2309_v58 = vpop.permute.xlu0 %2308  ;;  %v6358_v37 = vrot.slane %v2589_v27, %v5186_v50  ;;  %v6361_v25 = vrot.slane %v2758_v39, %v4879_v31  ;;  %v2356_v22 = vcombine.low %v6226_v42, %v6258_v49  ;;  %v6366_v53 = vrot.slane %v2742_v43, %v4879_v31  ;;  %v7641_v43 = vld [vmem:[#allocation77_spill] sm:$0xff] }
 0x180   : > { %7630 = vst [vmem:[#allocation18_spill] sm:$0xff] %v6352_v46  ;;  %v1965_v16 = vcombine.high %v6048_v35, %v6081_v12  ;;  %v2388_v5 = vcombine.low %v6280_v28, %v2321_v8  ;;  %v2341_v32 = vcombine.high %v6282_v17, %v2301_v44  ;;  %v6373_v10 = vrot.slane %v2045_v26, %v5186_v50 }
 0x181   : > { %v2060_v27 = vcombine.low %v1995_v51, %v2011_v18  ;;  %v2389_v55 = vcombine.high %v6280_v28, %v2321_v8  ;;  %v2348_v41 = vrot.slane %v2340_v59, %v4879_v31  ;;  %v2061_v39 = vcombine.high %v1995_v51, %v2011_v18 }
 0x182   : > { %v6380_v60 = vrot.slane %v1949_v40, %v4879_v31  ;;  %v2357_v35 = vcombine.high %v6226_v42, %v6258_v49  ;;  %v2013_v44 = vcombine.high %v6150_v47, %v6159_v36  ;;  %v2364_v28 = vrot.slane %v2356_v22, %v4879_v31 }
 0x183   : > { %v6384_v12 = vpop.permute.xlu1 %3099  ;;  %v2317_v17 = vpop.permute.xlu0 %2316  ;;  %v1228_v18 = vcombine.high %v5998_v0, %v6020_v48  ;;  %v6392_v51 = vrot.slane %v1965_v16, %v4879_v31  ;;  %v2396_v59 = vrot.slane %v2388_v5, %v4879_v31  ;;  %v6396_v42 = vrot.slane %v2341_v32, %v4879_v31  ;;  %v7640_v0 = vld [vmem:[#allocation81_spill] sm:$0xff] }
 0x184   : > { %7633 = vst [vmem:[#allocation26_spill] sm:$0xff] %v6384_v12  ;;  %v2372_v8 = vcombine.low %v2309_v58, %v2317_v17  ;;  %v2373_v26 = vcombine.high %v2309_v58, %v2317_v17  ;;  %v6399_v49 = vrot.slane %v2389_v55, %v4879_v31  ;;  %v2404_v40 = vcombine.low %v2348_v41, %v2364_v28 }
 0x185   : > { %v2028_v48 = vcombine.low %v6380_v60, %v6392_v51  ;;  %v6410_v58 = vrot.slane %v2357_v35, %v4879_v31  ;;  %v2405_v22 = vcombine.high %v2348_v41, %v2364_v28  ;;  %v6417_v32 = vrot.slane %v2013_v44, %v5186_v50 }
 0x186   : > { %v2380_v47 = vrot.slane %v2372_v8, %v4879_v31  ;;  %v6403_v36 = vrot.slane %v2373_v26, %v4879_v31  ;;  %v6422_v26 = vrot.slane %v2060_v27, %v5186_v50  ;;  %v6425_v52 = vrot.slane %v2061_v39, %v5186_v50 }
 0x187   : > { %v6412_v16 = vpop.permute.xlu1 %3107  ;;  %v6414_v5 = vpop.permute.xlu0 %3087  ;;  %v2420_v41 = vcombine.low %v6396_v42, %v6410_v58  ;;  %v6433_v35 = vrot.slane %v1637_v45, %v5186_v50  ;;  %v6436_v44 = vrot.slane %v1228_v18, %v5186_v50  ;;  %v6439_v28 = vrot.slane %v2404_v40, %v5186_v50  ;;  %v7643_v40 = vld [vmem:[#allocation78_spill] sm:$0xff] }
 0x188   : > { %7634 = vst [vmem:[#allocation11_spill] sm:$0xff] %v6414_v5  ;;  %v2436_v55 = vcombine.low %v2380_v47, %v2396_v59  ;;  %v2437_v17 = vcombine.high %v2380_v47, %v2396_v59  ;;  %v2452_v8 = vcombine.low %v6403_v36, %v6399_v49  ;;  %7635 = vst [vmem:[#allocation20_spill] sm:$0xff] %v6425_v52  ;;  %v7638_v59 = vld [vmem:[#allocation75_spill] sm:$0xff]  ;;  %v7639_v47 = vld [vmem:[#allocation72_spill] sm:$0xff] }
 0x189   : > { %7636 = vst [vmem:[#allocation24_spill] sm:$0xff] %v6439_v28  ;;  %v2085_v3 = vcombine.high %v7639_v47, %v7638_v59  ;;  %v2477_v6 = vcombine.high %v7641_v43, %v7640_v0  ;;  %v2419_v33 = vrot.slane %v2405_v22, %v5186_v50  ;;  %v2079_v43 = vcombine.high %v6417_v32, %v6373_v10 }
 0x18a   : > { %v6442_v27 = vrot.slane %v2436_v55, %v5186_v50  ;;  %v2451_v39 = vrot.slane %v2437_v17, %v5186_v50  ;;  %v6451_v34 = vrot.slane %v2452_v8, %v5186_v50  ;;  %v7644_v55 = vld [vmem:[#allocation76_spill] sm:$0xff]  ;;  %v6460_v17 = vrot.slane %v2028_v48, %v5186_v50 }
 0x18b   : > { %v6453_v45 = vpop.permute.xlu1 %3115  ;;  %v6455_v18 = vpop.permute.xlu0 %3095  ;;  %v2493_v4 = vcombine.high %v7644_v55, %v7643_v40  ;;  %v6467_v0 = vrot.slane %v2420_v41, %v5186_v50  ;;  %v2077_v8 = vcombine.high %v6207_v20, %v6224_v1  ;;  %v2822_v48 = vcombine.high %v6366_v53, %v6361_v25  ;;  %v7645_v40 = vld [vmem:[#allocation73_spill] sm:$0xff]  ;;  %v7646_v55 = vld [vmem:[#allocation70_spill] sm:$0xff] }
 0x18c   : > { %7637 = vst [vmem:[#allocation13_spill] sm:$0xff] %v6442_v27  ;;  %7642 = vst [vmem:[#allocation64_spill] sm:$0xff] %v6455_v18  ;;  %v2471_v22 = vcombine.high %v2419_v33, %v2451_v39  ;;  %v2469_v47 = vcombine.high %v6439_v28, %v6442_v27  ;;  %v2101_v54 = vcombine.high %v7646_v55, %v7645_v40 }
 0x18d   : > { %v3269_v59 = vcombine.low %v6414_v5, %v6455_v18  ;;  %v1281_v41 = vcombine.low %v6436_v44, %v6323_v19  ;;  %v2491_v30 = vrot.slane %v2477_v6, %v4879_v31  ;;  %v2472_v28 = vcombine.low %v6467_v0, %v6451_v34  ;;  %v7653_v18 = vld [vmem:[#allocation55_spill] sm:$0xff] }
 0x18e   : > { %v4316_v20 = vpack.i.bf16 %v2471_v22, %v2079_v43  ;;  %v4281_v27 = vpack.i.bf16 %v2469_v47, %v2077_v8  ;;  %v3285_v40 = vcombine.low %v6352_v46, %v6384_v12  ;;  %v1690_v55 = vcombine.low %v6433_v35, %v6273_v13 }
 0x18f   : > { %v6482_v63 = vpop.permute.xlu1 %3089  ;;  %v6484_v1 = vpop.permute.xlu0 %3103  ;;  %v1691_v52 = vcombine.high %v6433_v35, %v6273_v13  ;;  %v7647_v6 = vcombine.high %v7627_v21, %v7626_v23  ;;  %v2099_v43 = vrot.slane %v2085_v3, %v4879_v31  ;;  %v2507_v22 = vrot.slane %v2493_v4, %v4879_v31 }
 0x190   : > { %4317 = vrot.lane.b32.xlu1 %v4316_v20, %s4549_s20  ;;  %4282 = vrot.lane.b32.xlu0 %v4281_v27, %s4547_s17  ;;  %v2080_v8 = vcombine.low %v6460_v17, %v6422_v26  ;;  %v2115_v47 = vrot.slane %v2101_v54, %v4879_v31  ;;  %v3317_v13 = vcombine.low %v6412_v16, %v6453_v45 }
 0x191   : > { %v6498_v5 = vrot.slane %v7647_v6, %v5186_v50  ;;  %v6510_v23 = vrot.slane %v3269_v59, %v4879_v31  ;;  %v7648_v21 = vcombine.high %v7632_v56, %v7631_v38  ;;  %v2556_v20 = vcombine.low %v2491_v30, %v2507_v22 }
 0x192   : > { %v4326_v27 = vpack.i.bf16 %v2472_v28, %v2080_v8  ;;  %v4291_v6 = vpack.i.bf16 %v1690_v55, %v1281_v41  ;;  %v2470_v54 = vcombine.low %v2419_v33, %v2451_v39  ;;  %v6523_v46 = vrot.slane %v3285_v40, %v4879_v31  ;;  %v7651_v41 = vld [vmem:[#allocation53_spill] sm:$0xff]  ;;  %v7652_v40 = vld [vmem:[#allocation52_spill] sm:$0xff] }
 0x193   : > { %v6516_v4 = vrot.slane %v7648_v21, %v5186_v50  ;;  %v6518_v3 = vpop.permute.xlu1 %3097  ;;  %v6520_v35 = vpop.permute.xlu0 %3111  ;;  %v7649_v38 = vcombine.low %v6366_v53, %v6361_v25  ;;  %v6534_v21 = vrot.slane %v2822_v48, %v5186_v50  ;;  %v2164_v12 = vcombine.low %v2099_v43, %v2115_v47 }
 0x194   : > { %v3301_v59 = vcombine.low %v6484_v1, %v6520_v35  ;;  %4327 = vrot.lane.b32.xlu1 %v4326_v27, %s4546_s8  ;;  %4292 = vrot.lane.b32.xlu0 %v4291_v6, %s4548_s19  ;;  %v2078_v28 = vcombine.low %v6417_v32, %v6373_v10  ;;  %v7650_v39 = vcombine.low %v6331_v57, %v6320_v7 }
 0x195   : > { %v6531_v56 = vrot.slane %v7649_v38, %v5186_v50  ;;  %v3325_v25 = vrot.slane %v3317_v13, %v4879_v31  ;;  %v3333_v53 = vcombine.low %v6510_v23, %v6523_v46  ;;  %v3006_v55 = vcombine.high %v7652_v40, %v7651_v41  ;;  %v7654_v41 = vld [vmem:[#allocation54_spill] sm:$0xff] }
 0x196   : > { %v6544_v33 = vrot.slane %v7650_v39, %v5186_v50  ;;  %v3309_v48 = vrot.slane %v3301_v59, %v4879_v31  ;;  %v2557_v8 = vcombine.high %v2491_v30, %v2507_v22  ;;  %v2564_v27 = vrot.slane %v2556_v20, %v5186_v50 }
 0x197   : > { %v6553_v10 = vpop.permute.xlu1 %3105  ;;  %v6555_v32 = vpop.permute.xlu0 %3085  ;;  %v4301_v6 = vpack.i.bf16 %v2470_v54, %v2078_v28  ;;  %v1282_v38 = vcombine.high %v6436_v44, %v6323_v19  ;;  %v2165_v22 = vcombine.high %v2099_v43, %v2115_v47  ;;  %v2172_v20 = vrot.slane %v2164_v12, %v5186_v50 }
 0x198   : > { %v3365_v13 = vcombine.low %v3309_v48, %v3325_v25  ;;  %v6572_v44 = vrot.slane %v3333_v53, %v5186_v50  ;;  %v6582_v43 = vrot.slane %v2557_v8, %v5186_v50  ;;  %v3366_v47 = vcombine.high %v3309_v48, %v3325_v25 }
 0x199   : > { %4302 = vrot.lane.b32.xlu0 %v4301_v6, %s4545_s7  ;;  %v4311_v19 = vpack.i.bf16 %v1691_v52, %v1282_v38  ;;  %v2608_v53 = vcombine.low %v2564_v27, %v6355_v11  ;;  %v7656_v25 = vcombine.high %v6331_v57, %v6320_v7  ;;  %v6602_v8 = vrot.slane %v2165_v22, %v5186_v50  ;;  %v7657_v22 = vld [vmem:[#allocation66_spill] sm:$0xff] }
 0x19a   : > { %v6575_v28 = vrot.slane %v3365_v13, %v5186_v50  ;;  %v3334_v52 = vcombine.high %v6510_v23, %v6523_v46  ;;  %v2216_v38 = vcombine.low %v2172_v20, %v6328_v29  ;;  %v2609_v7 = vcombine.high %v2564_v27, %v6355_v11 }
 0x19b   : > { %v6584_v6 = vpop.permute.xlu1 %3113  ;;  %v6586_v54 = vpop.permute.xlu0 %3093  ;;  %v6599_v48 = vrot.slane %v7656_v25, %v5186_v50  ;;  %v6618_v46 = vrot.slane %v3366_v47, %v5186_v50  ;;  %v2610_v59 = vcombine.low %v6582_v43, %v6358_v37  ;;  %v3149_v11 = vcombine.low %v6482_v63, %v6518_v3 }
 0x19c   : > { %7655 = vst [vmem:[#allocation65_spill] sm:$0xff] %v6575_v28  ;;  %v3398_v13 = vcombine.high %v6572_v44, %v6575_v28  ;;  %v3133_v12 = vcombine.low %v6555_v32, %v6586_v54  ;;  %v4321_v25 = vpack.i.bf16 %v2608_v53, %v2216_v38  ;;  %v2217_v27 = vcombine.high %v2172_v20, %v6328_v29  ;;  %v7658_v28 = vld [vmem:[#allocation62_spill] sm:$0xff] }
 0x19d   : > { %4312 = vrot.lane.b32.xlu0 %v4311_v19, %s4551_s26  ;;  %v6633_v53 = vrot.slane %v3334_v52, %v5186_v50  ;;  %v2219_v29 = vcombine.high %v6602_v8, %v6344_v15  ;;  %v2029_v20 = vcombine.high %v6380_v60, %v6392_v51  ;;  %v3181_v38 = vcombine.low %v6553_v10, %v6584_v6 }
 0x19e   : > { %v4336_v30 = vpack.i.bf16 %v3398_v13, %v3006_v55  ;;  %v2218_v55 = vcombine.low %v6602_v8, %v6344_v15  ;;  %v3141_v52 = vrot.slane %v3133_v12, %v4879_v31  ;;  %v2473_v39 = vcombine.high %v6467_v0, %v6451_v34 }
 0x19f   : > { %v6620_v23 = vpop.permute.xlu1 %3483  ;;  %v3102_v19 = vpop.permute.xlu0 %3101  ;;  %v3399_v15 = vcombine.low %v6633_v53, %v6618_v46  ;;  %v3157_v60 = vrot.slane %v3149_v11, %v4879_v31  ;;  %v2081_v13 = vcombine.high %v6460_v17, %v6422_v26  ;;  %v4155_v12 = vunpack.i.h.bf16 %v7658_v28 }
 0x1a0   : > { %4337 = vrot.lane.b32.xlu1 %v4336_v30, %s4547_s17  ;;  %v4331_v30 = vpack.i.bf16 %v2609_v7, %v2217_v27  ;;  %v4346_v57 = vpack.i.bf16 %v2610_v59, %v2218_v55  ;;  %v3182_v7 = vcombine.high %v6553_v10, %v6584_v6  ;;  %v3134_v59 = vcombine.high %v6555_v32, %v6586_v54 }
 0x1a1   : > { %4322 = vrot.lane.b32.xlu0 %v4321_v25, %s4546_s8  ;;  %v2611_v34 = vcombine.high %v6582_v43, %v6358_v37  ;;  %v2453_v0 = vcombine.high %v6403_v36, %v6399_v49  ;;  %v3189_v26 = vrot.slane %v3181_v38, %v4879_v31  ;;  %v3197_v17 = vcombine.low %v3141_v52, %v3157_v60 }
 0x1a2   : > { %v3150_v10 = vcombine.high %v6482_v63, %v6518_v3  ;;  %v4341_v37 = vpack.i.bf16 %v2473_v39, %v2081_v13  ;;  %v7659_v49 = vcombine.low %v6498_v5, %v6276_v24  ;;  %v6682_v43 = vrot.slane %v2029_v20, %v5186_v50 }
 0x1a3   : > { %v6647_v47 = vpop.permute.xlu1 %3491  ;;  %v3110_v25 = vpop.permute.xlu0 %3109  ;;  %v4154_v3 = vunpack.i.l.bf16 %v7658_v28  ;;  %v6688_v27 = vrot.slane %v3182_v7, %v4879_v31  ;;  %v6691_v55 = vrot.slane %v3134_v59, %v4879_v31  ;;  %v3198_v39 = vcombine.high %v3141_v52, %v3157_v60  ;;  %v7660_v60 = vld [vmem:[#allocation30_spill] sm:$0xff] }
 0x1a4   : > { %v3165_v51 = vcombine.low %v3102_v19, %v3110_v25  ;;  %v3166_v8 = vcombine.high %v3102_v19, %v3110_v25  ;;  %4347 = vrot.lane.b32.xlu1 %v4346_v57, %s4548_s19  ;;  %v4356_v36 = vpack.i.bf16 %v3399_v15, %v7659_v49  ;;  %v2421_v57 = vcombine.high %v6396_v42, %v6410_v58  ;;  %v7668_v49 = vld [vmem:[#allocation11_spill] sm:$0xff] }
 0x1a5   : > { %4332 = vrot.lane.b32.xlu0 %v4331_v30, %s4550_s22  ;;  %v6696_v20 = vrot.slane %v2453_v0, %v5186_v50  ;;  %v6699_v42 = vrot.slane %v3197_v17, %v5186_v50  ;;  %v4366_v28 = vpack.i.bf16 %v2611_v34, %v2219_v29  ;;  %v6705_v13 = vrot.slane %v3150_v10, %v4879_v31  ;;  %v7663_v0 = vld [vmem:[#allocation29_spill] sm:$0xff] }
 0x1a6   : > { %v3173_v19 = vrot.slane %v3165_v51, %v4879_v31  ;;  %v6672_v32 = vrot.slane %v3166_v8, %v4879_v31  ;;  %v3400_v15 = vcombine.high %v6633_v53, %v6618_v46  ;;  %v7661_v51 = vld [vmem:[#allocation28_spill] sm:$0xff]  ;;  %v6723_v7 = vrot.slane %v2421_v57, %v5186_v50  ;;  %v7666_v10 = vld [vmem:[#allocation61_spill] sm:$0xff] }
 0x1a7   : > { %v6674_v54 = vpop.permute.xlu1 %3499  ;;  %v6676_v6 = vpop.permute.xlu0 %3479  ;;  %v7662_v8 = vcombine.low %v7660_v60, %v7661_v51  ;;  %v3302_v59 = vcombine.high %v6484_v1, %v6520_v35  ;;  %v3212_v46 = vrot.slane %v3198_v39, %v5186_v50  ;;  %v3213_v53 = vcombine.low %v6691_v55, %v6705_v13 }
 0x1a8   : > { %v3229_v11 = vcombine.low %v3173_v19, %v3189_v26  ;;  %v3230_v63 = vcombine.high %v3173_v19, %v3189_v26  ;;  %4357 = vrot.lane.b32.xlu1 %v4356_v36, %s4545_s7  ;;  %v3245_v52 = vcombine.low %v6672_v32, %v6688_v27  ;;  %v7664_v26 = vld [vmem:[#allocation27_spill] sm:$0xff]  ;;  %v4164_v1 = vunpack.i.l.bf16 %v7666_v10 }
 0x1a9   : > { %4342 = vrot.lane.b32.xlu0 %v4341_v37, %s4550_s22  ;;  %v682_v29 = vsel %vm668_vm8, %v7662_v8, %v4155_v12  ;;  %v7665_v17 = vcombine.low %v7663_v0, %v7664_v26  ;;  %v3318_v35 = vcombine.high %v6412_v16, %v6453_v45  ;;  %v7667_v37 = vld [vmem:[#allocation64_spill] sm:$0xff]  ;;  %v2474_v57 = vcombine.low %v6723_v7, %v6696_v20  ;;  %v7673_v26 = vld [vmem:[#allocation26_spill] sm:$0xff] }
 0x1aa   : > { %v6702_v58 = vrot.slane %v3229_v11, %v5186_v50  ;;  %v6708_v38 = vrot.slane %v3230_v63, %v5186_v50  ;;  %v3270_v36 = vcombine.high %v7668_v49, %v7667_v37  ;;  %v6747_v11 = vrot.slane %v3245_v52, %v5186_v50 }
 0x1ab   : > { %v6712_v25 = vpop.permute.xlu1 %3507  ;;  %v6714_v30 = vpop.permute.xlu0 %3487  ;;  %v669_v19 = vsel %vm668_vm8, %v7665_v17, %v4154_v3  ;;  %v7669_v39 = vcombine.high %v6498_v5, %v6276_v24  ;;  %v7670_v16 = vcombine.high %v7654_v41, %v7653_v18  ;;  %v7671_v51 = vunpack.i.l.bf16 %v7657_v22  ;;  %v7674_v17 = vld [vmem:[#allocation18_spill] sm:$0xff] }
 0x1ac   : > { %4367 = vrot.lane.b32.xlu1 %v4366_v28, %s4551_s26  ;;  %v3262_v12 = vcombine.high %v6699_v42, %v6702_v58  ;;  %v3264_v60 = vcombine.high %v3212_v46, %v6708_v38  ;;  %v7672_v52 = vunpack.i.h.bf16 %v7657_v22  ;;  %v3286_v37 = vcombine.high %v7674_v17, %v7673_v26  ;;  %v7675_v22 = vld [vmem:[#allocation20_spill] sm:$0xff] }
 0x1ad   : > { %v4376_v28 = vpack.i.bf16 %v3400_v15, %v7669_v39  ;;  %v671_v8 = vsel %vm670_vm9, %v669_v19, %v7671_v51  ;;  %v3316_v24 = vrot.slane %v3302_v59, %v4879_v31  ;;  %v4165_v5 = vunpack.i.h.bf16 %v7666_v10 }
 0x1ae   : > { %v4351_v45 = vpack.i.bf16 %v3262_v12, %v7670_v16  ;;  %v683_v0 = vsel %vm670_vm9, %v682_v29, %v7672_v52  ;;  %v3221_v15 = vrot.slane %v3213_v53, %v5186_v50  ;;  %v3709_v12 = vcombine.low %v6674_v54, %v6712_v25 }
 0x1af   : > { %v6749_v63 = vpop.permute.xlu1 %3481  ;;  %v6751_v3 = vpop.permute.xlu0 %3495  ;;  %v2082_v29 = vcombine.low %v6682_v43, %v7675_v22  ;;  %v673_v19 = vsel %vm672_vm10, %v671_v8, %v4164_v1  ;;  %v3332_v49 = vrot.slane %v3318_v35, %v4879_v31  ;;  %v3284_v59 = vrot.slane %v3270_v36, %v4879_v31 }
 0x1b0   : > { %4377 = vrot.lane.b32.xlu1 %v4376_v28, %s4549_s20  ;;  %4352 = vrot.lane.b32.xlu0 %v4351_v45, %s4547_s17  ;;  %v3661_v10 = vcombine.low %v6676_v6, %v6714_v30  ;;  %v3246_v53 = vcombine.high %v6672_v32, %v6688_v27  ;;  %v7676_v28 = vcombine.high %v6516_v4, %v6290_v61  ;;  %v7677_v32 = vld [vmem:[#allocation36_spill] sm:$0xff] }
 0x1b1   : > { %v4361_v45 = vpack.i.bf16 %v2474_v57, %v2082_v29  ;;  %v3265_v1 = vcombine.low %v3221_v15, %v6747_v11  ;;  %v3300_v35 = vrot.slane %v3286_v37, %v4879_v31  ;;  %v3381_v51 = vcombine.low %v3316_v24, %v3332_v49 }
 0x1b2   : > { %v4386_v16 = vpack.i.bf16 %v3264_v60, %v7676_v28  ;;  %v3677_v36 = vcombine.low %v6620_v23, %v6647_v47  ;;  %v3263_v52 = vcombine.low %v3212_v46, %v6708_v38  ;;  %v4170_v27 = vunpack.i.h.bf16 %v7677_v32 }
 0x1b3   : > { %v6784_v39 = vpop.permute.xlu1 %3489  ;;  %v6793_v8 = vpop.permute.xlu0 %3503  ;;  %v3214_v26 = vcombine.high %v6691_v55, %v6705_v13  ;;  %v6800_v60 = vrot.slane %v3709_v12, %v4879_v31  ;;  %v684_v17 = vsel %vm672_vm10, %v683_v0, %v4165_v5  ;;  %v3349_v37 = vcombine.low %v3284_v59, %v3300_v35 }
 0x1b4   : > { %v3693_v57 = vcombine.low %v6751_v3, %v6793_v8  ;;  %4387 = vrot.lane.b32.xlu1 %v4386_v16, %s4549_s20  ;;  %4362 = vrot.lane.b32.xlu0 %v4361_v45, %s4548_s19  ;;  %v6808_v38 = vrot.slane %v3661_v10, %v4879_v31  ;;  %v2475_v46 = vcombine.high %v6723_v7, %v6696_v20  ;;  %v7680_v45 = vld [vmem:[#allocation67_spill] sm:$0xff] }
 0x1b5   : > { %v6813_v55 = vrot.slane %v3246_v53, %v5186_v50  ;;  %v7678_v29 = vcombine.low %v6531_v56, %v6297_v9  ;;  %v3266_v5 = vcombine.high %v3221_v15, %v6747_v11  ;;  %v3382_v10 = vcombine.high %v3316_v24, %v3332_v49 }
 0x1b6   : > { %v6816_v13 = vrot.slane %v3693_v57, %v4879_v31  ;;  %v3389_v28 = vrot.slane %v3381_v51, %v5186_v50  ;;  %v6826_v20 = vrot.slane %v3677_v36, %v4879_v31  ;;  %v7679_v53 = vcombine.low %v6516_v4, %v6290_v61 }
 0x1b7   : > { %v6818_v12 = vpop.permute.xlu1 %3497  ;;  %v4396_v0 = vpack.i.bf16 %v3265_v1, %v7678_v29  ;;  %v6828_v7 = vpop.permute.xlu0 %3477  ;;  %v4175_v57 = vunpack.i.h.bf16 %v7680_v45  ;;  %v6835_v34 = vrot.slane %v3214_v26, %v5186_v50  ;;  %v2083_v24 = vcombine.high %v6682_v43, %v7675_v22  ;;  %v7682_v29 = vld [vmem:[#allocation63_spill] sm:$0xff] }
 0x1b8   : > { %v4371_v16 = vpack.i.bf16 %v3263_v52, %v7679_v53  ;;  %v3757_v11 = vcombine.low %v6816_v13, %v6800_v60  ;;  %v4174_v15 = vunpack.i.l.bf16 %v7680_v45  ;;  %v3350_v49 = vcombine.high %v3284_v59, %v3300_v35 }
 0x1b9   : > { %4397 = vrot.lane.b32.xlu1 %v4396_v0, %s4546_s8  ;;  %v3357_v1 = vrot.slane %v3349_v37, %v5186_v50  ;;  %v3725_v61 = vcombine.low %v6808_v38, %v6826_v20  ;;  %v4169_v4 = vunpack.i.l.bf16 %v7677_v32  ;;  %v7681_v36 = vcombine.high %v6531_v56, %v6297_v9 }
 0x1ba   : > { %4372 = vrot.lane.b32.xlu0 %v4371_v16, %s4545_s7  ;;  %v3267_v43 = vcombine.low %v6835_v34, %v6813_v55  ;;  %v685_v22 = vsel %vm674_vm11, %v684_v17, %v4170_v27  ;;  %v3396_v59 = vrot.slane %v3382_v10, %v5186_v50  ;;  %v6858_v35 = vrot.slane %v3757_v11, %v5186_v50  ;;  %v7683_v27 = vld [vmem:[#allocation19_spill] sm:$0xff] }
 0x1bb   : > { %v6848_v51 = vpop.permute.xlu1 %3505  ;;  %v4406_v52 = vpack.i.bf16 %v3266_v5, %v7681_v36  ;;  %v6860_v26 = vpop.permute.xlu0 %3485  ;;  %v4381_v37 = vpack.i.bf16 %v2475_v46, %v2083_v24  ;;  %v3401_v32 = vcombine.low %v3357_v1, %v3389_v28  ;;  %v4180_v0 = vunpack.i.h.bf16 %v7682_v29 }
 0x1bc   : > { %v4179_v53 = vunpack.i.l.bf16 %v7682_v29  ;;  %v686_v9 = vsel %vm676_vm12, %v685_v22, %v4175_v57  ;;  %v675_v56 = vsel %vm674_vm11, %v673_v19, %v4169_v4  ;;  %v4185_v17 = vunpack.i.h.bf16 %v7683_v27 }
 0x1bd   : > { %4407 = vrot.lane.b32.xlu1 %v4406_v52, %s4550_s22  ;;  %v3364_v5 = vrot.slane %v3350_v49, %v5186_v50  ;;  %v6870_v10 = vrot.slane %v3725_v61, %v5186_v50  ;;  %v677_v46 = vsel %vm676_vm12, %v675_v56, %v4174_v15  ;;  %v4184_v16 = vunpack.i.l.bf16 %v7683_v27 }
 0x1be   : > { %4382 = vrot.lane.b32.xlu0 %v4381_v37, %s4551_s26  ;;  %v3525_v45 = vcombine.low %v6828_v7, %v6860_v26  ;;  %v7684_v19 = vcombine.low %v6534_v21, %v6305_v2  ;;  %v3402_v24 = vcombine.high %v3357_v1, %v3389_v28  ;;  %v7685_v49 = vcombine.low %v6544_v33, %v6312_v62 }
 0x1bf   : > { %v4188_v11 = vpop.permute.xlu1 %4187  ;;  %v3494_v4 = vpop.permute.xlu0 %3493  ;;  %v3403_v36 = vcombine.low %v3364_v5, %v3396_v59  ;;  %v3404_v52 = vcombine.high %v3364_v5, %v3396_v59  ;;  %v3789_v15 = vcombine.low %v6870_v10, %v6858_v35  ;;  %v3541_v22 = vcombine.low %v6749_v63, %v6784_v39 }
 0x1c0   : > { %v4416_v57 = vpack.i.bf16 %v3267_v43, %v7684_v19  ;;  %v4391_v61 = vpack.i.bf16 %v3401_v32, %v7685_v49  ;;  %v3573_v37 = vcombine.low %v6818_v12, %v6848_v51  ;;  %v687_v28 = vsel %vm678_vm13, %v686_v9, %v4180_v0 }
 0x1c1   : > { %v679_v1 = vsel %vm678_vm13, %v677_v46, %v4179_v53  ;;  %v3710_v43 = vcombine.high %v6674_v54, %v6712_v25  ;;  %v3662_v59 = vcombine.high %v6676_v6, %v6714_v30  ;;  %v3726_v32 = vcombine.high %v6808_v38, %v6826_v20 }
 0x1c2   : > { %4417 = vrot.lane.b32.xlu1 %v4416_v57, %s4548_s19  ;;  %4392 = vrot.lane.b32.xlu0 %v4391_v61, %s4546_s8  ;;  %v6900_v29 = vsel %vm680_vm14, %v687_v28, %v4185_v17  ;;  %v6903_v56 = vrot.slane %v3525_v45, %v4879_v31  ;;  %v7686_v53 = vcombine.high %v6544_v33, %v6312_v62  ;;  %v7690_v28 = vld [vmem:[#allocation32_spill] sm:$0xff] }
 0x1c3   : > { %v4198_v0 = vpop.permute.xlu1 %4197  ;;  %v3790_v54 = vcombine.high %v6870_v10, %v6858_v35  ;;  %v6911_v6 = vsel %vm680_vm14, %v679_v1, %v4184_v16  ;;  %v3678_v25 = vcombine.high %v6620_v23, %v6647_v47  ;;  %v3502_v30 = vpop.permute.xlu0 %3501  ;;  %v7687_v38 = vcombine.low %v6599_v48, %v6315_v14 }
 0x1c4   : > { %v4401_v9 = vpack.i.bf16 %v3402_v24, %v7686_v53  ;;  %v7688_v27 = vcombine.high %v6599_v48, %v6315_v14  ;;  %v3268_v62 = vcombine.high %v6835_v34, %v6813_v55  ;;  %v3549_v33 = vrot.slane %v3541_v22, %v4879_v31 }
 0x1c5   : > { %v4411_v20 = vpack.i.bf16 %v3403_v36, %v7687_v38  ;;  %v3574_v5 = vcombine.high %v6818_v12, %v6848_v51  ;;  %v3581_v46 = vrot.slane %v3573_v37, %v4879_v31  ;;  %v3557_v16 = vcombine.low %v3494_v4, %v3502_v30 }
 0x1c6   : > { %v4421_v17 = vpack.i.bf16 %v3404_v52, %v7688_v27  ;;  %3826 = vrot.lane.b32.xlu1 %v3790_v54, %s4547_s17  ;;  %v6929_v45 = vrot.slane %v3710_v43, %v4879_v31  ;;  %v6932_v19 = vrot.slane %v3662_v59, %v4879_v31  ;;  %v6935_v14 = vrot.slane %v3726_v32, %v5186_v50  ;;  %v7694_v43 = vld [vmem:[#allocation35_spill] sm:$0xff] }
 0x1c7   : > { %v4190_v48 = vunpack.i.h.bf16 %v4188_v11  ;;  %4402 = vrot.lane.b32.xlu0 %v4401_v9, %s4550_s22  ;;  %v3542_v34 = vcombine.high %v6749_v63, %v6784_v39  ;;  %v3589_v55 = vcombine.low %v6903_v56, %v3549_v33  ;;  %v4189_v12 = vunpack.i.l.bf16 %v4188_v11  ;;  %v4208_v57 = vpop.permute.xlu1 %4207  ;;  %v4193_v36 = vpop.permute.xlu0 %4192 }
 0x1c8   : > { %v3565_v51 = vrot.slane %v3557_v16, %v4879_v31  ;;  %v3694_v24 = vcombine.high %v6751_v3, %v6793_v8  ;;  %v3758_v49 = vcombine.high %v6816_v13, %v6800_v60  ;;  %v3558_v61 = vcombine.high %v3494_v4, %v3502_v30  ;;  %v7691_v3 = vld [vmem:[#allocation68_spill] sm:$0xff] }
 0x1c9   : > { %v7689_v52 = vcombine.high %v6534_v21, %v6305_v2  ;;  %v6950_v63 = vrot.slane %v3574_v5, %v4879_v31  ;;  %v3526_v39 = vcombine.high %v6828_v7, %v6860_v26  ;;  %v3590_v11 = vcombine.high %v6903_v56, %v3549_v33  ;;  %v7693_v21 = vld [vmem:[#allocation43_spill] sm:$0xff] }
 0x1ca   : > { %v3621_v37 = vcombine.low %v3565_v51, %v3581_v46  ;;  %v7692_v8 = vcombine.low %v7690_v28, %v7691_v3  ;;  %v3622_v13 = vcombine.high %v3565_v51, %v3581_v46  ;;  %v4195_v4 = vunpack.i.h.bf16 %v4193_v36 }
 0x1cb   : > { %v4426_v22 = vpack.i.bf16 %v3268_v62, %v7689_v52  ;;  %v4194_v1 = vunpack.i.l.bf16 %v4193_v36  ;;  %4412 = vrot.lane.b32.xlu0 %v4411_v20, %s4548_s19  ;;  %v6961_v2 = vrot.slane %v3589_v55, %v5186_v50  ;;  %v7695_v59 = vcombine.low %v7693_v21, %v7694_v43  ;;  %v4218_v56 = vpop.permute.xlu1 %4217  ;;  %v4203_v38 = vpop.permute.xlu0 %4202 }
 0x1cc   : > { %v1090_v60 = vsel %vm668_vm8, %v7692_v8, %v4190_v48  ;;  %v4200_v26 = vunpack.i.h.bf16 %v4198_v0  ;;  %v6968_v32 = vrot.slane %v3621_v37, %v5186_v50  ;;  %v4199_v53 = vunpack.i.l.bf16 %v4198_v0 }
 0x1cd   : > { %v1083_v7 = vsel %vm668_vm8, %v7695_v59, %v4189_v12  ;;  %v6971_v9 = vrot.slane %v3558_v61, %v4879_v31  ;;  %v1091_v54 = vsel %vm670_vm9, %v1090_v60, %v4195_v4  ;;  %v6976_v20 = vrot.slane %v3542_v34, %v4879_v31 }
 0x1ce   : > { %v1084_v30 = vsel %vm670_vm9, %v1083_v7, %v4194_v1  ;;  %v6979_v27 = vrot.slane %v3694_v24, %v4879_v31  ;;  %v4205_v62 = vunpack.i.h.bf16 %v4203_v38  ;;  %v4204_v33 = vunpack.i.l.bf16 %v4203_v38 }
 0x1cf   : > { %v3636_v5 = vrot.slane %v3622_v13, %v5186_v50  ;;  %v1085_v0 = vsel %vm672_vm10, %v1084_v30, %v4199_v53  ;;  %v1092_v46 = vsel %vm672_vm10, %v1091_v54, %v4200_v26  ;;  %4422 = vrot.lane.b32.xlu0 %v4421_v17, %s4551_s26  ;;  %v3654_v16 = vcombine.high %v6961_v2, %v6968_v32  ;;  %v6991_v51 = vpop.permute.xlu1 %4227  ;;  %v4213_v52 = vpop.permute.xlu0 %4212 }
 0x1d0   : > { %v3772_v48 = vrot.slane %v3758_v49, %v5186_v50  ;;  %v3540_v34 = vrot.slane %v3526_v39, %v4879_v31  ;;  %v1086_v55 = vsel %vm674_vm11, %v1085_v0, %v4204_v33  ;;  %v1093_v12 = vsel %vm674_vm11, %v1092_v46, %v4205_v62 }
 0x1d1   : > { %v3604_v24 = vrot.slane %v3590_v11, %v5186_v50  ;;  %v3637_v61 = vcombine.low %v6971_v9, %v6950_v63  ;;  %v4210_v36 = vunpack.i.h.bf16 %v4208_v57  ;;  %v4209_v17 = vunpack.i.l.bf16 %v4208_v57  ;;  %3798 = vrot.lane.b32.xlu1 %v3654_v16, %s4547_s17  ;;  %s4553_s17 = smov [#allocation7]  }
 0x1d2   : > { %v4220_v37 = vunpack.i.h.bf16 %v4218_v56  ;;  %v4215_v49 = vunpack.i.h.bf16 %v4213_v52  ;;  %v4214_v28 = vunpack.i.l.bf16 %v4213_v52  ;;  %v3653_v39 = vcombine.low %v6961_v2, %v6968_v32 }
 0x1d3   : > { %v4219_v3 = vunpack.i.l.bf16 %v4218_v56  ;;  %4427 = vrot.lane.b32.xlu0 %v4426_v22, %s4551_s26  ;;  %v3655_v8 = vcombine.low %v3604_v24, %v3636_v5  ;;  %v1094_v11 = vsel %vm676_vm12, %v1093_v12, %v4210_v36  ;;  %v1087_v60 = vsel %vm676_vm12, %v1086_v55, %v4209_v17  ;;  %v7008_v4 = vpop.permute.xlu1 %4237 }
 0x1d4   : > { %v3692_v57 = vrot.slane %v3678_v25, %v4879_v31  ;;  %v3773_v13 = vcombine.low %v6979_v27, %v6929_v45  ;;  %v1095_v1 = vsel %vm678_vm13, %v1094_v11, %v4215_v49  ;;  %v1088_v21 = vsel %vm678_vm13, %v1087_v60, %v4214_v28  ;;  %v4223_v43 = vpop.permute.xlu0 %4222 }
 0x1d5   : > { %v3605_v22 = vcombine.low %v3540_v34, %v6976_v20  ;;  %3802 = vrot.lane.b32.xlu1 %v3655_v8, %s4545_s7  ;;  %v3791_v59 = vcombine.low %v6935_v14, %v3772_v48  ;;  %v1096_v7 = vsel %vm680_vm14, %v1095_v1, %v4220_v37  ;;  %v1089_v31 = vsel %vm680_vm14, %v1088_v21, %v4219_v3 }
 0x1d6   : > { %v4073_v23 = vpack.c.bf16 %v1096_v7, %v6900_v29  ;;  %v4075_v47 = vpack.c.bf16 %v1089_v31, %v6911_v6  ;;  %v3741_v25 = vcombine.low %v6932_v19, %v3692_v57  ;;  %v3645_v26 = vrot.slane %v3637_v61, %v5186_v50 }
 0x1d7   : > { %3830 = vrot.lane.b32.xlu0 %v3791_v59, %s4545_s7  ;;  %v3656_v56 = vcombine.high %v3604_v24, %v3636_v5  ;;  %v7022_v53 = vpop.permute.xlu1 %4247  ;;  %v3781_v54 = vrot.slane %v3773_v13, %v5186_v50  ;;  %v3613_v30 = vrot.slane %v3605_v22, %v5186_v50  ;;  %v3792_v29 = vcombine.high %v6935_v14, %v3772_v48  ;;  %v7696_v13 = vld [vmem:[#allocation25_spill] sm:$0xff]  ;;  %v7699_v22 = vld [vmem:[#allocation79_spill] sm:$0xff]  ;;  %s7253_s7 = scalar_lea.hbm %s7300_s3, %s4072_s10 }
 0x1d8   : > { %4074 = vmatprep.subr.bf16.mxu0 %v4073_v23  ;;  %v4233_v38 = vpop.permute.xlu0 %4232  ;;  %v3749_v6 = vrot.slane %v3741_v25, %v5186_v50  ;;  %v3638_v62 = vcombine.high %v6971_v9, %v6950_v63  ;;  %v3774_v0 = vcombine.high %v6979_v27, %v6929_v45  ;;  %v3606_v46 = vcombine.high %v3540_v34, %v6976_v20 }
 0x1d9   : > { %3806 = vrot.lane.b32.xlu1 %v3656_v56, %s4549_s20  ;;  %4076 = vmatpush1.bf16.msra.mxu0 %v4075_v47  ;;  %v3657_v33 = vcombine.low %v3613_v30, %v3645_v26  ;;  %v3742_v14 = vcombine.high %v6932_v19, %v3692_v57  ;;  %v3658_v63 = vcombine.high %v3613_v30, %v3645_v26  ;;  %v4552_v27 = vmov 0  }
 0x1da   : > { %v3793_v55 = vcombine.low %v3749_v6, %v3781_v54  ;;  %v3652_v48 = vrot.slane %v3638_v62, %v5186_v50  ;;  %v3788_v12 = vrot.slane %v3774_v0, %v5186_v50  ;;  %v3620_v24 = vrot.slane %v3606_v46, %v5186_v50  ;;  %4431 = vset.pattern.permute.xlu0 %v4552_v27 }
 0x1db   : > { %3834 = vrot.lane.b32.xlu0 %v3792_v29, %s4549_s20  ;;  %v7032_v5 = vpop.permute.xlu1 %4257  ;;  %v3794_v20 = vcombine.high %v3749_v6, %v3781_v54  ;;  %v3756_v34 = vrot.slane %v3742_v14, %v5186_v50  ;;  %v4225_v61 = vunpack.i.h.bf16 %v4223_v43  ;;  %v4224_v19 = vunpack.i.l.bf16 %v4223_v43  ;;  %v7697_v50 = vld [vmem:[#allocation10_spill] sm:$0xff]  ;;  %v7700_v43 = vld [vmem:[#allocation69_spill] sm:$0xff] }
 0x1dc   : > { %v4243_v16 = vpop.permute.xlu0 %4242  ;;  %v3659_v36 = vcombine.low %v3620_v24, %v3652_v48  ;;  %v4235_v17 = vunpack.i.h.bf16 %v4233_v38  ;;  %v4234_v52 = vunpack.i.l.bf16 %v4233_v38  ;;  %v3660_v57 = vcombine.high %v3620_v24, %v3652_v48 }
 0x1dd   : > { %3810 = vrot.lane.b32.xlu1 %v3657_v33, %s4546_s8  ;;  %v4245_v49 = vunpack.i.h.bf16 %v4243_v16  ;;  %v4244_v28 = vunpack.i.l.bf16 %v4243_v16  ;;  %v3795_v8 = vcombine.low %v3756_v34, %v3788_v12  ;;  %v7698_v1 = vcombine.low %v7696_v13, %v7697_v50  ;;  %v3888_v16 = vld [vmem:[%s7299_s2] sm:$0xff] }
 0x1de   : > { %v7701_v59 = vcombine.low %v7699_v22, %v7700_v43  ;;  %v3796_v30 = vcombine.high %v3756_v34, %v3788_v12  ;;  %v7705_v50 = vld [vmem:[#allocation74_spill] sm:$0xff] }
 0x1df   : > { %3838 = vrot.lane.b32.xlu0 %v3793_v55, %s4546_s8  ;;  %v1891_v21 = vsel %vm668_vm8, %v7698_v1, %v4225_v61  ;;  %v4230_v61 = vunpack.i.h.bf16 %v6991_v51  ;;  %v7706_v1 = vld [vmem:[#allocation71_spill] sm:$0xff]  ;;  %s3972_s8 = scalar_lea.sflag [#allocation6], %s4678_s5 }
 0x1e0   : > { %v4273_v9 = vpop.permute.xlu1 %4272  ;;  %v1482_v7 = vsel %vm668_vm8, %v7701_v59, %v4224_v19  ;;  %v1892_v25 = vsel %vm670_vm9, %v1891_v21, %v4235_v17  ;;  %v4229_v19 = vunpack.i.l.bf16 %v6991_v51  ;;  %v4239_v17 = vunpack.i.l.bf16 %v7008_v4 }
 0x1e1   : > { %3814 = vrot.lane.b32.xlu1 %v3658_v63, %s4550_s22  ;;  %v4253_v45 = vpop.permute.xlu0 %4252  ;;  %v1483_v47 = vsel %vm670_vm9, %v1482_v7, %v4234_v52  ;;  %v1893_v54 = vsel %vm672_vm10, %v1892_v25, %v4245_v49  ;;  %v4275_v33 = vunpack.i.h.bf16 %v4273_v9  ;;  %v4274_v0 = vunpack.i.l.bf16 %v4273_v9 }
 0x1e2   : > { %v4255_v11 = vunpack.i.h.bf16 %v4253_v45  ;;  %v4254_v60 = vunpack.i.l.bf16 %v4253_v45  ;;  %v1484_v56 = vsel %vm672_vm10, %v1483_v47, %v4244_v28  ;;  %v4250_v49 = vunpack.i.h.bf16 %v7022_v53 }
 0x1e3   : > { %3842 = vrot.lane.b32.xlu0 %v3794_v20, %s4550_s22  ;;  %v4249_v28 = vunpack.i.l.bf16 %v7022_v53 }
 0x1e4   : > { %v7046_v37 = vpop.permute.xlu1 %4277  ;;  %v1485_v38 = vsel %vm674_vm11, %v1484_v56, %v4254_v60  ;;  %v1894_v29 = vsel %vm674_vm11, %v1893_v54, %v4255_v11  ;;  %v7702_v60 = vld [vmem:[#allocation50_spill] sm:$0xff] }
 0x1e5   : > { %3818 = vrot.lane.b32.xlu1 %v3659_v36, %s4548_s19  ;;  %v4240_v36 = vunpack.i.h.bf16 %v7008_v4  ;;  %v7707_v4 = vcombine.low %v7705_v50, %v7706_v1 }
 0x1e6   : > { %v4263_v3 = vpop.permute.xlu0 %4262 }
 0x1e7   : > { %v4265_v31 = vunpack.i.h.bf16 %v4263_v3  ;;  %v4264_v23 = vunpack.i.l.bf16 %v4263_v3  ;;  %3846 = vrot.lane.b32.xlu0 %v3795_v8, %s4548_s19  ;;  %v4260_v3 = vunpack.i.h.bf16 %v7032_v5  ;;  %v4259_v8 = vunpack.i.l.bf16 %v7032_v5  ;;  %s4472_s19 = sshll.u32 %s4553_s17, 4  ;;  %s4473_s19 = int_to_ptr.vmem [resolvable:$false] %s4472_s19 }
 0x1e8   : > { %v7060_v26 = vpop.permute.xlu1 %4287  ;;  %v1475_v21 = vsel %vm668_vm8, %v7707_v4, %v4229_v19  ;;  %s4474_s20 = scalar_lea.vmem %s4473_s19, 512  ;;  %p4475_p8 = scmp.lt.s32.totalorder %s7255_s23, %s4473_s19 }
 0x1e9   : > { %3822 = vrot.lane.b32.xlu1 %v3660_v57, %s4551_s26  ;;  %v1486_v6 = vsel %vm676_vm12, %v1485_v38, %v4264_v23  ;;  %v1895_v62 = vsel %vm676_vm12, %v1894_v29, %v4265_v31  ;;  %v7703_v57 = vld [vmem:[#allocation51_spill] sm:$0xff]  ;;  %v1476_v53 = vsel %vm670_vm9, %v1475_v21, %v4239_v17  ;;  %p4476_p10 = scmp.lt.s32.totalorder %s4474_s20, %s4468_s16 }
 0x1ea   : > { %v1487_v48 = vsel %vm678_vm13, %v1486_v6, %v4274_v0  ;;  %v1896_v63 = vsel %vm678_vm13, %v1895_v62, %v4275_v33  ;;  %v4268_v20 = vpop.permute.xlu0 %4267  ;;  %v7704_v13 = vcombine.low %v7702_v60, %v7703_v57  ;;  %v1477_v31 = vsel %vm672_vm10, %v1476_v53, %v4249_v28  ;;  %v7708_v17 = vld [vmem:[#allocation31_spill] sm:$0xff]  ;;  %v7712_v60 = vld [vmem:[#allocation82_spill] sm:$0xff] }
 0x1eb   : > { %3850 = vrot.lane.b32.xlu0 %v3796_v30, %s4551_s26  ;;  %v4270_v22 = vunpack.i.h.bf16 %v4268_v20  ;;  %v4269_v43 = vunpack.i.l.bf16 %v4268_v20  ;;  %v1478_v47 = vsel %vm674_vm11, %v1477_v31, %v4259_v8  ;;  %v7711_v8 = vld [vmem:[#allocation80_spill] sm:$0xff]  ;;  %p4477_p0 = por %p4476_p10, %p4475_p8 }
 0x1ec   : > { %v4298_v46 = vpop.permute.xlu1 %4297  ;;  %v1884_v51 = vsel %vm668_vm8, %v7704_v13, %v4230_v61  ;;  %v7713_v57 = vcombine.low %v7711_v8, %v7712_v60 }
 0x1ed   : > { %v4300_v55 = vunpack.i.h.bf16 %v4298_v46  ;;  %v4299_v14 = vunpack.i.l.bf16 %v4298_v46  ;;  %v1885_v59 = vsel %vm670_vm9, %v1884_v51, %v4240_v36  ;;  %v1479_v38 = vsel %vm676_vm12, %v1478_v47, %v4269_v43  ;;  %p4478_p2 = pnand %p4477_p0, %p4471_p13 }
 0x1ee   : > { %v1886_v23 = vsel %vm672_vm10, %v1885_v59, %v4250_v49  ;;  %v7709_v49 = vld [vmem:[#allocation60_spill] sm:$0xff] }
 0x1ef   : > { %v1488_v12 = vsel %vm680_vm14, %v1487_v48, %v4299_v14  ;;  %v1897_v24 = vsel %vm680_vm14, %v1896_v63, %v4300_v55  ;;  %3891 = vperm.xlu0 %4431, %v3888_v16   ;;  %v1887_v25 = vsel %vm674_vm11, %v1886_v23, %v4260_v3  ;;  %v4280_v48 = vunpack.i.h.bf16 %v7046_v37 }
 0x1f0   : > { %v4077_v45 = vpack.c.bf16 %v1897_v24, %v1488_v12  ;;  %v4308_v27 = vpop.permute.xlu1 %4307  ;;  %v1888_v30 = vsel %vm676_vm12, %v1887_v25, %v4270_v22  ;;  %v4279_v63 = vunpack.i.l.bf16 %v7046_v37  ;;  %v4290_v12 = vunpack.i.h.bf16 %v7060_v26 }
 0x1f1   : > { %v4289_v24 = vunpack.i.l.bf16 %v7060_v26  ;;  %v4309_v61 = vunpack.i.l.bf16 %v4308_v27  ;;  %v7710_v28 = vcombine.low %v7708_v17, %v7709_v49 }
 0x1f2   : > { %4078 = vmatprep.subr.bf16.mxu0 %v4077_v45  ;;  %v2283_v37 = vsel %vm668_vm8, %v7713_v57, %v4279_v63  ;;  %v7714_v63 = vld [vmem:[#allocation24_spill] sm:$0xff] }
 0x1f3   : > { %v2675_v3 = vsel %vm668_vm8, %v7710_v28, %v4280_v48  ;;  %v2284_v26 = vsel %vm670_vm9, %v2283_v37, %v4289_v24 }
 0x1f4   : > { %v2676_v50 = vsel %vm670_vm9, %v2675_v3, %v4290_v12  ;;  %v7715_v12 = vld [vmem:[#allocation13_spill] sm:$0xff] }
 0x1f5   : > { %v7716_v24 = vcombine.low %v7714_v63, %v7715_v12 }
 0x202   : > { %v7077_v9 = vpop.permute.xlu0 %4282  ;;  %v7083_v52 = vpop.permute.xlu1 %4317 }
 0x203   : > { %v4320_v17 = vunpack.i.h.bf16 %v7083_v52 }
 0x206   : > { %v4293_v34 = vpop.permute.xlu0 %4292  ;;  %v7105_v56 = vpop.permute.xlu1 %4327 }
 0x207   : > { %v4295_v7 = vunpack.i.h.bf16 %v4293_v34  ;;  %v4294_v5 = vunpack.i.l.bf16 %v4293_v34  ;;  %v4310_v34 = vunpack.i.h.bf16 %v4308_v27  ;;  %v2285_v27 = vsel %vm672_vm10, %v2284_v26, %v4309_v61 }
 0x208   : > { %v4330_v37 = vunpack.i.h.bf16 %v7105_v56 }
 0x209   : > { %v1480_v62 = vsel %vm678_vm13, %v1479_v38, %v4294_v5  ;;  %v1889_v33 = vsel %vm678_vm13, %v1888_v30, %v4295_v7  ;;  %v2677_v4 = vsel %vm672_vm10, %v2676_v50, %v4310_v34  ;;  %v7718_v34 = vld [vmem:[#allocation12_spill] sm:$0xff] }
 0x20b   : > { %v7089_v11 = vpop.permute.xlu0 %4302 }
 0x20f   : > { %v4313_v54 = vpop.permute.xlu0 %4312 }
 0x210   : > { %v4315_v29 = vunpack.i.h.bf16 %v4313_v54  ;;  %v4314_v6 = vunpack.i.l.bf16 %v4313_v54 }
 0x212   : > { %v1481_v0 = vsel %vm680_vm14, %v1480_v62, %v4314_v6  ;;  %v1890_v46 = vsel %vm680_vm14, %v1889_v33, %v4315_v29  ;;  %v7113_v16 = vpop.permute.xlu1 %4337  ;;  %v4285_v33 = vunpack.i.h.bf16 %v7077_v9 }
 0x213   : > { %v4323_v55 = vpop.permute.xlu0 %4322  ;;  %v4079_v14 = vpack.c.bf16 %v1890_v46, %v1481_v0  ;;  %v4284_v0 = vunpack.i.l.bf16 %v7077_v9  ;;  %v4305_v46 = vunpack.i.h.bf16 %v7089_v11 }
 0x214   : > { %v4325_v19 = vunpack.i.h.bf16 %v4323_v55  ;;  %v4324_v36 = vunpack.i.l.bf16 %v4323_v55  ;;  %v4304_v55 = vunpack.i.l.bf16 %v7089_v11  ;;  %v4319_v11 = vunpack.i.l.bf16 %v7083_v52 }
 0x215   : > { %4080 = vmatpush1.bf16.msra.mxu0 %v4079_v14 }
 0x216   : > { %v4348_v45 = vpop.permute.xlu1 %4347  ;;  %v2678_v21 = vsel %vm674_vm11, %v2677_v4, %v4325_v19  ;;  %v2286_v22 = vsel %vm674_vm11, %v2285_v27, %v4324_v36 }
 0x217   : > { %v4333_v20 = vpop.permute.xlu0 %4332  ;;  %v4350_v43 = vunpack.i.h.bf16 %v4348_v45  ;;  %v4349_v53 = vunpack.i.l.bf16 %v4348_v45  ;;  %v2668_v45 = vsel %vm668_vm8, %v7716_v24, %v4285_v33 }
 0x218   : > { %v4335_v13 = vunpack.i.h.bf16 %v4333_v20  ;;  %v4334_v51 = vunpack.i.l.bf16 %v4333_v20  ;;  %v7717_v20 = vld [vmem:[#allocation23_spill] sm:$0xff]  ;;  %v2669_v9 = vsel %vm670_vm9, %v2668_v45, %v4305_v46 }
 0x219   : > { %v7719_v61 = vcombine.low %v7717_v20, %v7718_v34  ;;  %v2670_v8 = vsel %vm672_vm10, %v2669_v9, %v4320_v17  ;;  %v7724_v20 = vld [vmem:[#allocation65_spill] sm:$0xff] }
 0x21a   : > { %v7129_v1 = vpop.permute.xlu1 %4357  ;;  %v2287_v59 = vsel %vm676_vm12, %v2286_v22, %v4334_v51  ;;  %v2679_v7 = vsel %vm676_vm12, %v2678_v21, %v4335_v13  ;;  %v4329_v13 = vunpack.i.l.bf16 %v7105_v56  ;;  %v2671_v27 = vsel %vm674_vm11, %v2670_v8, %v4330_v37 }
 0x21b   : > { %v4343_v5 = vpop.permute.xlu0 %4342  ;;  %v2288_v25 = vsel %vm678_vm13, %v2287_v59, %v4349_v53  ;;  %v2680_v54 = vsel %vm678_vm13, %v2679_v7, %v4350_v43  ;;  %v2276_v19 = vsel %vm668_vm8, %v7719_v61, %v4284_v0  ;;  %v4360_v33 = vunpack.i.h.bf16 %v7129_v1 }
 0x21c   : > { %v2277_v36 = vsel %vm670_vm9, %v2276_v19, %v4304_v55  ;;  %v4345_v60 = vunpack.i.h.bf16 %v4343_v5  ;;  %v4344_v57 = vunpack.i.l.bf16 %v4343_v5  ;;  %v4359_v0 = vunpack.i.l.bf16 %v7129_v1 }
 0x21d   : > { %v2278_v3 = vsel %vm672_vm10, %v2277_v36, %v4319_v11  ;;  %v7725_v1 = vcombine.low %v6572_v44, %v7724_v20 }
 0x21e   : > { %v4368_v31 = vpop.permute.xlu1 %4367  ;;  %v2279_v50 = vsel %vm674_vm11, %v2278_v3, %v4329_v13  ;;  %v2672_v21 = vsel %vm676_vm12, %v2671_v27, %v4345_v60 }
 0x21f   : > { %v4370_v23 = vunpack.i.h.bf16 %v4368_v31  ;;  %v4369_v47 = vunpack.i.l.bf16 %v4368_v31  ;;  %v2280_v4 = vsel %vm676_vm12, %v2279_v50, %v4344_v57 }
 0x221   : > { %v2289_v30 = vsel %vm680_vm14, %v2288_v25, %v4369_v47  ;;  %v2681_v38 = vsel %vm680_vm14, %v2680_v54, %v4370_v23  ;;  %v4340_v54 = vunpack.i.h.bf16 %v7113_v16 }
 0x222   : > { %v7141_v29 = vpop.permute.xlu1 %4377  ;;  %v4353_v6 = vpop.permute.xlu0 %4352  ;;  %v4081_v62 = vpack.c.bf16 %v2681_v38, %v2289_v30  ;;  %v4339_v30 = vunpack.i.l.bf16 %v7113_v16  ;;  %v7722_v16 = vld [vmem:[#allocation53_spill] sm:$0xff] }
 0x223   : > { %v4355_v47 = vunpack.i.h.bf16 %v4353_v6  ;;  %v4354_v25 = vunpack.i.l.bf16 %v4353_v6  ;;  %v7721_v6 = vcombine.low %v7654_v41, %v7653_v18  ;;  %v7723_v24 = vcombine.low %v7652_v40, %v7722_v16 }
 0x224   : > { %4082 = vmatprep.subr.bf16.mxu0 %v4081_v62  ;;  %v3468_v34 = vsel %vm668_vm8, %v7725_v1, %v4340_v54  ;;  %v4379_v18 = vunpack.i.l.bf16 %v7141_v29 }
 0x225   : > { %v3069_v12 = vsel %vm668_vm8, %v7721_v6, %v4354_v25  ;;  %v3076_v45 = vsel %vm668_vm8, %v7723_v24, %v4339_v30  ;;  %v3469_v40 = vsel %vm670_vm9, %v3468_v34, %v4360_v33 }
 0x226   : > { %v4388_v14 = vpop.permute.xlu1 %4387  ;;  %v4363_v48 = vpop.permute.xlu0 %4362  ;;  %v3077_v36 = vsel %vm670_vm9, %v3076_v45, %v4359_v0 }
 0x227   : > { %v4365_v51 = vunpack.i.h.bf16 %v4363_v48  ;;  %v4364_v26 = vunpack.i.l.bf16 %v4363_v48  ;;  %v7720_v48 = vcombine.low %v6699_v42, %v6702_v58  ;;  %v4380_v58 = vunpack.i.h.bf16 %v7141_v29 }
 0x228   : > { %v4390_v41 = vunpack.i.h.bf16 %v4388_v14  ;;  %v4389_v19 = vunpack.i.l.bf16 %v4388_v14  ;;  %v3078_v13 = vsel %vm672_vm10, %v3077_v36, %v4379_v18 }
 0x229   : > { %v2281_v53 = vsel %vm678_vm13, %v2280_v4, %v4364_v26  ;;  %v2673_v59 = vsel %vm678_vm13, %v2672_v21, %v4365_v51  ;;  %v3461_v63 = vsel %vm668_vm8, %v7720_v48, %v4355_v47  ;;  %v3470_v51 = vsel %vm672_vm10, %v3469_v40, %v4380_v58 }
 0x22b   : > { %v7159_v49 = vpop.permute.xlu1 %4397 }
 0x22c   : > { %v4373_v28 = vpop.permute.xlu0 %4372  ;;  %v4400_v60 = vunpack.i.h.bf16 %v7159_v49  ;;  %v4399_v57 = vunpack.i.l.bf16 %v7159_v49 }
 0x22d   : > { %v4375_v38 = vunpack.i.h.bf16 %v4373_v28  ;;  %v4374_v62 = vunpack.i.l.bf16 %v4373_v28 }
 0x22f   : > { %v7171_v7 = vpop.permute.xlu1 %4407  ;;  %v3070_v61 = vsel %vm670_vm9, %v3069_v12, %v4374_v62  ;;  %v3462_v42 = vsel %vm670_vm9, %v3461_v63, %v4375_v38 }
 0x230   : > { %v4383_v52 = vpop.permute.xlu0 %4382  ;;  %v3071_v44 = vsel %vm672_vm10, %v3070_v61, %v4389_v19  ;;  %v3463_v28 = vsel %vm672_vm10, %v3462_v42, %v4390_v41  ;;  %v4410_v26 = vunpack.i.h.bf16 %v7171_v7  ;;  %v4409_v50 = vunpack.i.l.bf16 %v7171_v7 }
 0x231   : > { %v4385_v22 = vunpack.i.h.bf16 %v4383_v52  ;;  %v4384_v43 = vunpack.i.l.bf16 %v4383_v52  ;;  %v3072_v27 = vsel %vm674_vm11, %v3071_v44, %v4399_v57  ;;  %v3464_v52 = vsel %vm674_vm11, %v3463_v28, %v4400_v60  ;;  %v3869_v28 = vld [vmem:[%s7298_s1] sm:$0xff] }
 0x232   : > { %v3073_v38 = vsel %vm676_vm12, %v3072_v27, %v4409_v50  ;;  %v3465_v62 = vsel %vm676_vm12, %v3464_v52, %v4410_v26 }
 0x233   : > { %v2282_v56 = vsel %vm680_vm14, %v2281_v53, %v4384_v43  ;;  %v2674_v5 = vsel %vm680_vm14, %v2673_v59, %v4385_v22 }
 0x234   : > { %v4393_v31 = vpop.permute.xlu0 %4392  ;;  %v4083_v23 = vpack.c.bf16 %v2674_v5, %v2282_v56  ;;  %v4418_v46 = vpop.permute.xlu1 %4417 }
 0x235   : > { %v4395_v9 = vunpack.i.h.bf16 %v4393_v31  ;;  %v4394_v17 = vunpack.i.l.bf16 %v4393_v31  ;;  %v4420_v56 = vunpack.i.h.bf16 %v4418_v46  ;;  %v4419_v5 = vunpack.i.l.bf16 %v4418_v46 }
 0x236   : > { %4084 = vmatpush1.bf16.msra.mxu0 %v4083_v23 }
 0x237   : > { %v3471_v4 = vsel %vm674_vm11, %v3470_v51, %v4395_v9  ;;  %v3079_v21 = vsel %vm674_vm11, %v3078_v13, %v4394_v17  ;;  %v3466_v46 = vsel %vm678_vm13, %v3465_v62, %v4420_v56 }
 0x238   : > { %v3827_v29 = vpop.permute.xlu1 %3826 }
 0x239   : > { %v4403_v55 = vpop.permute.xlu0 %4402  ;;  %v3860_v58 = vsel %vm668_vm8, %v3789_v15, %v3827_v29 }
 0x23a   : > { %v4405_v3 = vunpack.i.h.bf16 %v4403_v55  ;;  %v4404_v8 = vunpack.i.l.bf16 %v4403_v55  ;;  %v3074_v55 = vsel %vm678_vm13, %v3073_v38, %v4419_v5 }
 0x23c   : > { %v3080_v22 = vsel %vm676_vm12, %v3079_v21, %v4404_v8  ;;  %v3472_v43 = vsel %vm676_vm12, %v3471_v4, %v4405_v3 }
 0x23d   : > { %v4413_v11 = vpop.permute.xlu0 %4412 }
 0x23e   : > { %v4415_v37 = vunpack.i.h.bf16 %v4413_v11  ;;  %v4414_v14 = vunpack.i.l.bf16 %v4413_v11 }
 0x240   : > { %v3081_v31 = vsel %vm678_vm13, %v3080_v22, %v4414_v14  ;;  %v3473_v7 = vsel %vm678_vm13, %v3472_v43, %v4415_v37 }
 0x241   : > { %v4423_v49 = vpop.permute.xlu0 %4422 }
 0x242   : > { %v4425_v53 = vunpack.i.h.bf16 %v4423_v49  ;;  %v4424_v59 = vunpack.i.l.bf16 %v4423_v49 }
 0x243   : > { %v3799_v23 = vpop.permute.xlu1 %3798 }
 0x244   : > { %v3082_v47 = vsel %vm680_vm14, %v3081_v31, %v4424_v59  ;;  %v3474_v25 = vsel %vm680_vm14, %v3473_v7, %v4425_v53  ;;  %v3853_v18 = vsel %vm668_vm8, %v3653_v39, %v3799_v23 }
 0x245   : > { %v4428_v54 = vpop.permute.xlu0 %4427  ;;  %v4085_v30 = vpack.c.bf16 %v3474_v25, %v3082_v47 }
 0x246   : > { %v4430_v33 = vunpack.i.h.bf16 %v4428_v54  ;;  %v4429_v0 = vunpack.i.l.bf16 %v4428_v54 }
 0x247   : > { %v3803_v48 = vpop.permute.xlu1 %3802  ;;  %4086 = vmatprep.subr.bf16.mxu0 %v4085_v30 }
 0x248   : > { %v3075_v63 = vsel %vm680_vm14, %v3074_v55, %v4429_v0  ;;  %v3467_v6 = vsel %vm680_vm14, %v3466_v46, %v4430_v33  ;;  %v3854_v36 = vsel %vm670_vm9, %v3853_v18, %v3803_v48 }
 0x249   : > { %v3831_v12 = vpop.permute.xlu0 %3830  ;;  %v4087_v16 = vpack.c.bf16 %v3467_v6, %v3075_v63 }
 0x24a   : > { %v3861_v41 = vsel %vm670_vm9, %v3860_v58, %v3831_v12 }
 0x24b   : > { %v3807_v24 = vpop.permute.xlu1 %3806  ;;  %4088 = vmatpush1.bf16.msra.mxu0 %v4087_v16 }
 0x24c   : > { %v3855_v9 = vsel %vm672_vm10, %v3854_v36, %v3807_v24 }
 0x24d   : > { %v3835_v45 = vpop.permute.xlu0 %3834 }
 0x24e   : > { %v3862_v40 = vsel %vm672_vm10, %v3861_v41, %v3835_v45 }
 0x24f   : > { %v3811_v20 = vpop.permute.xlu1 %3810 }
 0x250   : > { %v3856_v35 = vsel %vm674_vm11, %v3855_v9, %v3811_v20 }
 0x251   : > { %v3839_v1 = vpop.permute.xlu0 %3838 }
 0x252   : > { %v3863_v17 = vsel %vm674_vm11, %v3862_v40, %v3839_v1 }
 0x253   : > { %v3815_v34 = vpop.permute.xlu1 %3814 }
 0x254   : > { %v3857_v2 = vsel %vm676_vm12, %v3856_v35, %v3815_v34 }
 0x255   : > { %v3843_v61 = vpop.permute.xlu0 %3842 }
 0x256   : > { %v3864_v10 = vsel %vm676_vm12, %v3863_v17, %v3843_v61 }
 0x257   : > { %v3819_v42 = vpop.permute.xlu1 %3818 }
 0x258   : > { %v3858_v11 = vsel %vm678_vm13, %v3857_v2, %v3819_v42 }
 0x259   : > { %v3847_v19 = vpop.permute.xlu0 %3846 }
 0x25a   : > { %v3865_v32 = vsel %vm678_vm13, %v3864_v10, %v3847_v19 }
 0x25b   : > { %v3823_v15 = vpop.permute.xlu1 %3822 }
 0x25c   : > { %v3859_v3 = vsel %vm680_vm14, %v3858_v11, %v3823_v15 }
 0x25d   : > { %v3851_v39 = vpop.permute.xlu0 %3850 }
 0x25e   : > { %v3866_v44 = vsel %vm680_vm14, %v3865_v32, %v3851_v39 }
 0x25f   : > { %3914 = vmatprep.subr.mxu0 %v3866_v44 }
 0x260   : > { %3915 = vmatpush1.msra.mxu0 %v3859_v3 }
 0x261   : > { %4065 = vmatmul.mubr.msk.f32.vlgmr.msra.gmra.mrb[0].mxu0 %vm3894_vm15, %v3869_v28 }
 0x26e   : > { %v3892_v8 = vpop.permute.xlu0 %3891 }
 0x334   : > { %v3964_v60 = vpop.f32.mrb[0].mxu0 }
 0x335   : > { %v3965_v57 = vadd.f32 %v3964_v60, %v3892_v8  ;;  %v3966_v29 = vpop.f32.mrb[1].mxu0 }
 0x336   : > { %v3967_v37 = vadd.f32 %v3966_v29, %v3892_v8 }
 0x337   : > { %3969 = vst [vmem:[%s188_s11] sm:$0xff] %v3965_v57 }
 0x338   : > { %3970 = vst [vmem:[%s188_s11 + $0x8] sm:$0xff] %v3967_v37 }
 0x339   : > { %4481 = shalt.err (!%p4478_p2)
}
 0x33a   : > { %s4482_s5 = scalar_lea.hbm %s7253_s7, 256  ;;  %s4486_s27 = scalar_lea.hbm %s7300_s3, 512 }
 0x33b   : > { %p4483_p4 = scmp.ne.s32.totalorder %s7253_s7, %s4482_s5  ;;  %p4487_p9 = scmp.lt.u32.totalorder %s7253_s7, %s7300_s3 }
 0x33c   : > { %p4488_p1 = scmp.lt.u32.totalorder %s4486_s27, %s4482_s5  ;;  %p4490_p6 = scmp.lt.u32.totalorder %s4482_s5, %s7253_s7 }
 0x33d   : > { %p4484_p5 = pnand %p4483_p4, %p7726_p11 }
 0x33e   : > { %p4489_p3 = por %p4488_p1, %p4487_p9 }
 0x33f   : > { %p4485_p7 = pneg %p4484_p5 }
 0x340   : > { %p4491_p12 = por %p4490_p6, %p4489_p3 }
 0x342   : > { %p4492_p13 = pnand %p4491_p12, %p4485_p7 }
 0x344   : > { %4495 = shalt.err (!%p4492_p13)
}
 0x345   : > { %4091 = dma.vmem_to_hbm [thread:$0]  (%p7726_p11), %s7255_s23, 256, %s7253_s7, %s3972_s8  }
 0x346 PF: > { %s3998_s30 = sand.u32 1, %s4522_s12   ;;  %p7727_p8 = scmp.ne.s32.totalorder %s7441_s25, 0 }
 0x347   : > { %p7728_p10 = scmp.ge.s32.totalorder %s4534_s15, 2  ;;  %s3999_s9 = scalar_lea.sflag [#allocation6], %s3998_s30 }
 0x349   : > { %p4098_p0 = pnand %p7728_p10, %p7727_p8 }
 0x34b   : > { %4517 = dma.done.wait (!%p4098_p0), %s3999_s9, 256  }
 0x34c   : > { %4519 = vsyncadd (!%p4098_p0), %s3999_s9, 4294967040  ;;  %p16_p2 = scmp.ge.s32.totalorder %s4599_s18, 4   ;;  %s7729_s12 = smov %s4526_s13 }
 0x34d   : > { %s7730_s13 = smov %s4530_s14  ;;  %s7731_s14 = smov %s4611_s21 }
 0x34e   : > { %s7732_s15 = smov %s4599_s18  ;;  %18 = sbr.rel (!%p16_p2) target bundleno = 5 (0x5), region = 78 }
 0x355   :  { %4004 = vsyncpa [#allocation5], 1 }
 0x356   :  { %4006 = vsyncpa [#allocation5 + $0x1], 1 }
 0x357   :  { %4007 = vsyncpa [#allocation6], 1 }
 0x358   :  { %4009 = vsyncpa [#allocation6 + $0x1], 1 }

</bundles_post_ra>
